<compile_context>
chip_gen: v5e
topology: v5e:2x2
jax: 0.10.0
libtpu: 0.0.40
codegen_flags: <defaults>
</compile_context>

<pallas_src>
import jax
import jax.numpy as jnp
from jax.experimental import pallas as pl
from jax.experimental.pallas import tpu as pltpu


def _out_transition_kernel(x_ref, w_ref, b_ref, o_ref):
    """x_ref: (nb, C, ts) VMEM; w_ref: (C, L) VMEM; b_ref: (L,) SMEM f32; o_ref: (nb, L, ts)."""
    x = x_ref[...]                                   # native dtype, spatial on lanes
    w = w_ref[...]                                   # (C, L), same dtype as x
    n_labels = o_ref.shape[1]
    rows = []
    for l in range(n_labels):                        # n_labels is tiny; static unroll
        wl = w[:, l:l + 1][None, :, :]               # (1, C, 1) -> lane / batch broadcast
        # VPU multiply in the input dtype, cross-sublane (XLU) reduce over channels with
        # f32 accumulation. Per-lane, so any garbage in a ragged last tile stays confined
        # to dropped lanes.
        acc = jnp.sum(x * wl, axis=1, keepdims=True, dtype=jnp.float32)   # (nb, 1, ts)
        rows.append(jax.nn.sigmoid(acc + b_ref[l]))  # scalar bias from SMEM
    out = rows[0] if n_labels == 1 else jnp.concatenate(rows, axis=1)     # (nb, L, ts)
    o_ref[...] = out.astype(o_ref.dtype)             # single lane-dense store


def output_transition_pallas(x, weight, bias, *, target_slab_bytes=None):
    """Conv3d(C->L, kernel_size=1) + Sigmoid on NCDHW input (channels-first Pallas kernel).

    x: (N, C, D, H, W); weight: (L, C, 1, 1, 1); bias: (L,). Returns (N, L, D, H, W).
    """
    N, C, D, H, W = x.shape
    L = weight.shape[0]
    S = D * H * W

    x3 = x.reshape(N, C, S)                                  # free view, no transpose
    w_cl = weight.reshape(L, C).T.astype(x.dtype)            # (C, L) column(s)
    b = bias.reshape(L).astype(jnp.float32)                  # (L,) -> SMEM scalars

    itemsize = jnp.dtype(x.dtype).itemsize
    out_itemsize = itemsize

    # Generation-aware slab target: ~1/16 of physical VMEM, clamped to [1 MiB, 8 MiB].
    # (v7x: 64 MiB/TC -> 4 MiB slab; v5e/v6e: 128 MiB -> 8 MiB slab.)
    if target_slab_bytes is None:
        try:
            vmem_cap = int(pltpu.get_tpu_info().vmem_capacity_bytes)
        except Exception:
            vmem_cap = 64 << 20                              # conservative (v7x per-TC)
        target_slab_bytes = int(min(max(vmem_cap // 16, 1 << 20), 8 << 20))

    ts_cap = max(128, (target_slab_bytes // (C * itemsize)) // 128 * 128)

    if S <= ts_cap:
        ts, grid_s = S, 1                                    # one full-DHW block per step
        # Batch N per step up to the slab target. nb is an exact divisor of N (no ragged
        # leading-dim blocks); prefer configurations with >= 2 grid steps (v7x megacore).
        nb_budget = max(1, target_slab_bytes // max(1, C * S * itemsize))
        divisors = [d for d in range(1, N + 1) if N % d == 0 and d <= nb_budget]
        two_step = [d for d in divisors if N // d >= 2]
        nb = max(two_step) if two_step else max(divisors)
        grid_n = N // nb
        if grid_n * grid_s < 2 and S >= 256:
            # Single-image decode: split S so both v7x TensorCores get work.
            ts = pl.cdiv(pl.cdiv(S, 2), 128) * 128
            grid_s = pl.cdiv(S, ts)                          # ragged tail: OOB writes dropped
    else:
        nb, grid_n = 1, N
        ts, grid_s = ts_cap, pl.cdiv(S, ts_cap)              # ragged tail: OOB writes dropped

    # Explicit scoped-VMEM budget: 2x double-buffered in/out + one f32-sized temporary
    # + generous margin for Mosaic internals. (Matters on v5e's 16 MiB scoped default.)
    in_bytes = nb * C * ts * itemsize
    out_bytes = nb * L * ts * out_itemsize
    vmem_limit = 2 * in_bytes + 2 * out_bytes + nb * C * ts * 4 + (8 << 20)
    vmem_limit = int(min(max(vmem_limit, 32 << 20), 100 << 20))

    cost = pl.CostEstimate(
        flops=2 * N * C * S * L,
        transcendentals=N * L * S,
        bytes_accessed=N * C * S * itemsize + N * L * S * out_itemsize + C * L * itemsize,
    )

    out3 = pl.pallas_call(
        _out_transition_kernel,
        out_shape=jax.ShapeDtypeStruct((N, L, S), x.dtype),
        grid_spec=pltpu.PrefetchScalarGridSpec(
            num_scalar_prefetch=0,
            grid=(grid_n, grid_s),
            in_specs=[
                pl.BlockSpec((nb, C, ts), lambda n, s: (n, 0, s)),     # activations
                pl.BlockSpec((C, L), lambda n, s: (0, 0)),             # weight columns
                pl.BlockSpec(memory_space=pltpu.MemorySpace.SMEM),     # bias scalars
            ],
            out_specs=pl.BlockSpec((nb, L, ts), lambda n, s: (n, 0, s)),
        ),
        compiler_params=pltpu.CompilerParams(
            dimension_semantics=("parallel", "parallel"),
            vmem_limit_bytes=vmem_limit,
        ),
        cost_estimate=cost,
    )(x3, w_cl, b)

    return out3.reshape(N, L, D, H, W)


def _reference(x, weight, bias):
    # Exact-f32 pure-JAX reference of Conv3d(k=1) + sigmoid in NCDHW.
    L, C = weight.shape[0], weight.shape[1]
    w2d = weight.reshape(L, C)
    y = jnp.einsum("ncdhw,lc->nldhw", x, w2d,
                   precision=jax.lax.Precision.HIGHEST)
    return jax.nn.sigmoid(y + bias[None, :, None, None, None])


if __name__ == "__main__":
    key = jax.random.PRNGKey(0)
    k_x, k_w, k_b, k_x2, k_w2, k_b2 = jax.random.split(key, 6)

    # Shapes implied by the module: out_tr = OutputTransition(inChans=64, n_labels=n_class=1).
    N, C, D, H, W = 2, 64, 16, 16, 16
    L = 1
    x = jax.random.normal(k_x, (N, C, D, H, W), dtype=jnp.float32)
    weight = jax.random.normal(k_w, (L, C, 1, 1, 1), dtype=jnp.float32) * 0.1
    bias = jax.random.normal(k_b, (L,), dtype=jnp.float32) * 0.1

    out = jax.block_until_ready(output_transition_pallas(x, weight, bias))
    ref = _reference(x, weight, bias)
    assert out.shape == (N, L, D, H, W)
    assert jnp.allclose(out, ref, atol=1e-5, rtol=1e-5), float(jnp.max(jnp.abs(out - ref)))

    # Ragged spatial tail (S = 500, not a multiple of 128), single-image megacore split,
    # and a multi-label (L=2) head exercising the single fused store path.
    N2, C2, D2, H2, W2, L2 = 1, 64, 5, 10, 10, 2
    x2 = jax.random.normal(k_x2, (N2, C2, D2, H2, W2), dtype=jnp.float32)
    w2 = jax.random.normal(k_w2, (L2, C2, 1, 1, 1), dtype=jnp.float32) * 0.1
    b2 = jax.random.normal(k_b2, (L2,), dtype=jnp.float32) * 0.1
    out2 = jax.block_until_ready(output_transition_pallas(x2, w2, b2))
    ref2 = _reference(x2, w2, b2)
    assert out2.shape == (N2, L2, D2, H2, W2)
    assert jnp.allclose(out2, ref2, atol=1e-5, rtol=1e-5), float(jnp.max(jnp.abs(out2 - ref2)))

    # Force the multi-spatial-tile (ts_cap) path with a tiny slab target.
    out3 = jax.block_until_ready(
        output_transition_pallas(x2, w2, b2, target_slab_bytes=64 * 128 * 4))
    assert jnp.allclose(out3, ref2, atol=1e-5, rtol=1e-5), float(jnp.max(jnp.abs(out3 - ref2)))

    print("KERNEL_OK")
</pallas_src>

<mosaic_0001>
module attributes {stable_mosaic.version = 11 : i64} {
  func.func @_out_transition_kernel(%arg0: i32, %arg1: i32, %arg2: memref<1x64x4096xf32, #tpu.memory_space<vmem>>, %arg3: memref<64x1xf32, #tpu.memory_space<vmem>>, %arg4: memref<1xf32, #tpu.memory_space<smem>>, %arg5: memref<1x1x4096xf32, #tpu.memory_space<vmem>>) attributes {dimension_semantics = [#tpu.dimension_semantics<parallel>, #tpu.dimension_semantics<parallel>], iteration_bounds = array<i64: 2, 1>, scalar_prefetch = 0 : i64, scratch_operands = 0 : i64, tpu.core_type = #tpu.core_type<tc>, window_params = [{transform_indices = @transform_0, window_bounds = array<i64: 1, 64, 4096>}, {pipeline_mode = #tpu.pipeline_mode<synchronous>, transform_indices = @transform_1, window_bounds = array<i64: 64, 1>}, {transform_indices = @transform_2, window_bounds = array<i64: 1>}, {transform_indices = @transform_3, window_bounds = array<i64: 1, 1, 4096>}]} {
    %c0 = arith.constant 0 : index
    %c0_0 = arith.constant 0 : index
    %c0_1 = arith.constant 0 : index
    %0 = vector.load %arg2[%c0, %c0_0, %c0_1] : memref<1x64x4096xf32, #tpu.memory_space<vmem>>, vector<1x64x4096xf32>
    %c0_2 = arith.constant 0 : index
    %c0_3 = arith.constant 0 : index
    %1 = vector.load %arg3[%c0_2, %c0_3] : memref<64x1xf32, #tpu.memory_space<vmem>>, vector<64x1xf32>
    %2 = vector.shape_cast %1 : vector<64x1xf32> to vector<1x64x1xf32>
    %3 = vector.broadcast %2 : vector<1x64x1xf32> to vector<1x64x4096xf32>
    %4 = arith.mulf %0, %3 : vector<1x64x4096xf32>
    %cst = arith.constant dense<0.000000e+00> : vector<1x4096xf32>
    %5 = vector.multi_reduction <add>, %4, %cst [1] : vector<1x64x4096xf32> to vector<1x4096xf32>
    %6 = vector.shape_cast %5 : vector<1x4096xf32> to vector<1x1x4096xf32>
    %c0_4 = arith.constant 0 : index
    %7 = memref.load %arg4[%c0_4] : memref<1xf32, #tpu.memory_space<smem>>
    %8 = vector.broadcast %7 : f32 to vector<1x1x4096xf32>
    %9 = arith.addf %6, %8 : vector<1x1x4096xf32>
    %10 = arith.negf %9 : vector<1x1x4096xf32>
    %11 = math.exp %10 : vector<1x1x4096xf32>
    %cst_5 = arith.constant 1.000000e+00 : f32
    %12 = vector.broadcast %cst_5 : f32 to vector<1x1x4096xf32>
    %13 = arith.addf %12, %11 : vector<1x1x4096xf32>
    %14 = arith.divf %12, %13 : vector<1x1x4096xf32>
    %c0_6 = arith.constant 0 : index
    %c0_7 = arith.constant 0 : index
    %c0_8 = arith.constant 0 : index
    %15 = vector.load %arg5[%c0_6, %c0_7, %c0_8] : memref<1x1x4096xf32, #tpu.memory_space<vmem>>, vector<1x1x4096xf32>
    tpu.vector_store %arg5[%c0_6, %c0_7, %c0_8], %14 {strides = array<i32>} : memref<1x1x4096xf32, #tpu.memory_space<vmem>>, vector<1x1x4096xf32>,
    return
  }
  func.func @transform_0(%arg0: i32, %arg1: i32) -> (i32, i32, i32) {
    %c0_i32 = arith.constant 0 : i32
    %c0_i32_0 = arith.constant 0 : i32
    return %arg0, %c0_i32, %arg1 : i32, i32, i32
  }
  func.func @transform_1(%arg0: i32, %arg1: i32) -> (i32, i32) {
    %c0_i32 = arith.constant 0 : i32
    %c0_i32_0 = arith.constant 0 : i32
    %c0_i32_1 = arith.constant 0 : i32
    return %c0_i32, %c0_i32_0 : i32, i32
  }
  func.func @transform_2(%arg0: i32, %arg1: i32) -> i32 {
    %c0_i32 = arith.constant 0 : i32
    %c0_i32_0 = arith.constant 0 : i32
    return %c0_i32 : i32
  }
  func.func @transform_3(%arg0: i32, %arg1: i32) -> (i32, i32, i32) {
    %c0_i32 = arith.constant 0 : i32
    %c0_i32_0 = arith.constant 0 : i32
    return %arg0, %c0_i32, %arg1 : i32, i32, i32
  }
}

</mosaic_0001>

<bundles_post_ra>
// kernel: tpu_custom_call.1
= control target key start
LH: loop header
LB: loop body
LE: loop exit
PB: predicated region body
PF: predicated region fallthrough
CT: control target
= control target key end

     0   :  { %s5084_s0 = inlined_call_operand.hbm [shape: f32[2,64,4096], index: 0, kind: input, shape index: {}]   ;;  %s5085_s1 = inlined_call_operand.vmem [shape: f32[64,1], index: 1, kind: input, shape index: {}]   ;;  %s5086_s2 = inlined_call_operand.<no memory space> [shape: f32[1], index: 2, kind: input, shape index: {}]   ;;  %s5087_s3 = inlined_call_operand.hbm [shape: f32[2,1,4096], index: 3, kind: output, shape index: {}]  }
   0x1   :  { %8 = sst [smem:[#allocation2]] %s5086_s2 }
   0x2   :  { %9 = vsyncpa [#allocation4], 0 }
   0x3   :  { %11 = vsyncpa [#allocation4 + $0x1], 0 }
   0x4   :  { %12 = vsyncpa [#allocation5], 0 }
   0x5   :  { %14 = vsyncpa [#allocation5 + $0x1], 0  ;;  %s2417_s14 = smov 0   ;;  %s2419_s15 = smov 0  }
   0x6   :  { %s2421_s16 = smov 0   ;;  %s2423_s17 = smov 0  }
   0x7   :  { %s2425_s18 = smov 0   ;;  %s2427_s19 = smov 0  }
   0x8 LB: > { %s2034_s2 = sadd.s32 4294967295, %s2389_s19   ;;  %s2035_s20 = sadd.s32 4294967294, %s2389_s19   ;;  %s2389_s19 = sphi %s2427_s19, %s20_s19   ;;  %s2385_s18 = sphi %s2425_s18, %s5644_s18   ;;  %s2381_s17 = sphi %s2423_s17, %s5643_s17   ;;  %s2377_s16 = sphi %s2421_s16, %s5642_s16   ;;  %s2373_s15 = sphi %s2419_s15, %s5641_s15   ;;  %s2369_s14 = sphi %s2417_s14, %s5640_s14  }
   0x9   : > { %s32_s21 = sadd.s32 1, %s2385_s18  ;;  %s41_s22 = sadd.s32 1, %s2377_s16 }
   0xa   : > { %p34_p0 = scmp.ge.s32.totalorder %s32_s21, 2  ;;  %p48_p1 = scmp.ne.s32.totalorder %s2377_s16, %s2373_s15 }
   0xb   : > { %p49_p2 = scmp.eq.s32.totalorder %s2389_s19, 0  ;;  %p54_p3 = scmp.ne.s32.totalorder %s2373_s15, %s2369_s14 }
   0xc   : > { %s5646_s21 = smov (%p34_p0, %s32_s21), 0  ;;  %p55_p5 = scmp.eq.s32.totalorder %s2034_s2, 0 }
   0xd   : > { %p2458_p4 = por %p49_p2, %p48_p1  ;;  %s36_s24 = ssub.s32 %s2385_s18, %s5646_s21 }
   0xe   : > { %p122_p6 = scmp.eq.s32.totalorder %s2034_s2, 1  ;;  %p39_p7 = scmp.eq.s32.totalorder %s36_s24, 0 }
   0xf   : > { %p2464_p8 = por %p55_p5, %p54_p3  ;;  %p128_p10 = scmp.eq.s32.totalorder %s2035_s20, 1 }
  0x10   : > { %p2468_p9 = por %p122_p6, %p48_p1  ;;  %p2037_p12 = scmp.ge.s32.totalorder %s2389_s19, 2 }
  0x11   : > { %s2473_s27 = scalar_select %p39_p7, %s2377_s16, %s41_s22  }
  0x12   : > { %p2475_p11 = por %p128_p10, %p54_p3  ;;  %p2093_p13 = scmp.lt.s32.totalorder %s2389_s19, 2 }
  0x13   : > { %s154_s29 = sand.u32 1, %s2377_s16   ;;  %s2080_s4 = sshll.u32 %s2385_s18, 11 }
  0x14   : > { %s2038_s30 = sshll.u32 %s154_s29, 11  ;;  %s165_s7 = scalar_lea.hbm %s5084_s0, %s2080_s4 }
  0x15   : > { %s158_s8 = scalar_lea.vmem [#allocation3], %s2038_s30  ;;  %s166_s10 = sshll.u32 %s165_s7, 4  ;;  %s167_s10 = int_to_ptr.hbm [resolvable:$true] %s166_s10 }
  0x16   : > { %s168_s9 = sshll.u32 %s158_s8, 4  ;;  %p2086_p0 = pnand %p2093_p13, %p2458_p4  ;;  %s169_s9 = int_to_ptr.vmem [resolvable:$true] %s168_s9 }
  0x17   : > { %p2041_p1 = scmp.ge.s32.totalorder %s2389_s19, 1  ;;  %s155_s11 = scalar_lea.sflag [#allocation4], %s154_s29 }
  0x18   : > { %s2391_s12 = smov 4096   ;;  %s2392_s13 = smov 256  }
  0x19   : > { %2088 = dma.hbm_to_vmem [thread:$0]  (!%p2086_p0), %s167_s10, 32768, %s169_s9, %s155_s11, %s2391_s12, %s2391_s12, %s2392_s13  }
  0x1a   : > { %p176_p2 = scmp.lt.s32.totalorder %s2389_s19, 3 }
  0x1c   : > { %p177_p3 = pnand %p2041_p1, %p176_p2 }
  0x1e   : > { %180 = sbr.rel (%p177_p3) target bundleno = 598 (0x256), region = 32 }
  0x23   : > { %s2491_s2 = sand.u32 1, %s2373_s15  }
  0x24   : > { %s2042_s20 = sshll.u32 %s2491_s2, 11  ;;  %s183_s22 = scalar_lea.sflag [#allocation4], %s2491_s2 }
  0x25   : > { %s2495_s24 = scalar_lea.vmem [#allocation3], %s2042_s20 }
  0x26   : > { %2360 = dma.done.wait (%p2464_p8), %s183_s22, 32768  }
  0x27   : > { %2362 = vsyncadd (%p2464_p8), %s183_s22, 4294934528  ;;  %v2393_v0 = vmov 0   ;;  %v470_v1 = vld [vmem:[%s5085_s1 + $0x10] sm:$0xff]  ;;  %v468_v2 = vld [vmem:[%s5085_s1] sm:$0xff]  ;;  %s2043_s23 = sshll.u32 %s2491_s2, 5  ;;  %s2077_s29 = sshll.u32 %s2381_s17, 5 }
  0x28   : > { %2147 = vset.pattern.permute.xlu1 %v2393_v0  ;;  %2146 = vset.pattern.permute.xlu0 %v2393_v0  ;;  %v472_v3 = vld [vmem:[%s5085_s1 + $0x20] sm:$0xff]  ;;  %v471_v4 = vld [vmem:[%s5085_s1 + $0x18] sm:$0xff]  ;;  %v469_v5 = vld [vmem:[%s5085_s1 + $0x8] sm:$0xff]  ;;  %s5021_s4 = scalar_lea.hbm %s5087_s3, %s2077_s29  ;;  %s209_s5 = scalar_lea.vmem [#allocation6], %s2043_s23 }
  0x29   : > { %2148 = vset.pattern.permute.xlu2 %v2393_v0  ;;  %488 = vperm.xlu1 %2147, %v470_v1   ;;  %v473_v6 = vld [vmem:[%s5085_s1 + $0x28] sm:$0xff]  ;;  %v475_v7 = vld [vmem:[%s5085_s1 + $0x38] sm:$0xff]  ;;  %v474_v8 = vld [vmem:[%s5085_s1 + $0x30] sm:$0xff]  ;;  %s1948_s6 = sshll.u32 %s209_s5, 4  ;;  %s1950_s25 = sshll.u32 %s5021_s4, 4  ;;  %s1949_s6 = int_to_ptr.vmem [resolvable:$true] %s1948_s6  ;;  %s1951_s25 = int_to_ptr.hbm [resolvable:$true] %s1950_s25 }
  0x2a   : > { %478 = vperm.xlu0 %2146, %v468_v2   ;;  %498 = vperm.xlu2 %2148, %v472_v3   ;;  %v212_v10 = vld [vmem:[%s2495_s24] sm:$0xff]  ;;  %v213_v11 = vld [vmem:[%s2495_s24 + $0x8] sm:$0xff]  ;;  %v214_v12 = vld [vmem:[%s2495_s24 + $0x10] sm:$0xff]  ;;  %s1934_s7 = scalar_lea.sflag [#allocation5], %s2491_s2  ;;  %s2321_s8 = sshra.s32 %s1951_s25, 4  ;;  %s2322_s8 = int_to_ptr.hbm [resolvable:$true] %s2321_s8 }
  0x2b   : > { %v215_v13 = vld [vmem:[%s2495_s24 + $0x18] sm:$0xff]  ;;  %v216_v14 = vld [vmem:[%s2495_s24 + $0x20] sm:$0xff]  ;;  %v217_v15 = vld [vmem:[%s2495_s24 + $0x28] sm:$0xff]  ;;  %s2323_s9 = scalar_lea.hbm %s2322_s8, 32  ;;  %s2327_s12 = scalar_lea.hbm %s5087_s3, 64 }
  0x2c   : > { %v218_v16 = vld [vmem:[%s2495_s24 + $0x30] sm:$0xff]  ;;  %v219_v17 = vld [vmem:[%s2495_s24 + $0x38] sm:$0xff]  ;;  %v220_v18 = vld [vmem:[%s2495_s24 + $0x40] sm:$0xff]  ;;  %p2324_p4 = scmp.ne.s32.totalorder %s2322_s8, %s2323_s9  ;;  %p2328_p7 = scmp.lt.s32.totalorder %s2322_s8, %s5087_s3 }
  0x2d   : > { %v221_v19 = vld [vmem:[%s2495_s24 + $0x48] sm:$0xff]  ;;  %v222_v20 = vld [vmem:[%s2495_s24 + $0x50] sm:$0xff]  ;;  %v223_v21 = vld [vmem:[%s2495_s24 + $0x58] sm:$0xff]  ;;  %p2329_p8 = scmp.lt.s32.totalorder %s2327_s12, %s2323_s9 }
  0x2e   : > { %v224_v22 = vld [vmem:[%s2495_s24 + $0x60] sm:$0xff]  ;;  %v225_v23 = vld [vmem:[%s2495_s24 + $0x68] sm:$0xff]  ;;  %v226_v24 = vld [vmem:[%s2495_s24 + $0x70] sm:$0xff]  ;;  %p2325_p5 = pnand %p2324_p4, %p2468_p9 }
  0x2f   : > { %v227_v25 = vld [vmem:[%s2495_s24 + $0x78] sm:$0xff]  ;;  %v228_v26 = vld [vmem:[%s2495_s24 + $0x80] sm:$0xff]  ;;  %v229_v27 = vld [vmem:[%s2495_s24 + $0x88] sm:$0xff]  ;;  %p2330_p10 = por %p2329_p8, %p2328_p7 }
  0x30   : > { %v230_v28 = vld [vmem:[%s2495_s24 + $0x90] sm:$0xff]  ;;  %v231_v29 = vld [vmem:[%s2495_s24 + $0x98] sm:$0xff]  ;;  %v232_v30 = vld [vmem:[%s2495_s24 + $0xa0] sm:$0xff]  ;;  %p2326_p6 = pneg %p2325_p5 }
  0x31   : > { %493 = vperm.xlu1 %2147, %v471_v4   ;;  %v233_v32 = vld [vmem:[%s2495_s24 + $0xa8] sm:$0xff]  ;;  %v234_v33 = vld [vmem:[%s2495_s24 + $0xb0] sm:$0xff]  ;;  %v235_v34 = vld [vmem:[%s2495_s24 + $0xb8] sm:$0xff] }
  0x32   : > { %483 = vperm.xlu0 %2146, %v469_v5   ;;  %503 = vperm.xlu2 %2148, %v473_v6   ;;  %v236_v35 = vld [vmem:[%s2495_s24 + $0xc0] sm:$0xff]  ;;  %v237_v40 = vld [vmem:[%s2495_s24 + $0xc8] sm:$0xff]  ;;  %v238_v41 = vld [vmem:[%s2495_s24 + $0xd0] sm:$0xff]  ;;  %p2331_p13 = pnand %p2330_p10, %p2326_p6 }
  0x33   : > { %v239_v42 = vld [vmem:[%s2495_s24 + $0xd8] sm:$0xff]  ;;  %v240_v43 = vld [vmem:[%s2495_s24 + $0xe0] sm:$0xff]  ;;  %v241_v48 = vld [vmem:[%s2495_s24 + $0xe8] sm:$0xff] }
  0x34   : > { %v242_v49 = vld [vmem:[%s2495_s24 + $0xf0] sm:$0xff]  ;;  %v243_v50 = vld [vmem:[%s2495_s24 + $0xf8] sm:$0xff]  ;;  %v244_v51 = vld [vmem:[%s2495_s24 + $0x100] sm:$0xff] }
  0x35   : > { %v245_v56 = vld [vmem:[%s2495_s24 + $0x108] sm:$0xff]  ;;  %v246_v57 = vld [vmem:[%s2495_s24 + $0x110] sm:$0xff]  ;;  %v247_v58 = vld [vmem:[%s2495_s24 + $0x118] sm:$0xff] }
  0x36   : > { %v248_v59 = vld [vmem:[%s2495_s24 + $0x120] sm:$0xff]  ;;  %v249_v1 = vld [vmem:[%s2495_s24 + $0x128] sm:$0xff]  ;;  %v250_v2 = vld [vmem:[%s2495_s24 + $0x130] sm:$0xff] }
  0x37   : > { %v251_v3 = vld [vmem:[%s2495_s24 + $0x138] sm:$0xff]  ;;  %v252_v4 = vld [vmem:[%s2495_s24 + $0x140] sm:$0xff] }
  0x39   : > { %513 = vperm.xlu1 %2147, %v475_v7  }
  0x3a   : > { %508 = vperm.xlu0 %2146, %v474_v8  }
  0x9c   : > { %v2525_v9 = vpop.permute.xlu0 %478 }
  0x9d   : > { %v2549_v31 = vmul.f32 %v2525_v9, %v212_v10  ;;  %v2556_v36 = vmul.f32 %v2525_v9, %v213_v11  ;;  %v2559_v37 = vmul.f32 %v2525_v9, %v214_v12  ;;  %v2562_v38 = vmul.f32 %v2525_v9, %v215_v13  ;;  %v253_v10 = vld [vmem:[%s2495_s24 + $0x148] sm:$0xff]  ;;  %v254_v11 = vld [vmem:[%s2495_s24 + $0x150] sm:$0xff]  ;;  %v255_v12 = vld [vmem:[%s2495_s24 + $0x158] sm:$0xff] }
  0x9e   : > { %v2565_v39 = vmul.f32 %v2525_v9, %v216_v14  ;;  %v2572_v44 = vmul.f32 %v2525_v9, %v217_v15  ;;  %v2575_v45 = vmul.f32 %v2525_v9, %v218_v16  ;;  %v2578_v46 = vmul.f32 %v2525_v9, %v219_v17  ;;  %v256_v13 = vld [vmem:[%s2495_s24 + $0x160] sm:$0xff] }
  0x9f   : > { %v2581_v47 = vmul.f32 %v2525_v9, %v220_v18  ;;  %v2588_v52 = vmul.f32 %v2525_v9, %v221_v19  ;;  %v2591_v53 = vmul.f32 %v2525_v9, %v222_v20  ;;  %v2594_v54 = vmul.f32 %v2525_v9, %v223_v21  ;;  %v257_v18 = vld [vmem:[%s2495_s24 + $0x168] sm:$0xff]  ;;  %v258_v19 = vld [vmem:[%s2495_s24 + $0x170] sm:$0xff]  ;;  %v259_v20 = vld [vmem:[%s2495_s24 + $0x178] sm:$0xff] }
  0xa0   : > { %v2597_v55 = vmul.f32 %v2525_v9, %v224_v22  ;;  %v2604_v60 = vmul.f32 %v2525_v9, %v225_v23  ;;  %v2607_v61 = vmul.f32 %v2525_v9, %v226_v24  ;;  %v2610_v62 = vmul.f32 %v2525_v9, %v227_v25  ;;  %v260_v21 = vld [vmem:[%s2495_s24 + $0x180] sm:$0xff] }
  0xa1   : > { %5104 = vst [vmem:[#allocation9_spill] sm:$0xff] %v2581_v47  ;;  %v2613_v63 = vmul.f32 %v2525_v9, %v228_v26  ;;  %v2622_v5 = vmul.f32 %v2525_v9, %v229_v27  ;;  %v2625_v6 = vmul.f32 %v2525_v9, %v230_v28  ;;  %v2628_v7 = vmul.f32 %v2525_v9, %v231_v29  ;;  %v261_v26 = vld [vmem:[%s2495_s24 + $0x188] sm:$0xff]  ;;  %v262_v27 = vld [vmem:[%s2495_s24 + $0x190] sm:$0xff]  ;;  %v263_v28 = vld [vmem:[%s2495_s24 + $0x198] sm:$0xff] }
  0xa2   : > { %5105 = vst [vmem:[#allocation10_spill] sm:$0xff] %v2588_v52  ;;  %v2631_v8 = vmul.f32 %v2525_v9, %v232_v30  ;;  %v2638_v14 = vmul.f32 %v2525_v9, %v233_v32  ;;  %v2641_v15 = vmul.f32 %v2525_v9, %v234_v33  ;;  %v2644_v16 = vmul.f32 %v2525_v9, %v235_v34  ;;  %v264_v29 = vld [vmem:[%s2495_s24 + $0x1a0] sm:$0xff]  ;;  %v339_v52 = vld [vmem:[%s2495_s24 + $0x3f8] sm:$0xff]  ;;  %v342_v47 = vld [vmem:[%s2495_s24 + $0x410] sm:$0xff] }
  0xa3   : > { %5106 = vst [vmem:[#allocation11_spill] sm:$0xff] %v2591_v53  ;;  %v2647_v17 = vmul.f32 %v2525_v9, %v236_v35  ;;  %v2654_v22 = vmul.f32 %v2525_v9, %v237_v40  ;;  %v2657_v23 = vmul.f32 %v2525_v9, %v238_v41  ;;  %v2660_v24 = vmul.f32 %v2525_v9, %v239_v42  ;;  %v265_v35 = vld [vmem:[%s2495_s24 + $0x1a8] sm:$0xff]  ;;  %v266_v40 = vld [vmem:[%s2495_s24 + $0x1b0] sm:$0xff]  ;;  %v267_v41 = vld [vmem:[%s2495_s24 + $0x1b8] sm:$0xff] }
  0xa4   : > { %5107 = vst [vmem:[#allocation12_spill] sm:$0xff] %v2594_v54  ;;  %v2615_v0 = vpop.permute.xlu0 %483  ;;  %v2663_v25 = vmul.f32 %v2525_v9, %v240_v43  ;;  %v2670_v30 = vmul.f32 %v2525_v9, %v241_v48  ;;  %v2673_v32 = vmul.f32 %v2525_v9, %v242_v49  ;;  %v2676_v33 = vmul.f32 %v2525_v9, %v243_v50  ;;  %v268_v42 = vld [vmem:[%s2495_s24 + $0x1c0] sm:$0xff]  ;;  %v269_v50 = vld [vmem:[%s2495_s24 + $0x1c8] sm:$0xff] }
  0xa5   : > { %5108 = vst [vmem:[#allocation13_spill] sm:$0xff] %v2597_v55  ;;  %v2679_v34 = vmul.f32 %v2615_v0, %v244_v51  ;;  %v2686_v43 = vmul.f32 %v2615_v0, %v245_v56  ;;  %v2689_v48 = vmul.f32 %v2615_v0, %v246_v57  ;;  %v2692_v9 = vmul.f32 %v2615_v0, %v247_v58  ;;  %v270_v51 = vld [vmem:[%s2495_s24 + $0x1d0] sm:$0xff]  ;;  %v311_v55 = vld [vmem:[%s2495_s24 + $0x318] sm:$0xff]  ;;  %v320_v54 = vld [vmem:[%s2495_s24 + $0x360] sm:$0xff] }
  0xa6   : > { %5109 = vst [vmem:[#allocation14_spill] sm:$0xff] %v2604_v60  ;;  %v2695_v49 = vmul.f32 %v2615_v0, %v248_v59  ;;  %v2702_v56 = vmul.f32 %v2615_v0, %v249_v1  ;;  %v2705_v57 = vmul.f32 %v2615_v0, %v250_v2  ;;  %v2708_v58 = vmul.f32 %v2615_v0, %v251_v3  ;;  %v276_v1 = vld [vmem:[%s2495_s24 + $0x200] sm:$0xff]  ;;  %v337_v53 = vld [vmem:[%s2495_s24 + $0x3e8] sm:$0xff] }
  0xa7   : > { %5110 = vst [vmem:[#allocation15_spill] sm:$0xff] %v2607_v61  ;;  %v2711_v59 = vmul.f32 %v2615_v0, %v252_v4  ;;  %v2723_v2 = vmul.f32 %v2615_v0, %v254_v11  ;;  %v2726_v3 = vmul.f32 %v2615_v0, %v255_v12  ;;  %v2729_v4 = vmul.f32 %v2615_v0, %v256_v13  ;;  %v306_v61 = vld [vmem:[%s2495_s24 + $0x2f0] sm:$0xff]  ;;  %v308_v60 = vld [vmem:[%s2495_s24 + $0x300] sm:$0xff] }
  0xa8   : > { %5111 = vst [vmem:[#allocation16_spill] sm:$0xff] %v2610_v62  ;;  %v2739_v11 = vmul.f32 %v2615_v0, %v258_v19  ;;  %v2742_v12 = vmul.f32 %v2615_v0, %v259_v20  ;;  %v2745_v13 = vmul.f32 %v2615_v0, %v260_v21  ;;  %v2755_v19 = vmul.f32 %v2615_v0, %v262_v27  ;;  %v288_v62 = vld [vmem:[%s2495_s24 + $0x260] sm:$0xff] }
  0xa9   : > { %5112 = vst [vmem:[#allocation17_spill] sm:$0xff] %v2613_v63  ;;  %v2758_v20 = vmul.f32 %v2615_v0, %v263_v28  ;;  %v2761_v21 = vmul.f32 %v2615_v0, %v264_v29  ;;  %v286_v63 = vld [vmem:[%s2495_s24 + $0x250] sm:$0xff]  ;;  %v2771_v27 = vmul.f32 %v2615_v0, %v266_v40  ;;  %v2774_v28 = vmul.f32 %v2615_v0, %v267_v41 }
  0xaa   : > { %5113 = vst [vmem:[#allocation18_spill] sm:$0xff] %v2622_v5  ;;  %v284_v5 = vld [vmem:[%s2495_s24 + $0x240] sm:$0xff]  ;;  %v2777_v29 = vmul.f32 %v2615_v0, %v268_v42  ;;  %v2787_v40 = vmul.f32 %v2615_v0, %v270_v51 }
  0xab   : > { %5114 = vst [vmem:[#allocation19_spill] sm:$0xff] %v2625_v6  ;;  %v283_v6 = vld [vmem:[%s2495_s24 + $0x238] sm:$0xff] }
  0xac   : > { %5115 = vst [vmem:[#allocation20_spill] sm:$0xff] %v2628_v7  ;;  %v282_v7 = vld [vmem:[%s2495_s24 + $0x230] sm:$0xff] }
  0xad   : > { %5116 = vst [vmem:[#allocation21_spill] sm:$0xff] %v2631_v8  ;;  %v281_v8 = vld [vmem:[%s2495_s24 + $0x228] sm:$0xff] }
  0xae   : > { %5117 = vst [vmem:[#allocation22_spill] sm:$0xff] %v2638_v14  ;;  %v280_v14 = vld [vmem:[%s2495_s24 + $0x220] sm:$0xff] }
  0xaf   : > { %5118 = vst [vmem:[#allocation23_spill] sm:$0xff] %v2641_v15  ;;  %v279_v15 = vld [vmem:[%s2495_s24 + $0x218] sm:$0xff] }
  0xb0   : > { %5119 = vst [vmem:[#allocation24_spill] sm:$0xff] %v2644_v16  ;;  %v278_v16 = vld [vmem:[%s2495_s24 + $0x210] sm:$0xff] }
  0xb1   : > { %5120 = vst [vmem:[#allocation25_spill] sm:$0xff] %v2647_v17  ;;  %v277_v17 = vld [vmem:[%s2495_s24 + $0x208] sm:$0xff] }
  0xb2   : > { %5121 = vst [vmem:[#allocation26_spill] sm:$0xff] %v2654_v22  ;;  %v2720_v22 = vmul.f32 %v2615_v0, %v253_v10  ;;  %v2736_v10 = vmul.f32 %v2615_v0, %v257_v18  ;;  %v2752_v18 = vmul.f32 %v2615_v0, %v261_v26  ;;  %v2768_v26 = vmul.f32 %v2615_v0, %v265_v35 }
  0xb3   : > { %5122 = vst [vmem:[#allocation27_spill] sm:$0xff] %v2657_v23  ;;  %v275_v23 = vld [vmem:[%s2495_s24 + $0x1f8] sm:$0xff]  ;;  %v2784_v35 = vmul.f32 %v2615_v0, %v269_v50 }
  0xb4   : > { %5123 = vst [vmem:[#allocation28_spill] sm:$0xff] %v2660_v24  ;;  %v274_v24 = vld [vmem:[%s2495_s24 + $0x1f0] sm:$0xff] }
  0xb5   : > { %5124 = vst [vmem:[#allocation29_spill] sm:$0xff] %v2663_v25  ;;  %v273_v25 = vld [vmem:[%s2495_s24 + $0x1e8] sm:$0xff]  ;;  %v2803_v51 = vmul.f32 %v2615_v0, %v274_v24 }
  0xb6   : > { %5125 = vst [vmem:[#allocation30_spill] sm:$0xff] %v2670_v30  ;;  %v2713_v30 = vpop.permute.xlu1 %488  ;;  %v2800_v50 = vmul.f32 %v2615_v0, %v273_v25 }
  0xb7   : > { %5126 = vst [vmem:[#allocation31_spill] sm:$0xff] %v2673_v32  ;;  %v272_v32 = vld [vmem:[%s2495_s24 + $0x1e0] sm:$0xff]  ;;  %v2816_v25 = vmul.f32 %v2713_v30, %v277_v17  ;;  %v2819_v24 = vmul.f32 %v2713_v30, %v278_v16  ;;  %v2832_v17 = vmul.f32 %v2713_v30, %v281_v8  ;;  %v2835_v16 = vmul.f32 %v2713_v30, %v282_v7  ;;  %v309_v8 = vld [vmem:[%s2495_s24 + $0x308] sm:$0xff] }
  0xb8   : > { %5127 = vst [vmem:[#allocation32_spill] sm:$0xff] %v2676_v33  ;;  %v271_v33 = vld [vmem:[%s2495_s24 + $0x1d8] sm:$0xff]  ;;  %v2793_v42 = vmul.f32 %v2615_v0, %v272_v32  ;;  %v2809_v32 = vmul.f32 %v2713_v30, %v276_v1  ;;  %v301_v1 = vld [vmem:[%s2495_s24 + $0x2c8] sm:$0xff]  ;;  %v2851_v7 = vmul.f32 %v2713_v30, %v286_v63 }
  0xb9   : > { %5128 = vst [vmem:[#allocation33_spill] sm:$0xff] %v2711_v59  ;;  %v2790_v41 = vmul.f32 %v2615_v0, %v271_v33  ;;  %v2806_v33 = vmul.f32 %v2615_v0, %v275_v23  ;;  %v2822_v0 = vmul.f32 %v2713_v30, %v279_v15  ;;  %v2825_v23 = vmul.f32 %v2713_v30, %v280_v14 }
  0xba   : > { %5129 = vst [vmem:[#allocation34_spill] sm:$0xff] %v2720_v22  ;;  %v2838_v15 = vmul.f32 %v2713_v30, %v283_v6  ;;  %v2841_v14 = vmul.f32 %v2713_v30, %v284_v5  ;;  %v2857_v5 = vmul.f32 %v2713_v30, %v288_v62  ;;  %v338_v22 = vld [vmem:[%s2495_s24 + $0x3f0] sm:$0xff] }
  0xbb   : > { %5130 = vst [vmem:[#allocation35_spill] sm:$0xff] %v2723_v2 }
  0xbc   : > { %5131 = vst [vmem:[#allocation36_spill] sm:$0xff] %v2726_v3  ;;  %v312_v3 = vld [vmem:[%s2495_s24 + $0x320] sm:$0xff] }
  0xbd   : > { %5132 = vst [vmem:[#allocation37_spill] sm:$0xff] %v2729_v4 }
  0xbe   : > { %5133 = vst [vmem:[#allocation38_spill] sm:$0xff] %v2736_v10  ;;  %v307_v10 = vld [vmem:[%s2495_s24 + $0x2f8] sm:$0xff] }
  0xbf   : > { %5134 = vst [vmem:[#allocation39_spill] sm:$0xff] %v2739_v11  ;;  %v305_v11 = vld [vmem:[%s2495_s24 + $0x2e8] sm:$0xff] }
  0xc0   : > { %5135 = vst [vmem:[#allocation40_spill] sm:$0xff] %v2742_v12  ;;  %v287_v12 = vld [vmem:[%s2495_s24 + $0x258] sm:$0xff] }
  0xc1   : > { %5136 = vst [vmem:[#allocation41_spill] sm:$0xff] %v2745_v13  ;;  %v285_v13 = vld [vmem:[%s2495_s24 + $0x248] sm:$0xff]  ;;  %v2854_v6 = vmul.f32 %v2713_v30, %v287_v12 }
  0xc2   : > { %5137 = vst [vmem:[#allocation42_spill] sm:$0xff] %v2752_v18  ;;  %v292_v18 = vld [vmem:[%s2495_s24 + $0x280] sm:$0xff]  ;;  %v2848_v4 = vmul.f32 %v2713_v30, %v285_v13 }
  0xc3   : > { %5138 = vst [vmem:[#allocation43_spill] sm:$0xff] %v2755_v19  ;;  %v291_v19 = vld [vmem:[%s2495_s24 + $0x278] sm:$0xff]  ;;  %v2873_v62 = vmul.f32 %v2713_v30, %v292_v18 }
  0xc4   : > { %5139 = vst [vmem:[#allocation44_spill] sm:$0xff] %v2758_v20  ;;  %v290_v20 = vld [vmem:[%s2495_s24 + $0x270] sm:$0xff]  ;;  %v2870_v12 = vmul.f32 %v2713_v30, %v291_v19 }
  0xc5   : > { %5140 = vst [vmem:[#allocation45_spill] sm:$0xff] %v2761_v21  ;;  %v289_v21 = vld [vmem:[%s2495_s24 + $0x268] sm:$0xff]  ;;  %v2867_v63 = vmul.f32 %v2713_v30, %v290_v20 }
  0xc6   : > { %5141 = vst [vmem:[#allocation46_spill] sm:$0xff] %v2768_v26  ;;  %v296_v26 = vld [vmem:[%s2495_s24 + $0x2a0] sm:$0xff]  ;;  %v2864_v13 = vmul.f32 %v2713_v30, %v289_v21 }
  0xc7   : > { %5142 = vst [vmem:[#allocation47_spill] sm:$0xff] %v2771_v27  ;;  %v295_v27 = vld [vmem:[%s2495_s24 + $0x298] sm:$0xff]  ;;  %v316_v21 = vld [vmem:[%s2495_s24 + $0x340] sm:$0xff]  ;;  %v2891_v18 = vmul.f32 %v2713_v30, %v296_v26 }
  0xc8   : > { %5143 = vst [vmem:[#allocation48_spill] sm:$0xff] %v2774_v28  ;;  %v294_v28 = vld [vmem:[%s2495_s24 + $0x290] sm:$0xff]  ;;  %v2888_v19 = vmul.f32 %v2713_v30, %v295_v27 }
  0xc9   : > { %5144 = vst [vmem:[#allocation49_spill] sm:$0xff] %v2777_v29  ;;  %v293_v29 = vld [vmem:[%s2495_s24 + $0x288] sm:$0xff]  ;;  %v2885_v20 = vmul.f32 %v2713_v30, %v294_v28 }
  0xca   : > { %5145 = vst [vmem:[#allocation50_spill] sm:$0xff] %v2784_v35  ;;  %v300_v35 = vld [vmem:[%s2495_s24 + $0x2c0] sm:$0xff] }
  0xcb   : > { %5146 = vst [vmem:[#allocation51_spill] sm:$0xff] %v2787_v40  ;;  %v299_v40 = vld [vmem:[%s2495_s24 + $0x2b8] sm:$0xff]  ;;  %v2907_v26 = vmul.f32 %v2713_v30, %v300_v35 }
  0xcc   : > { %5147 = vst [vmem:[#allocation52_spill] sm:$0xff] %v2790_v41  ;;  %v298_v41 = vld [vmem:[%s2495_s24 + $0x2b0] sm:$0xff]  ;;  %v2904_v27 = vmul.f32 %v2713_v30, %v299_v40 }
  0xcd   : > { %5148 = vst [vmem:[#allocation53_spill] sm:$0xff] %v2793_v42  ;;  %v297_v42 = vld [vmem:[%s2495_s24 + $0x2a8] sm:$0xff]  ;;  %v2901_v28 = vmul.f32 %v2713_v30, %v298_v41 }
  0xce   : > { %5149 = vst [vmem:[#allocation54_spill] sm:$0xff] %v2800_v50  ;;  %v304_v50 = vld [vmem:[%s2495_s24 + $0x2e0] sm:$0xff] }
  0xcf   : > { %5150 = vst [vmem:[#allocation55_spill] sm:$0xff] %v2803_v51  ;;  %v303_v51 = vld [vmem:[%s2495_s24 + $0x2d8] sm:$0xff]  ;;  %v2923_v35 = vmul.f32 %v2713_v30, %v304_v50 }
  0xd0   : > { %5151 = vst [vmem:[#allocation56_spill] sm:$0xff] %v2806_v33  ;;  %v302_v33 = vld [vmem:[%s2495_s24 + $0x2d0] sm:$0xff]  ;;  %v2920_v40 = vmul.f32 %v2713_v30, %v303_v51  ;;  %v2936_v51 = vmul.f32 %v2713_v30, %v307_v10  ;;  %v333_v10 = vld [vmem:[%s2495_s24 + $0x3c8] sm:$0xff] }
  0xd1   : > { %5152 = vst [vmem:[#allocation57_spill] sm:$0xff] %v2841_v14  ;;  %v310_v14 = vld [vmem:[%s2495_s24 + $0x310] sm:$0xff]  ;;  %v2917_v41 = vmul.f32 %v2713_v30, %v302_v33  ;;  %v2933_v33 = vmul.f32 %v2713_v30, %v306_v61 }
  0xd2   : > { %5153 = vst [vmem:[#allocation58_spill] sm:$0xff] %v2848_v4  ;;  %v315_v4 = vld [vmem:[%s2495_s24 + $0x338] sm:$0xff] }
  0xd3   : > { %5154 = vst [vmem:[#allocation59_spill] sm:$0xff] %v2851_v7  ;;  %v314_v7 = vld [vmem:[%s2495_s24 + $0x330] sm:$0xff] }
  0xd4   : > { %5155 = vst [vmem:[#allocation60_spill] sm:$0xff] %v2854_v6  ;;  %v313_v6 = vld [vmem:[%s2495_s24 + $0x328] sm:$0xff] }
  0xd5   : > { %5156 = vst [vmem:[#allocation61_spill] sm:$0xff] %v2857_v5  ;;  %v2875_v5 = vpop.permute.xlu1 %493 }
  0xd6   : > { %5157 = vst [vmem:[#allocation62_spill] sm:$0xff] %v2864_v13  ;;  %v2882_v13 = vmul.f32 %v2713_v30, %v293_v29  ;;  %v2898_v29 = vmul.f32 %v2713_v30, %v297_v42  ;;  %v2914_v42 = vmul.f32 %v2713_v30, %v301_v1  ;;  %v2930_v1 = vmul.f32 %v2713_v30, %v305_v11  ;;  %v334_v11 = vld [vmem:[%s2495_s24 + $0x3d0] sm:$0xff] }
  0xd7   : > { %5158 = vst [vmem:[#allocation63_spill] sm:$0xff] %v2867_v63  ;;  %v319_v63 = vld [vmem:[%s2495_s24 + $0x358] sm:$0xff]  ;;  %v2939_v50 = vmul.f32 %v2875_v5, %v308_v60  ;;  %v2946_v2 = vmul.f32 %v2875_v5, %v309_v8  ;;  %v2949_v61 = vmul.f32 %v2875_v5, %v310_v14  ;;  %v2952_v30 = vmul.f32 %v2875_v5, %v311_v55 }
  0xd8   : > { %5159 = vst [vmem:[#allocation64_spill] sm:$0xff] %v2870_v12  ;;  %v318_v12 = vld [vmem:[%s2495_s24 + $0x350] sm:$0xff]  ;;  %v2955_v60 = vmul.f32 %v2875_v5, %v312_v3  ;;  %v2962_v8 = vmul.f32 %v2875_v5, %v313_v6  ;;  %v2965_v14 = vmul.f32 %v2875_v5, %v314_v7  ;;  %v2968_v55 = vmul.f32 %v2875_v5, %v315_v4  ;;  %v340_v6 = vld [vmem:[%s2495_s24 + $0x400] sm:$0xff] }
  0xd9   : > { %5160 = vst [vmem:[#allocation65_spill] sm:$0xff] %v2873_v62  ;;  %v317_v62 = vld [vmem:[%s2495_s24 + $0x348] sm:$0xff]  ;;  %v2971_v3 = vmul.f32 %v2875_v5, %v316_v21  ;;  %v2983_v7 = vmul.f32 %v2875_v5, %v318_v12  ;;  %v2986_v4 = vmul.f32 %v2875_v5, %v319_v63  ;;  %v2989_v21 = vmul.f32 %v2875_v5, %v320_v54 }
  0xda   : > { %5161 = vst [vmem:[#allocation66_spill] sm:$0xff] %v2882_v13  ;;  %v324_v13 = vld [vmem:[%s2495_s24 + $0x380] sm:$0xff]  ;;  %v2980_v59 = vmul.f32 %v2875_v5, %v317_v62 }
  0xdb   : > { %5162 = vst [vmem:[#allocation67_spill] sm:$0xff] %v2885_v20  ;;  %v323_v20 = vld [vmem:[%s2495_s24 + $0x378] sm:$0xff]  ;;  %v3005_v54 = vmul.f32 %v2875_v5, %v324_v13 }
  0xdc   : > { %5163 = vst [vmem:[#allocation68_spill] sm:$0xff] %v2888_v19  ;;  %v322_v19 = vld [vmem:[%s2495_s24 + $0x370] sm:$0xff]  ;;  %v3002_v63 = vmul.f32 %v2875_v5, %v323_v20 }
  0xdd   : > { %5164 = vst [vmem:[#allocation69_spill] sm:$0xff] %v2891_v18  ;;  %v321_v18 = vld [vmem:[%s2495_s24 + $0x368] sm:$0xff]  ;;  %v2999_v12 = vmul.f32 %v2875_v5, %v322_v19 }
  0xde   : > { %5165 = vst [vmem:[#allocation70_spill] sm:$0xff] %v2898_v29  ;;  %v328_v29 = vld [vmem:[%s2495_s24 + $0x3a0] sm:$0xff]  ;;  %v2996_v62 = vmul.f32 %v2875_v5, %v321_v18 }
  0xdf   : > { %5166 = vst [vmem:[#allocation71_spill] sm:$0xff] %v2901_v28  ;;  %v327_v28 = vld [vmem:[%s2495_s24 + $0x398] sm:$0xff]  ;;  %v3021_v13 = vmul.f32 %v2875_v5, %v328_v29 }
  0xe0   : > { %5167 = vst [vmem:[#allocation72_spill] sm:$0xff] %v2904_v27  ;;  %v326_v27 = vld [vmem:[%s2495_s24 + $0x390] sm:$0xff]  ;;  %v3018_v20 = vmul.f32 %v2875_v5, %v327_v28 }
  0xe1   : > { %5168 = vst [vmem:[#allocation73_spill] sm:$0xff] %v2907_v26  ;;  %v325_v26 = vld [vmem:[%s2495_s24 + $0x388] sm:$0xff]  ;;  %v3015_v19 = vmul.f32 %v2875_v5, %v326_v27 }
  0xe2   : > { %5169 = vst [vmem:[#allocation74_spill] sm:$0xff] %v2914_v42  ;;  %v332_v42 = vld [vmem:[%s2495_s24 + $0x3c0] sm:$0xff]  ;;  %v3012_v18 = vmul.f32 %v2875_v5, %v325_v26 }
  0xe3   : > { %5170 = vst [vmem:[#allocation75_spill] sm:$0xff] %v2917_v41  ;;  %v331_v41 = vld [vmem:[%s2495_s24 + $0x3b8] sm:$0xff]  ;;  %v3037_v29 = vmul.f32 %v2875_v5, %v332_v42 }
  0xe4   : > { %5171 = vst [vmem:[#allocation76_spill] sm:$0xff] %v2920_v40  ;;  %v330_v40 = vld [vmem:[%s2495_s24 + $0x3b0] sm:$0xff]  ;;  %v3034_v28 = vmul.f32 %v2875_v5, %v331_v41 }
  0xe5   : > { %5172 = vst [vmem:[#allocation77_spill] sm:$0xff] %v2923_v35  ;;  %v329_v35 = vld [vmem:[%s2495_s24 + $0x3a8] sm:$0xff]  ;;  %v3031_v27 = vmul.f32 %v2875_v5, %v330_v40  ;;  %v3047_v40 = vmul.f32 %v2875_v5, %v334_v11  ;;  %v3063_v11 = vmul.f32 %v2875_v5, %v338_v22 }
  0xe6   : > { %5173 = vst [vmem:[#allocation78_spill] sm:$0xff] %v2930_v1  ;;  %v2973_v1 = vpop.permute.xlu2 %498  ;;  %v3028_v26 = vmul.f32 %v2875_v5, %v329_v35  ;;  %v3044_v35 = vmul.f32 %v2875_v5, %v333_v10  ;;  %v3060_v10 = vmul.f32 %v2875_v5, %v337_v53 }
  0xe7   : > { %5174 = vst [vmem:[#allocation79_spill] sm:$0xff] %v2933_v33  ;;  %v336_v33 = vld [vmem:[%s2495_s24 + $0x3e0] sm:$0xff]  ;;  %v3079_v22 = vmul.f32 %v2973_v1, %v342_v47 }
  0xe8   : > { %5175 = vst [vmem:[#allocation80_spill] sm:$0xff] %v2936_v51  ;;  %v335_v51 = vld [vmem:[%s2495_s24 + $0x3d8] sm:$0xff]  ;;  %v3053_v42 = vmul.f32 %v2875_v5, %v336_v33  ;;  %v3069_v33 = vmul.f32 %v2973_v1, %v340_v6  ;;  %v365_v6 = vld [vmem:[%s2495_s24 + $0x4c8] sm:$0xff] }
  0xe9   : > { %5176 = vst [vmem:[#allocation81_spill] sm:$0xff] %v2962_v8  ;;  %v3050_v41 = vmul.f32 %v2875_v5, %v335_v51  ;;  %v3066_v51 = vmul.f32 %v2875_v5, %v339_v52 }
  0xea   : > { %5177 = vst [vmem:[#allocation82_spill] sm:$0xff] %v2965_v14  ;;  %v344_v14 = vld [vmem:[%s2495_s24 + $0x420] sm:$0xff] }
  0xeb   : > { %5178 = vst [vmem:[#allocation83_spill] sm:$0xff] %v2968_v55  ;;  %v343_v55 = vld [vmem:[%s2495_s24 + $0x418] sm:$0xff]  ;;  %v3085_v5 = vmul.f32 %v2973_v1, %v344_v14 }
  0xec   : > { %5179 = vst [vmem:[#allocation84_spill] sm:$0xff] %v2971_v3  ;;  %v341_v3 = vld [vmem:[%s2495_s24 + $0x408] sm:$0xff]  ;;  %v3082_v52 = vmul.f32 %v2973_v1, %v343_v55 }
  0xed   : > { %5180 = vst [vmem:[#allocation85_spill] sm:$0xff] %v2980_v59  ;;  %v348_v59 = vld [vmem:[%s2495_s24 + $0x440] sm:$0xff]  ;;  %v3076_v53 = vmul.f32 %v2973_v1, %v341_v3 }
  0xee   : > { %5181 = vst [vmem:[#allocation86_spill] sm:$0xff] %v2983_v7  ;;  %v347_v7 = vld [vmem:[%s2495_s24 + $0x438] sm:$0xff]  ;;  %v3101_v14 = vmul.f32 %v2973_v1, %v348_v59 }
  0xef   : > { %5182 = vst [vmem:[#allocation87_spill] sm:$0xff] %v2986_v4  ;;  %v346_v4 = vld [vmem:[%s2495_s24 + $0x430] sm:$0xff]  ;;  %v3098_v55 = vmul.f32 %v2973_v1, %v347_v7 }
  0xf0   : > { %5183 = vst [vmem:[#allocation88_spill] sm:$0xff] %v2989_v21  ;;  %v345_v21 = vld [vmem:[%s2495_s24 + $0x428] sm:$0xff]  ;;  %v3095_v47 = vmul.f32 %v2973_v1, %v346_v4 }
  0xf1   : > { %5184 = vst [vmem:[#allocation89_spill] sm:$0xff] %v2996_v62  ;;  %v352_v62 = vld [vmem:[%s2495_s24 + $0x460] sm:$0xff]  ;;  %v3092_v3 = vmul.f32 %v2973_v1, %v345_v21  ;;  %v373_v21 = vld [vmem:[%s2495_s24 + $0x508] sm:$0xff] }
  0xf2   : > { %5185 = vst [vmem:[#allocation90_spill] sm:$0xff] %v2999_v12  ;;  %v351_v12 = vld [vmem:[%s2495_s24 + $0x458] sm:$0xff]  ;;  %v3117_v59 = vmul.f32 %v2973_v1, %v352_v62 }
  0xf3   : > { %5186 = vst [vmem:[#allocation91_spill] sm:$0xff] %v3002_v63  ;;  %v350_v63 = vld [vmem:[%s2495_s24 + $0x450] sm:$0xff]  ;;  %v3114_v7 = vmul.f32 %v2973_v1, %v351_v12 }
  0xf4   : > { %5187 = vst [vmem:[#allocation92_spill] sm:$0xff] %v3005_v54  ;;  %v349_v54 = vld [vmem:[%s2495_s24 + $0x448] sm:$0xff]  ;;  %v3111_v4 = vmul.f32 %v2973_v1, %v350_v63 }
  0xf5   : > { %5188 = vst [vmem:[#allocation93_spill] sm:$0xff] %v3012_v18  ;;  %v356_v18 = vld [vmem:[%s2495_s24 + $0x480] sm:$0xff]  ;;  %v3108_v8 = vmul.f32 %v2973_v1, %v349_v54 }
  0xf6   : > { %5189 = vst [vmem:[#allocation94_spill] sm:$0xff] %v3015_v19  ;;  %v355_v19 = vld [vmem:[%s2495_s24 + $0x478] sm:$0xff]  ;;  %v3133_v62 = vmul.f32 %v2973_v1, %v356_v18 }
  0xf7   : > { %5190 = vst [vmem:[#allocation95_spill] sm:$0xff] %v3018_v20  ;;  %v354_v20 = vld [vmem:[%s2495_s24 + $0x470] sm:$0xff]  ;;  %v3130_v12 = vmul.f32 %v2973_v1, %v355_v19 }
  0xf8   : > { %5191 = vst [vmem:[#allocation96_spill] sm:$0xff] %v3021_v13  ;;  %v353_v13 = vld [vmem:[%s2495_s24 + $0x468] sm:$0xff]  ;;  %v3127_v63 = vmul.f32 %v2973_v1, %v354_v20 }
  0xf9   : > { %5192 = vst [vmem:[#allocation97_spill] sm:$0xff] %v3028_v26  ;;  %v360_v26 = vld [vmem:[%s2495_s24 + $0x4a0] sm:$0xff]  ;;  %v3124_v54 = vmul.f32 %v2973_v1, %v353_v13 }
  0xfa   : > { %5193 = vst [vmem:[#allocation98_spill] sm:$0xff] %v3031_v27  ;;  %v359_v27 = vld [vmem:[%s2495_s24 + $0x498] sm:$0xff]  ;;  %v380_v13 = vld [vmem:[%s2495_s24 + $0x540] sm:$0xff]  ;;  %v3151_v18 = vmul.f32 %v2973_v1, %v360_v26 }
  0xfb   : > { %5194 = vst [vmem:[#allocation99_spill] sm:$0xff] %v3034_v28  ;;  %v358_v28 = vld [vmem:[%s2495_s24 + $0x490] sm:$0xff]  ;;  %v3148_v19 = vmul.f32 %v2973_v1, %v359_v27 }
  0xfc   : > { %5195 = vst [vmem:[#allocation100_spill] sm:$0xff] %v3037_v29  ;;  %v357_v29 = vld [vmem:[%s2495_s24 + $0x488] sm:$0xff]  ;;  %v3145_v20 = vmul.f32 %v2973_v1, %v358_v28 }
  0xfd   : > { %5196 = vst [vmem:[#allocation101_spill] sm:$0xff] %v3044_v35  ;;  %v364_v35 = vld [vmem:[%s2495_s24 + $0x4c0] sm:$0xff] }
  0xfe   : > { %5197 = vst [vmem:[#allocation102_spill] sm:$0xff] %v3047_v40  ;;  %v363_v40 = vld [vmem:[%s2495_s24 + $0x4b8] sm:$0xff]  ;;  %v3167_v26 = vmul.f32 %v2973_v1, %v364_v35 }
  0xff   : > { %5198 = vst [vmem:[#allocation103_spill] sm:$0xff] %v3050_v41  ;;  %v362_v41 = vld [vmem:[%s2495_s24 + $0x4b0] sm:$0xff]  ;;  %v3164_v27 = vmul.f32 %v2973_v1, %v363_v40 }
 0x100   : > { %5199 = vst [vmem:[#allocation104_spill] sm:$0xff] %v3053_v42  ;;  %v361_v42 = vld [vmem:[%s2495_s24 + $0x4a8] sm:$0xff]  ;;  %v3161_v28 = vmul.f32 %v2973_v1, %v362_v41 }
 0x101   : > { %5200 = vst [vmem:[#allocation105_spill] sm:$0xff] %v3060_v10  ;;  %v368_v10 = vld [vmem:[%s2495_s24 + $0x4e0] sm:$0xff] }
 0x102   : > { %5201 = vst [vmem:[#allocation106_spill] sm:$0xff] %v3063_v11  ;;  %v367_v11 = vld [vmem:[%s2495_s24 + $0x4d8] sm:$0xff]  ;;  %v3183_v35 = vmul.f32 %v2973_v1, %v368_v10 }
 0x103   : > { %5202 = vst [vmem:[#allocation107_spill] sm:$0xff] %v3066_v51  ;;  %v366_v51 = vld [vmem:[%s2495_s24 + $0x4d0] sm:$0xff]  ;;  %v3180_v40 = vmul.f32 %v2973_v1, %v367_v11 }
 0x104   : > { %5203 = vst [vmem:[#allocation108_spill] sm:$0xff] %v3069_v33  ;;  %v3177_v41 = vmul.f32 %v2973_v1, %v366_v51 }
 0x105   : > { %5204 = vst [vmem:[#allocation109_spill] sm:$0xff] %v3076_v53  ;;  %v372_v53 = vld [vmem:[%s2495_s24 + $0x500] sm:$0xff] }
 0x106   : > { %5205 = vst [vmem:[#allocation110_spill] sm:$0xff] %v3079_v22  ;;  %v371_v22 = vld [vmem:[%s2495_s24 + $0x4f8] sm:$0xff] }
 0x107   : > { %5206 = vst [vmem:[#allocation111_spill] sm:$0xff] %v3082_v52  ;;  %v370_v52 = vld [vmem:[%s2495_s24 + $0x4f0] sm:$0xff]  ;;  %v3196_v11 = vmul.f32 %v2973_v1, %v371_v22 }
 0x108   : > { %5207 = vst [vmem:[#allocation112_spill] sm:$0xff] %v3085_v5  ;;  %v369_v5 = vld [vmem:[%s2495_s24 + $0x4e8] sm:$0xff]  ;;  %v3193_v51 = vmul.f32 %v2973_v1, %v370_v52  ;;  %v398_v22 = vld [vmem:[%s2495_s24 + $0x5d0] sm:$0xff] }
 0x109   : > { %5208 = vst [vmem:[#allocation113_spill] sm:$0xff] %v3092_v3  ;;  %v384_v3 = vld [vmem:[%s2495_s24 + $0x560] sm:$0xff] }
 0x10a   : > { %5209 = vst [vmem:[#allocation114_spill] sm:$0xff] %v3095_v47  ;;  %v376_v47 = vld [vmem:[%s2495_s24 + $0x520] sm:$0xff] }
 0x10b   : > { %5210 = vst [vmem:[#allocation115_spill] sm:$0xff] %v3098_v55  ;;  %v375_v55 = vld [vmem:[%s2495_s24 + $0x518] sm:$0xff] }
 0x10c   : > { %5211 = vst [vmem:[#allocation116_spill] sm:$0xff] %v3101_v14  ;;  %v374_v14 = vld [vmem:[%s2495_s24 + $0x510] sm:$0xff] }
 0x10d   : > { %5212 = vst [vmem:[#allocation117_spill] sm:$0xff] %v3108_v8  ;;  %v379_v8 = vld [vmem:[%s2495_s24 + $0x538] sm:$0xff] }
 0x10e   : > { %5213 = vst [vmem:[#allocation118_spill] sm:$0xff] %v3111_v4  ;;  %v378_v4 = vld [vmem:[%s2495_s24 + $0x530] sm:$0xff] }
 0x10f   : > { %5214 = vst [vmem:[#allocation119_spill] sm:$0xff] %v3114_v7  ;;  %v377_v7 = vld [vmem:[%s2495_s24 + $0x528] sm:$0xff] }
 0x110   : > { %5215 = vst [vmem:[#allocation120_spill] sm:$0xff] %v3117_v59  ;;  %v3135_v59 = vpop.permute.xlu2 %503 }
 0x111   : > { %5216 = vst [vmem:[#allocation121_spill] sm:$0xff] %v3124_v54  ;;  %v3142_v54 = vmul.f32 %v2973_v1, %v357_v29  ;;  %v3158_v29 = vmul.f32 %v2973_v1, %v361_v42  ;;  %v3174_v42 = vmul.f32 %v2973_v1, %v365_v6  ;;  %v3190_v6 = vmul.f32 %v2973_v1, %v369_v5 }
 0x112   : > { %5217 = vst [vmem:[#allocation122_spill] sm:$0xff] %v3127_v63  ;;  %v383_v63 = vld [vmem:[%s2495_s24 + $0x558] sm:$0xff]  ;;  %v3199_v10 = vmul.f32 %v3135_v59, %v372_v53  ;;  %v3206_v33 = vmul.f32 %v3135_v59, %v373_v21  ;;  %v3209_v5 = vmul.f32 %v3135_v59, %v374_v14  ;;  %v3212_v52 = vmul.f32 %v3135_v59, %v375_v55  ;;  %v397_v53 = vld [vmem:[%s2495_s24 + $0x5c8] sm:$0xff] }
 0x113   : > { %5218 = vst [vmem:[#allocation123_spill] sm:$0xff] %v3130_v12  ;;  %v382_v12 = vld [vmem:[%s2495_s24 + $0x550] sm:$0xff]  ;;  %v3215_v1 = vmul.f32 %v3135_v59, %v376_v47  ;;  %v3225_v21 = vmul.f32 %v3135_v59, %v378_v4  ;;  %v3228_v14 = vmul.f32 %v3135_v59, %v379_v8  ;;  %v3231_v55 = vmul.f32 %v3135_v59, %v380_v13  ;;  %v401_v47 = vld [vmem:[%s2495_s24 + $0x5e8] sm:$0xff]  ;;  %v404_v13 = vld [vmem:[%s2495_s24 + $0x600] sm:$0xff] }
 0x114   : > { %5219 = vst [vmem:[#allocation124_spill] sm:$0xff] %v3133_v62  ;;  %v381_v62 = vld [vmem:[%s2495_s24 + $0x548] sm:$0xff]  ;;  %v3243_v4 = vmul.f32 %v3135_v59, %v383_v63  ;;  %v3246_v8 = vmul.f32 %v3135_v59, %v384_v3  ;;  %v3263_v3 = vpop.permute.xlu0 %508 }
 0x115   : > { %5220 = vst [vmem:[#allocation125_spill] sm:$0xff] %v3142_v54  ;;  %v388_v54 = vld [vmem:[%s2495_s24 + $0x580] sm:$0xff] }
 0x116   : > { %5221 = vst [vmem:[#allocation126_spill] sm:$0xff] %v3145_v20  ;;  %v387_v20 = vld [vmem:[%s2495_s24 + $0x578] sm:$0xff]  ;;  %v3261_v63 = vmul.f32 %v3135_v59, %v388_v54 }
 0x117   : > { %5222 = vst [vmem:[#allocation127_spill] sm:$0xff] %v3148_v19  ;;  %v386_v19 = vld [vmem:[%s2495_s24 + $0x570] sm:$0xff] }
 0x118   : > { %5223 = vst [vmem:[#allocation128_spill] sm:$0xff] %v3151_v18  ;;  %v385_v18 = vld [vmem:[%s2495_s24 + $0x568] sm:$0xff] }
 0x119   : > { %5224 = vst [vmem:[#allocation129_spill] sm:$0xff] %v3158_v29  ;;  %v392_v29 = vld [vmem:[%s2495_s24 + $0x5a0] sm:$0xff] }
 0x11a   : > { %5225 = vst [vmem:[#allocation130_spill] sm:$0xff] %v3161_v28  ;;  %v391_v28 = vld [vmem:[%s2495_s24 + $0x598] sm:$0xff]  ;;  %v3278_v54 = vmul.f32 %v3135_v59, %v392_v29  ;;  %v413_v29 = vld [vmem:[%s2495_s24 + $0x648] sm:$0xff] }
 0x11b   : > { %5226 = vst [vmem:[#allocation131_spill] sm:$0xff] %v3164_v27  ;;  %v390_v27 = vld [vmem:[%s2495_s24 + $0x590] sm:$0xff] }
 0x11c   : > { %5227 = vst [vmem:[#allocation132_spill] sm:$0xff] %v3167_v26  ;;  %v389_v26 = vld [vmem:[%s2495_s24 + $0x588] sm:$0xff] }
 0x11d   : > { %5228 = vst [vmem:[#allocation133_spill] sm:$0xff] %v3174_v42  ;;  %v396_v42 = vld [vmem:[%s2495_s24 + $0x5c0] sm:$0xff] }
 0x11e   : > { %5229 = vst [vmem:[#allocation134_spill] sm:$0xff] %v3177_v41  ;;  %v395_v41 = vld [vmem:[%s2495_s24 + $0x5b8] sm:$0xff] }
 0x11f   : > { %5230 = vst [vmem:[#allocation135_spill] sm:$0xff] %v3180_v40  ;;  %v394_v40 = vld [vmem:[%s2495_s24 + $0x5b0] sm:$0xff] }
 0x120   : > { %5231 = vst [vmem:[#allocation136_spill] sm:$0xff] %v3183_v35  ;;  %v393_v35 = vld [vmem:[%s2495_s24 + $0x5a8] sm:$0xff] }
 0x121   : > { %5232 = vst [vmem:[#allocation137_spill] sm:$0xff] %v3190_v6  ;;  %v3222_v6 = vmul.f32 %v3135_v59, %v377_v7  ;;  %v3240_v7 = vmul.f32 %v3135_v59, %v382_v12  ;;  %v3258_v12 = vmul.f32 %v3135_v59, %v387_v20  ;;  %v3275_v20 = vmul.f32 %v3135_v59, %v391_v28 }
 0x122   : > { %5233 = vst [vmem:[#allocation138_spill] sm:$0xff] %v3193_v51  ;;  %v400_v51 = vld [vmem:[%s2495_s24 + $0x5e0] sm:$0xff]  ;;  %v3293_v28 = vmul.f32 %v3135_v59, %v396_v42 }
 0x123   : > { %5234 = vst [vmem:[#allocation139_spill] sm:$0xff] %v3196_v11  ;;  %v399_v11 = vld [vmem:[%s2495_s24 + $0x5d8] sm:$0xff]  ;;  %v416_v42 = vld [vmem:[%s2495_s24 + $0x660] sm:$0xff] }
 0x124   : > { %5235 = vst [vmem:[#allocation140_spill] sm:$0xff] %v3209_v5  ;;  %v3237_v5 = vmul.f32 %v3135_v59, %v381_v62  ;;  %v3255_v62 = vmul.f32 %v3135_v59, %v386_v19  ;;  %v3272_v19 = vmul.f32 %v3135_v59, %v390_v27  ;;  %v3290_v27 = vmul.f32 %v3135_v59, %v395_v41 }
 0x125   : > { %5236 = vst [vmem:[#allocation141_spill] sm:$0xff] %v3212_v52  ;;  %v403_v52 = vld [vmem:[%s2495_s24 + $0x5f8] sm:$0xff]  ;;  %v3308_v41 = vmul.f32 %v3135_v59, %v400_v51 }
 0x126   : > { %5237 = vst [vmem:[#allocation142_spill] sm:$0xff] %v3215_v1  ;;  %v402_v1 = vld [vmem:[%s2495_s24 + $0x5f0] sm:$0xff]  ;;  %v419_v51 = vld [vmem:[%s2495_s24 + $0x678] sm:$0xff] }
 0x127   : > { %5238 = vst [vmem:[#allocation143_spill] sm:$0xff] %v3225_v21  ;;  %v3252_v21 = vmul.f32 %v3135_v59, %v385_v18  ;;  %v3269_v18 = vmul.f32 %v3135_v59, %v389_v26  ;;  %v3287_v26 = vmul.f32 %v3135_v59, %v394_v40  ;;  %v3305_v40 = vmul.f32 %v3135_v59, %v399_v11 }
 0x128   : > { %5239 = vst [vmem:[#allocation144_spill] sm:$0xff] %v3228_v14  ;;  %v406_v14 = vld [vmem:[%s2495_s24 + $0x610] sm:$0xff]  ;;  %v3323_v11 = vmul.f32 %v3263_v3, %v404_v13  ;;  %v423_v13 = vld [vmem:[%s2495_s24 + $0x698] sm:$0xff] }
 0x129   : > { %5240 = vst [vmem:[#allocation145_spill] sm:$0xff] %v3231_v55  ;;  %v405_v55 = vld [vmem:[%s2495_s24 + $0x608] sm:$0xff] }
 0x12a   : > { %5241 = vst [vmem:[#allocation146_spill] sm:$0xff] %v3240_v7  ;;  %v409_v7 = vld [vmem:[%s2495_s24 + $0x628] sm:$0xff] }
 0x12b   : > { %5242 = vst [vmem:[#allocation147_spill] sm:$0xff] %v3243_v4  ;;  %v408_v4 = vld [vmem:[%s2495_s24 + $0x620] sm:$0xff] }
 0x12c   : > { %5243 = vst [vmem:[#allocation148_spill] sm:$0xff] %v3246_v8  ;;  %v407_v8 = vld [vmem:[%s2495_s24 + $0x618] sm:$0xff] }
 0x12d   : > { %5244 = vst [vmem:[#allocation149_spill] sm:$0xff] %v3252_v21  ;;  %v3284_v21 = vmul.f32 %v3135_v59, %v393_v35  ;;  %v3302_v35 = vmul.f32 %v3135_v59, %v398_v22  ;;  %v3320_v22 = vmul.f32 %v3135_v59, %v403_v52  ;;  %v422_v52 = vld [vmem:[%s2495_s24 + $0x690] sm:$0xff] }
 0x12e   : > { %5245 = vst [vmem:[#allocation150_spill] sm:$0xff] %v3255_v62  ;;  %v412_v62 = vld [vmem:[%s2495_s24 + $0x640] sm:$0xff] }
 0x12f   : > { %5246 = vst [vmem:[#allocation151_spill] sm:$0xff] %v3258_v12  ;;  %v411_v12 = vld [vmem:[%s2495_s24 + $0x638] sm:$0xff] }
 0x130   : > { %5247 = vst [vmem:[#allocation152_spill] sm:$0xff] %v3261_v63  ;;  %v410_v63 = vld [vmem:[%s2495_s24 + $0x630] sm:$0xff] }
 0x131   : > { %5248 = vst [vmem:[#allocation153_spill] sm:$0xff] %v3269_v18 }
 0x132   : > { %5249 = vst [vmem:[#allocation154_spill] sm:$0xff] %v3272_v19  ;;  %v3299_v19 = vmul.f32 %v3135_v59, %v397_v53  ;;  %v3317_v53 = vmul.f32 %v3135_v59, %v402_v1  ;;  %v3335_v1 = vmul.f32 %v3263_v3, %v407_v8  ;;  %v3353_v8 = vmul.f32 %v3263_v3, %v412_v62 }
 0x133   : > { %5250 = vst [vmem:[#allocation155_spill] sm:$0xff] %v3275_v20  ;;  %v415_v20 = vld [vmem:[%s2495_s24 + $0x658] sm:$0xff] }
 0x134   : > { %5251 = vst [vmem:[#allocation156_spill] sm:$0xff] %v3278_v54  ;;  %v414_v54 = vld [vmem:[%s2495_s24 + $0x650] sm:$0xff] }
 0x135   : > { %5252 = vst [vmem:[#allocation157_spill] sm:$0xff] %v3284_v21  ;;  %v3359_v21 = vmul.f32 %v3263_v3, %v413_v29  ;;  %v3377_v29 = vmul.f32 %v3263_v3, %v419_v51  ;;  %v430_v51 = vld [vmem:[%s2495_s24 + $0x6d0] sm:$0xff] }
 0x136   : > { %5253 = vst [vmem:[#allocation158_spill] sm:$0xff] %v3287_v26  ;;  %v3314_v26 = vmul.f32 %v3135_v59, %v401_v47  ;;  %v3332_v47 = vmul.f32 %v3263_v3, %v406_v14  ;;  %v3338_v59 = vmul.f32 %v3263_v3, %v408_v4  ;;  %v3350_v14 = vmul.f32 %v3263_v3, %v411_v12  ;;  %v426_v4 = vld [vmem:[%s2495_s24 + $0x6b0] sm:$0xff] }
 0x137   : > { %5254 = vst [vmem:[#allocation159_spill] sm:$0xff] %v3290_v27  ;;  %v418_v27 = vld [vmem:[%s2495_s24 + $0x670] sm:$0xff]  ;;  %v3368_v12 = vmul.f32 %v3263_v3, %v416_v42 }
 0x138   : > { %5255 = vst [vmem:[#allocation160_spill] sm:$0xff] %v3293_v28  ;;  %v417_v28 = vld [vmem:[%s2495_s24 + $0x668] sm:$0xff]  ;;  %v3374_v18 = vmul.f32 %v3263_v3, %v418_v27  ;;  %v3390_v27 = vmul.f32 %v3263_v3, %v422_v52 }
 0x139   : > { %5256 = vst [vmem:[#allocation161_spill] sm:$0xff] %v3299_v19  ;;  %v427_v19 = vld [vmem:[%s2495_s24 + $0x6b8] sm:$0xff]  ;;  %v3371_v62 = vmul.f32 %v3263_v3, %v417_v28  ;;  %v433_v52 = vld [vmem:[%s2495_s24 + $0x6e8] sm:$0xff] }
 0x13a   : > { %5257 = vst [vmem:[#allocation162_spill] sm:$0xff] %v3302_v35  ;;  %v3329_v35 = vmul.f32 %v3263_v3, %v405_v55  ;;  %v3347_v55 = vmul.f32 %v3263_v3, %v410_v63  ;;  %v3365_v63 = vmul.f32 %v3263_v3, %v415_v20  ;;  %v428_v20 = vld [vmem:[%s2495_s24 + $0x6c0] sm:$0xff] }
 0x13b   : > { %5258 = vst [vmem:[#allocation163_spill] sm:$0xff] %v3305_v40  ;;  %v421_v40 = vld [vmem:[%s2495_s24 + $0x688] sm:$0xff] }
 0x13c   : > { %5259 = vst [vmem:[#allocation164_spill] sm:$0xff] %v3308_v41  ;;  %v420_v41 = vld [vmem:[%s2495_s24 + $0x680] sm:$0xff]  ;;  %v3387_v28 = vmul.f32 %v3263_v3, %v421_v40  ;;  %v3405_v40 = vmul.f32 %v3263_v3, %v426_v4  ;;  %v824_v4 = vadd.f32 %v2695_v49, %v2565_v39 }
 0x13d   : > { %5260 = vst [vmem:[#allocation165_spill] sm:$0xff] %v3314_v26  ;;  %v425_v26 = vld [vmem:[%s2495_s24 + $0x6a8] sm:$0xff]  ;;  %v3384_v42 = vmul.f32 %v3263_v3, %v420_v41  ;;  %v3408_v41 = vmul.f32 %v3263_v3, %v427_v19  ;;  %v440_v49 = vld [vmem:[%s2495_s24 + $0x720] sm:$0xff] }
 0x13e   : > { %5261 = vst [vmem:[#allocation166_spill] sm:$0xff] %v3317_v53  ;;  %v3344_v53 = vmul.f32 %v3263_v3, %v409_v7  ;;  %v3362_v7 = vmul.f32 %v3263_v3, %v414_v54  ;;  %v772_v54 = vadd.f32 %v2679_v34, %v2549_v31  ;;  %v3402_v34 = vmul.f32 %v3263_v3, %v425_v26 }
 0x13f   : > { %5262 = vst [vmem:[#allocation167_spill] sm:$0xff] %v3320_v22  ;;  %v424_v22 = vld [vmem:[%s2495_s24 + $0x6a0] sm:$0xff]  ;;  %v811_v26 = vadd.f32 %v2692_v9, %v2562_v38  ;;  %v3431_v38 = vmul.f32 %v3263_v3, %v428_v20  ;;  %v438_v9 = vld [vmem:[%s2495_s24 + $0x710] sm:$0xff] }
 0x140   : > { %5263 = vst [vmem:[#allocation168_spill] sm:$0xff] %v3365_v63  ;;  %v429_v63 = vld [vmem:[%s2495_s24 + $0x6c8] sm:$0xff]  ;;  %v3399_v31 = vmul.f32 %v3263_v3, %v424_v22  ;;  %v798_v22 = vadd.f32 %v2689_v48, %v2559_v37  ;;  %v773_v19 = vadd.f32 %v772_v54, %v2809_v32  ;;  %v436_v37 = vld [vmem:[%s2495_s24 + $0x700] sm:$0xff]  ;;  %v3437_v48 = vmul.f32 %v3263_v3, %v430_v51  ;;  %v443_v54 = vld [vmem:[%s2495_s24 + $0x738] sm:$0xff] }
 0x141   : > { %5264 = vst [vmem:[#allocation169_spill] sm:$0xff] %v3371_v62  ;;  %v432_v62 = vld [vmem:[%s2495_s24 + $0x6e0] sm:$0xff]  ;;  %v3434_v39 = vmul.f32 %v3263_v3, %v429_v63  ;;  %v441_v63 = vld [vmem:[%s2495_s24 + $0x728] sm:$0xff]  ;;  %v812_v51 = vadd.f32 %v811_v26, %v2822_v0 }
 0x142   : > { %5265 = vst [vmem:[#allocation170_spill] sm:$0xff] %v3374_v18  ;;  %v3393_v18 = vmul.f32 %v3263_v3, %v423_v13  ;;  %v434_v13 = vld [vmem:[%s2495_s24 + $0x6f0] sm:$0xff]  ;;  %v449_v26 = vld [vmem:[%s2495_s24 + $0x768] sm:$0xff] }
 0x143   : > { %5266 = vst [vmem:[#allocation171_spill] sm:$0xff] %v3377_v29  ;;  %v431_v29 = vld [vmem:[%s2495_s24 + $0x6d8] sm:$0xff] }
 0x144   : > { %5267 = vst [vmem:[#allocation172_spill] sm:$0xff] %v3384_v42 }
 0x145   : > { %5268 = vst [vmem:[#allocation173_spill] sm:$0xff] %v3387_v28  ;;  %v5294_v28 = vld [vmem:[#allocation115_spill] sm:$0xff] }
 0x146   : > { %5269 = vst [vmem:[#allocation174_spill] sm:$0xff] %v3390_v27  ;;  %v785_v27 = vadd.f32 %v2686_v43, %v2556_v36  ;;  %v863_v36 = vadd.f32 %v2708_v58, %v2578_v46  ;;  %v437_v43 = vld [vmem:[%s2495_s24 + $0x708] sm:$0xff]  ;;  %v439_v46 = vld [vmem:[%s2495_s24 + $0x718] sm:$0xff]  ;;  %v3454_v58 = vmul.f32 %v3263_v3, %v434_v13  ;;  %v774_v13 = vadd.f32 %v773_v19, %v2939_v50  ;;  %v448_v50 = vld [vmem:[%s2495_s24 + $0x760] sm:$0xff] }
 0x147   : > { %5270 = vst [vmem:[#allocation175_spill] sm:$0xff] %v3393_v18  ;;  %v435_v18 = vld [vmem:[%s2495_s24 + $0x6f8] sm:$0xff] }
 0x148   : > { %5271 = vst [vmem:[#allocation176_spill] sm:$0xff] %v3399_v31  ;;  %v3457_v32 = vmul.f32 %v3263_v3, %v435_v18  ;;  %v786_v20 = vadd.f32 %v785_v27, %v2816_v25  ;;  %v864_v18 = vadd.f32 %v863_v36, %v2838_v15  ;;  %v445_v25 = vld [vmem:[%s2495_s24 + $0x748] sm:$0xff]  ;;  %v451_v19 = vld [vmem:[%s2495_s24 + $0x778] sm:$0xff] }
 0x149   : > { %5272 = vst [vmem:[#allocation177_spill] sm:$0xff] %v3402_v34 }
 0x14a   : > { %5273 = vst [vmem:[#allocation178_spill] sm:$0xff] %v3405_v40  ;;  %v850_v40 = vadd.f32 %v2705_v57, %v2575_v45  ;;  %v3442_v45 = vpop.permute.xlu1 %513  ;;  %v3451_v57 = vmul.f32 %v3263_v3, %v433_v52  ;;  %v825_v52 = vadd.f32 %v824_v4, %v2825_v23  ;;  %v450_v4 = vld [vmem:[%s2495_s24 + $0x770] sm:$0xff]  ;;  %v787_v36 = vadd.f32 %v786_v20, %v2946_v2  ;;  %v453_v2 = vld [vmem:[%s2495_s24 + $0x788] sm:$0xff] }
 0x14b   : > { %5274 = vst [vmem:[#allocation179_spill] sm:$0xff] %v3408_v41  ;;  %v837_v41 = vadd.f32 %v2702_v56, %v2572_v44  ;;  %v3440_v44 = vmul.f32 %v3263_v3, %v431_v29  ;;  %v3448_v56 = vmul.f32 %v3263_v3, %v432_v62  ;;  %v442_v29 = vld [vmem:[%s2495_s24 + $0x730] sm:$0xff]  ;;  %v799_v62 = vadd.f32 %v798_v22, %v2819_v24 }
 0x14c   : > { %5275 = vst [vmem:[#allocation180_spill] sm:$0xff] %v3431_v38  ;;  %v851_v3 = vadd.f32 %v850_v40, %v2835_v16  ;;  %v3473_v27 = vmul.f32 %v3442_v45, %v436_v37  ;;  %v3476_v24 = vmul.f32 %v3442_v45, %v437_v43  ;;  %v3479_v0 = vmul.f32 %v3442_v45, %v438_v9  ;;  %v447_v16 = vld [vmem:[%s2495_s24 + $0x758] sm:$0xff]  ;;  %v5292_v38 = vld [vmem:[#allocation113_spill] sm:$0xff] }
 0x14d   : > { %5276 = vst [vmem:[#allocation181_spill] sm:$0xff] %v3434_v39  ;;  %v3482_v23 = vmul.f32 %v3442_v45, %v439_v46  ;;  %v3488_v15 = vmul.f32 %v3442_v45, %v440_v49  ;;  %v3491_v40 = vmul.f32 %v3442_v45, %v441_v63  ;;  %v3497_v22 = vmul.f32 %v3442_v45, %v443_v54  ;;  %v5283_v46 = vld [vmem:[#allocation108_spill] sm:$0xff]  ;;  %v5284_v63 = vld [vmem:[#allocation81_spill] sm:$0xff]  ;;  %v5285_v54 = vld [vmem:[#allocation82_spill] sm:$0xff] }
 0x14e   : > { %5277 = vst [vmem:[#allocation182_spill] sm:$0xff] %v3437_v48  ;;  %v800_v37 = vadd.f32 %v799_v62, %v2949_v61  ;;  %v813_v43 = vadd.f32 %v812_v51, %v2952_v30  ;;  %v826_v9 = vadd.f32 %v825_v52, %v2955_v60  ;;  %v775_v49 = vadd.f32 %v774_v13, %v5283_v46  ;;  %v452_v48 = vld [vmem:[%s2495_s24 + $0x780] sm:$0xff]  ;;  %v455_v62 = vld [vmem:[%s2495_s24 + $0x798] sm:$0xff]  ;;  %v5289_v46 = vld [vmem:[#allocation110_spill] sm:$0xff] }
 0x14f   : > { %5278 = vst [vmem:[#allocation183_spill] sm:$0xff] %v3440_v44  ;;  %v3516_v61 = vmul.f32 %v3442_v45, %v445_v25  ;;  %v3522_v60 = vmul.f32 %v3442_v45, %v447_v16  ;;  %v456_v51 = vld [vmem:[%s2495_s24 + $0x7a0] sm:$0xff]  ;;  %v3534_v52 = vmul.f32 %v3442_v45, %v450_v4  ;;  %v3537_v13 = vmul.f32 %v3442_v45, %v451_v19  ;;  %v459_v25 = vld [vmem:[%s2495_s24 + $0x7b8] sm:$0xff]  ;;  %v5293_v19 = vld [vmem:[#allocation114_spill] sm:$0xff] }
 0x150   : > { %5279 = vst [vmem:[#allocation184_spill] sm:$0xff] %v3448_v56  ;;  %v5286_v56 = vld [vmem:[#allocation83_spill] sm:$0xff]  ;;  %v776_v4 = vadd.f32 %v775_v49, %v3199_v10  ;;  %v3562_v10 = vmul.f32 %v3442_v45, %v455_v62  ;;  %v3577_v49 = vmul.f32 %v3442_v45, %v459_v25 }
 0x151   : > { %5280 = vst [vmem:[#allocation185_spill] sm:$0xff] %v3451_v57  ;;  %v852_v57 = vadd.f32 %v851_v3, %v5285_v54  ;;  %v865_v44 = vadd.f32 %v864_v18, %v5286_v56  ;;  %v3528_v56 = vmul.f32 %v3442_v45, %v448_v50  ;;  %v457_v3 = vld [vmem:[%s2495_s24 + $0x7a8] sm:$0xff]  ;;  %v458_v18 = vld [vmem:[%s2495_s24 + $0x7b0] sm:$0xff]  ;;  %v801_v50 = vadd.f32 %v800_v37, %v5289_v46  ;;  %v5301_v46 = vld [vmem:[#allocation140_spill] sm:$0xff] }
 0x152   : > { %5281 = vst [vmem:[#allocation186_spill] sm:$0xff] %v3454_v58  ;;  %v838_v58 = vadd.f32 %v837_v41, %v2832_v17  ;;  %v446_v17 = vld [vmem:[%s2495_s24 + $0x750] sm:$0xff]  ;;  %v3494_v41 = vmul.f32 %v3442_v45, %v442_v29  ;;  %v3556_v37 = vmul.f32 %v3442_v45, %v453_v2 }
 0x153   : > { %5282 = vst [vmem:[#allocation187_spill] sm:$0xff] %v3457_v32  ;;  %v444_v32 = vld [vmem:[%s2495_s24 + $0x740] sm:$0xff]  ;;  %v3519_v30 = vmul.f32 %v3442_v45, %v446_v17  ;;  %v853_v31 = vadd.f32 %v852_v57, %v5293_v19  ;;  %v866_v42 = vadd.f32 %v865_v44, %v5294_v28  ;;  %v463_v57 = vld [vmem:[%s2495_s24 + $0x7d8] sm:$0xff]  ;;  %v3568_v28 = vmul.f32 %v3442_v45, %v456_v51  ;;  %v466_v2 = vld [vmem:[%s2495_s24 + $0x7f0] sm:$0xff] }
 0x154   : > { %v839_v29 = vadd.f32 %v838_v58, %v5284_v63  ;;  %v3513_v20 = vmul.f32 %v3442_v45, %v444_v32  ;;  %v454_v58 = vld [vmem:[%s2495_s24 + $0x790] sm:$0xff]  ;;  %v3531_v32 = vmul.f32 %v3442_v45, %v449_v26  ;;  %5287 = vst [vmem:[#allocation108_spill] sm:$0xff] %v3537_v13  ;;  %v5288_v17 = vld [vmem:[#allocation109_spill] sm:$0xff]  ;;  %v5291_v26 = vld [vmem:[#allocation112_spill] sm:$0xff]  ;;  %v3571_v44 = vmul.f32 %v3442_v45, %v457_v3 }
 0x155   : > { %v788_v16 = vadd.f32 %v787_v36, %v5288_v17  ;;  %v5290_v63 = vld [vmem:[#allocation111_spill] sm:$0xff]  ;;  %v827_v39 = vadd.f32 %v826_v9, %v5291_v26  ;;  %v460_v13 = vld [vmem:[%s2495_s24 + $0x7c0] sm:$0xff]  ;;  %v461_v36 = vld [vmem:[%s2495_s24 + $0x7c8] sm:$0xff]  ;;  %v3553_v17 = vmul.f32 %v3442_v45, %v452_v48  ;;  %5296 = vst [vmem:[#allocation82_spill] sm:$0xff] %v3562_v10  ;;  %v3574_v48 = vmul.f32 %v3442_v45, %v458_v18 }
 0x156   : > { %v814_v54 = vadd.f32 %v813_v43, %v5290_v63  ;;  %v840_v34 = vadd.f32 %v839_v29, %v5292_v38  ;;  %v3559_v43 = vmul.f32 %v3442_v45, %v454_v58  ;;  %v462_v38 = vld [vmem:[%s2495_s24 + $0x7d0] sm:$0xff]  ;;  %v464_v9 = vld [vmem:[%s2495_s24 + $0x7e0] sm:$0xff]  ;;  %5297 = vst [vmem:[#allocation83_spill] sm:$0xff] %v3568_v28  ;;  %v465_v29 = vld [vmem:[%s2495_s24 + $0x7e8] sm:$0xff]  ;;  %v802_v63 = vadd.f32 %v801_v50, %v5301_v46 }
 0x157   : > { %5298 = vst [vmem:[#allocation109_spill] sm:$0xff] %v3571_v44  ;;  %v467_v58 = vld [vmem:[%s2495_s24 + $0x7f8] sm:$0xff]  ;;  %v789_v62 = vadd.f32 %v788_v16, %v3206_v33  ;;  %v5302_v26 = vld [vmem:[#allocation141_spill] sm:$0xff]  ;;  %v5303_v51 = vld [vmem:[#allocation142_spill] sm:$0xff]  ;;  %v777_v3 = vadd.f32 %v776_v4, %v3323_v11  ;;  %v3597_v33 = vmul.f32 %v3442_v45, %v462_v38  ;;  %v3600_v16 = vmul.f32 %v3442_v45, %v463_v57  ;;  %s3849_s24 = sld [smem:[#allocation2]] }
 0x158   : > { %5295 = vst [vmem:[#allocation81_spill] sm:$0xff] %v3559_v43  ;;  %v815_v19 = vadd.f32 %v814_v54, %v5302_v26  ;;  %v828_v28 = vadd.f32 %v827_v39, %v5303_v51  ;;  %v841_v44 = vadd.f32 %v840_v34, %v3222_v6  ;;  %v5304_v18 = vld [vmem:[#allocation143_spill] sm:$0xff]  ;;  %v5305_v10 = vld [vmem:[#allocation144_spill] sm:$0xff]  ;;  %v3594_v43 = vmul.f32 %v3442_v45, %v461_v36  ;;  %v5308_v38 = vld [vmem:[#allocation9_spill] sm:$0xff] }
 0x159   : > { %5299 = vst [vmem:[#allocation110_spill] sm:$0xff] %v3574_v48  ;;  %v854_v48 = vadd.f32 %v853_v31, %v5304_v18  ;;  %v867_v25 = vadd.f32 %v866_v42, %v5305_v10  ;;  %v3603_v11 = vmul.f32 %v3442_v45, %v464_v9  ;;  %v3606_v6 = vmul.f32 %v3442_v45, %v465_v29  ;;  %v5309_v57 = vld [vmem:[#allocation33_spill] sm:$0xff]  ;;  %v5310_v9 = vld [vmem:[#allocation10_spill] sm:$0xff]  ;;  %v5322_v26 = vld [vmem:[#allocation16_spill] sm:$0xff] }
 0x15a   : > { %5300 = vst [vmem:[#allocation111_spill] sm:$0xff] %v3577_v49  ;;  %v3591_v49 = vmul.f32 %v3442_v45, %v460_v13  ;;  %v3609_v42 = vmul.f32 %v3442_v45, %v466_v2  ;;  %v3612_v31 = vmul.f32 %v3442_v45, %v467_v58  ;;  %v790_v34 = vadd.f32 %v789_v62, %v3329_v35  ;;  %v5311_v29 = vld [vmem:[#allocation34_spill] sm:$0xff]  ;;  %v5312_v2 = vld [vmem:[#allocation11_spill] sm:$0xff]  ;;  %v5315_v62 = vld [vmem:[#allocation36_spill] sm:$0xff] }
 0x15b   : > { %v803_v39 = vadd.f32 %v802_v63, %v3332_v47  ;;  %v816_v13 = vadd.f32 %v815_v19, %v3335_v1  ;;  %v829_v50 = vadd.f32 %v828_v28, %v3338_v59  ;;  %v778_v54 = vadd.f32 %v777_v3, %v3473_v27  ;;  %v5313_v47 = vld [vmem:[#allocation35_spill] sm:$0xff]  ;;  %v5314_v1 = vld [vmem:[#allocation12_spill] sm:$0xff]  ;;  %v5316_v28 = vld [vmem:[#allocation13_spill] sm:$0xff] }
 0x15c   : > { %5306 = vst [vmem:[#allocation112_spill] sm:$0xff] %v3609_v42  ;;  %v842_v4 = vadd.f32 %v841_v44, %v3344_v53  ;;  %v855_v36 = vadd.f32 %v854_v48, %v3347_v55  ;;  %v868_v10 = vadd.f32 %v867_v25, %v3350_v14  ;;  %v876_v45 = vadd.f32 %v5309_v57, %v5308_v38  ;;  %v5317_v27 = vld [vmem:[#allocation37_spill] sm:$0xff]  ;;  %v5318_v53 = vld [vmem:[#allocation14_spill] sm:$0xff]  ;;  %v5320_v48 = vld [vmem:[#allocation15_spill] sm:$0xff] }
 0x15d   : > { %5307 = vst [vmem:[#allocation113_spill] sm:$0xff] %v3612_v31  ;;  %v889_v35 = vadd.f32 %v5311_v29, %v5310_v9  ;;  %v902_v58 = vadd.f32 %v5313_v47, %v5312_v2  ;;  %v915_v59 = vadd.f32 %v5315_v62, %v5314_v1  ;;  %v928_v46 = vadd.f32 %v5317_v27, %v5316_v28  ;;  %v5319_v44 = vld [vmem:[#allocation38_spill] sm:$0xff]  ;;  %v5321_v14 = vld [vmem:[#allocation39_spill] sm:$0xff]  ;;  %v5323_v19 = vld [vmem:[#allocation40_spill] sm:$0xff] }
 0x15e   : > { %v941_v55 = vadd.f32 %v5319_v44, %v5318_v53  ;;  %v954_v63 = vadd.f32 %v5321_v14, %v5320_v48  ;;  %v967_v51 = vadd.f32 %v5323_v19, %v5322_v26  ;;  %v791_v3 = vadd.f32 %v790_v34, %v3476_v24  ;;  %v5324_v47 = vld [vmem:[#allocation57_spill] sm:$0xff]  ;;  %v5325_v62 = vld [vmem:[#allocation58_spill] sm:$0xff]  ;;  %v5326_v27 = vld [vmem:[#allocation59_spill] sm:$0xff] }
 0x15f   : > { %v804_v18 = vadd.f32 %v803_v39, %v3479_v0  ;;  %v817_v25 = vadd.f32 %v816_v13, %v3482_v23  ;;  %v830_v38 = vadd.f32 %v829_v50, %v3488_v15  ;;  %v779_v57 = vrot.slane %v778_v54, 4  ;;  %v5327_v24 = vld [vmem:[#allocation60_spill] sm:$0xff]  ;;  %v5328_v0 = vld [vmem:[#allocation61_spill] sm:$0xff]  ;;  %v5329_v23 = vld [vmem:[#allocation62_spill] sm:$0xff] }
 0x160   : > { %v843_v9 = vadd.f32 %v842_v4, %v3491_v40  ;;  %v856_v29 = vadd.f32 %v855_v36, %v3494_v41  ;;  %v869_v2 = vadd.f32 %v868_v10, %v3497_v22  ;;  %v877_v1 = vadd.f32 %v876_v45, %v5324_v47  ;;  %v5330_v15 = vld [vmem:[#allocation63_spill] sm:$0xff]  ;;  %v5331_v44 = vld [vmem:[#allocation64_spill] sm:$0xff]  ;;  %v5333_v26 = vld [vmem:[#allocation85_spill] sm:$0xff] }
 0x161   : > { %v890_v28 = vadd.f32 %v889_v35, %v5325_v62  ;;  %v903_v53 = vadd.f32 %v902_v58, %v5326_v27  ;;  %v916_v34 = vadd.f32 %v915_v59, %v5327_v24  ;;  %v929_v39 = vadd.f32 %v928_v46, %v5328_v0  ;;  %v5332_v14 = vld [vmem:[#allocation84_spill] sm:$0xff]  ;;  %v5334_v19 = vld [vmem:[#allocation86_spill] sm:$0xff]  ;;  %v5335_v47 = vld [vmem:[#allocation87_spill] sm:$0xff] }
 0x162   : > { %v942_v13 = vadd.f32 %v941_v55, %v5329_v23  ;;  %v955_v50 = vadd.f32 %v954_v63, %v5330_v15  ;;  %v968_v40 = vadd.f32 %v967_v51, %v5331_v44  ;;  %v792_v4 = vrot.slane %v791_v3, 4  ;;  %v5336_v62 = vld [vmem:[#allocation88_spill] sm:$0xff]  ;;  %v5337_v27 = vld [vmem:[#allocation89_spill] sm:$0xff]  ;;  %v5338_v24 = vld [vmem:[#allocation90_spill] sm:$0xff] }
 0x163   : > { %v805_v41 = vrot.slane %v804_v18, 4  ;;  %v818_v36 = vrot.slane %v817_v25, 4  ;;  %v831_v22 = vrot.slane %v830_v38, 4  ;;  %v780_v10 = vadd.f32 %v779_v57, %v778_v54  ;;  %v5339_v23 = vld [vmem:[#allocation91_spill] sm:$0xff] }
 0x164   : > { %v844_v45 = vrot.slane %v843_v9, 4  ;;  %v857_v48 = vrot.slane %v856_v29, 4  ;;  %v870_v35 = vrot.slane %v869_v2, 4  ;;  %v878_v58 = vadd.f32 %v877_v1, %v5332_v14 }
 0x165   : > { %v891_v59 = vadd.f32 %v890_v28, %v5333_v26  ;;  %v904_v46 = vadd.f32 %v903_v53, %v5334_v19  ;;  %v917_v55 = vadd.f32 %v916_v34, %v5335_v47  ;;  %v930_v63 = vadd.f32 %v929_v39, %v5336_v62  ;;  %v5340_v26 = vld [vmem:[#allocation116_spill] sm:$0xff]  ;;  %v5341_v19 = vld [vmem:[#allocation117_spill] sm:$0xff]  ;;  %v5342_v47 = vld [vmem:[#allocation118_spill] sm:$0xff] }
 0x166   : > { %v943_v51 = vadd.f32 %v942_v13, %v5337_v27  ;;  %v956_v0 = vadd.f32 %v955_v50, %v5338_v24  ;;  %v969_v15 = vadd.f32 %v968_v40, %v5339_v23  ;;  %v793_v54 = vadd.f32 %v792_v4, %v791_v3  ;;  %v5343_v62 = vld [vmem:[#allocation119_spill] sm:$0xff]  ;;  %v5344_v27 = vld [vmem:[#allocation120_spill] sm:$0xff]  ;;  %v5345_v24 = vld [vmem:[#allocation121_spill] sm:$0xff] }
 0x167   : > { %v806_v57 = vadd.f32 %v805_v41, %v804_v18  ;;  %v819_v44 = vadd.f32 %v818_v36, %v817_v25  ;;  %v832_v31 = vadd.f32 %v831_v22, %v830_v38  ;;  %v781_v42 = vrot.slane %v780_v10, 2  ;;  %v5346_v3 = vld [vmem:[#allocation122_spill] sm:$0xff]  ;;  %v5347_v25 = vld [vmem:[#allocation123_spill] sm:$0xff]  ;;  %v5352_v23 = vld [vmem:[#allocation149_spill] sm:$0xff] }
 0x168   : > { %v845_v1 = vadd.f32 %v844_v45, %v843_v9  ;;  %v858_v14 = vadd.f32 %v857_v48, %v856_v29  ;;  %v871_v28 = vadd.f32 %v870_v35, %v869_v2  ;;  %v879_v53 = vadd.f32 %v878_v58, %v5340_v26  ;;  %v5348_v48 = vld [vmem:[#allocation145_spill] sm:$0xff]  ;;  %v5353_v26 = vld [vmem:[#allocation150_spill] sm:$0xff] }
 0x169   : > { %v892_v34 = vadd.f32 %v891_v59, %v5341_v19  ;;  %v905_v39 = vadd.f32 %v904_v46, %v5342_v47  ;;  %v918_v13 = vadd.f32 %v917_v55, %v5343_v62  ;;  %v931_v50 = vadd.f32 %v930_v63, %v5344_v27  ;;  %v5349_v59 = vld [vmem:[#allocation146_spill] sm:$0xff]  ;;  %v5350_v55 = vld [vmem:[#allocation147_spill] sm:$0xff] }
 0x16a   : > { %v944_v40 = vadd.f32 %v943_v51, %v5345_v24  ;;  %v957_v18 = vadd.f32 %v956_v0, %v5346_v3  ;;  %v970_v38 = vadd.f32 %v969_v15, %v5347_v25  ;;  %v794_v4 = vrot.slane %v793_v54, 2  ;;  %v5351_v51 = vld [vmem:[#allocation148_spill] sm:$0xff]  ;;  %v5354_v47 = vld [vmem:[#allocation151_spill] sm:$0xff] }
 0x16b   : > { %v807_v9 = vrot.slane %v806_v57, 2  ;;  %v820_v29 = vrot.slane %v819_v44, 2  ;;  %v833_v2 = vrot.slane %v832_v31, 2  ;;  %v782_v41 = vadd.f32 %v781_v42, %v780_v10 }
 0x16c   : > { %v846_v36 = vrot.slane %v845_v1, 2  ;;  %v859_v22 = vrot.slane %v858_v14, 2  ;;  %v872_v45 = vrot.slane %v871_v28, 2  ;;  %v880_v35 = vadd.f32 %v879_v53, %v5348_v48  ;;  %v5356_v48 = vld [vmem:[#allocation169_spill] sm:$0xff] }
 0x16d   : > { %v893_v58 = vadd.f32 %v892_v34, %v3237_v5  ;;  %v906_v46 = vadd.f32 %v905_v39, %v5349_v59  ;;  %v919_v63 = vadd.f32 %v918_v13, %v5350_v55  ;;  %v932_v0 = vadd.f32 %v931_v50, %v5351_v51  ;;  %v5355_v50 = vld [vmem:[#allocation168_spill] sm:$0xff] }
 0x16e   : > { %v945_v15 = vadd.f32 %v944_v40, %v5352_v23  ;;  %v958_v19 = vadd.f32 %v957_v18, %v5353_v26  ;;  %v971_v62 = vadd.f32 %v970_v38, %v5354_v47  ;;  %v795_v42 = vadd.f32 %v794_v4, %v793_v54  ;;  %v5357_v54 = vld [vmem:[#allocation170_spill] sm:$0xff] }
 0x16f   : > { %v808_v10 = vadd.f32 %v807_v9, %v806_v57  ;;  %v821_v27 = vadd.f32 %v820_v29, %v819_v44  ;;  %v834_v24 = vadd.f32 %v833_v2, %v832_v31  ;;  %v783_v3 = vrot.slane %v782_v41, 1  ;;  %v5358_v44 = vld [vmem:[#allocation171_spill] sm:$0xff] }
 0x170   : > { %v847_v53 = vadd.f32 %v846_v36, %v845_v1  ;;  %v860_v25 = vadd.f32 %v859_v22, %v858_v14  ;;  %v873_v5 = vadd.f32 %v872_v45, %v871_v28  ;;  %v881_v34 = vadd.f32 %v880_v35, %v3353_v8 }
 0x171   : > { %v894_v39 = vadd.f32 %v893_v58, %v3359_v21  ;;  %v907_v13 = vadd.f32 %v906_v46, %v3362_v7  ;;  %v920_v40 = vadd.f32 %v919_v63, %v5355_v50  ;;  %v933_v18 = vadd.f32 %v932_v0, %v3368_v12  ;;  %v5359_v58 = vld [vmem:[#allocation108_spill] sm:$0xff]  ;;  %v5370_v50 = vld [vmem:[#allocation65_spill] sm:$0xff] }
 0x172   : > { %v946_v38 = vadd.f32 %v945_v15, %v5356_v48  ;;  %v959_v57 = vadd.f32 %v958_v19, %v5357_v54  ;;  %v972_v31 = vadd.f32 %v971_v62, %v5358_v44  ;;  %v796_v4 = vrot.slane %v795_v42, 1  ;;  %v5362_v62 = vld [vmem:[#allocation18_spill] sm:$0xff]  ;;  %v5373_v54 = vld [vmem:[#allocation23_spill] sm:$0xff] }
 0x173   : > { %v809_v1 = vrot.slane %v808_v10, 1  ;;  %v822_v14 = vrot.slane %v821_v27, 1  ;;  %v835_v28 = vrot.slane %v834_v24, 1  ;;  %v3685_v9 = vadd.f32 %v783_v3, %v782_v41  ;;  %v5372_v48 = vld [vmem:[#allocation46_spill] sm:$0xff] }
 0x174   : > { %v848_v8 = vrot.slane %v847_v53, 1  ;;  %v861_v21 = vrot.slane %v860_v25, 1  ;;  %v874_v29 = vrot.slane %v873_v5, 1  ;;  %v882_v7 = vadd.f32 %v881_v34, %v3513_v20  ;;  %v5368_v34 = vld [vmem:[#allocation21_spill] sm:$0xff] }
 0x175   : > { %v895_v2 = vadd.f32 %v894_v39, %v3516_v61  ;;  %v908_v12 = vadd.f32 %v907_v13, %v3519_v30  ;;  %v921_v36 = vadd.f32 %v920_v40, %v3522_v60  ;;  %v934_v22 = vadd.f32 %v933_v18, %v3528_v56  ;;  %v5360_v56 = vld [vmem:[#allocation17_spill] sm:$0xff]  ;;  %v5371_v18 = vld [vmem:[#allocation22_spill] sm:$0xff] }
 0x176   : > { %v947_v45 = vadd.f32 %v946_v38, %v3531_v32  ;;  %v960_v35 = vadd.f32 %v959_v57, %v3534_v52  ;;  %v973_v41 = vadd.f32 %v972_v31, %v5359_v58  ;;  %v3695_v59 = vadd.f32 %v796_v4, %v795_v42  ;;  %v5361_v32 = vld [vmem:[#allocation41_spill] sm:$0xff]  ;;  %v5363_v42 = vld [vmem:[#allocation42_spill] sm:$0xff]  ;;  %v5374_v57 = vld [vmem:[#allocation47_spill] sm:$0xff] }
 0x177   : > { %v3697_v46 = vadd.f32 %v809_v1, %v808_v10  ;;  %v3699_v55 = vadd.f32 %v822_v14, %v821_v27  ;;  %v3701_v20 = vadd.f32 %v835_v28, %v834_v24  ;;  %v3703_v61 = vadd.f32 %v848_v8, %v847_v53  ;;  %v5364_v27 = vld [vmem:[#allocation19_spill] sm:$0xff]  ;;  %v5366_v53 = vld [vmem:[#allocation20_spill] sm:$0xff]  ;;  %v5369_v39 = vld [vmem:[#allocation45_spill] sm:$0xff] }
 0x178   : > { %v3705_v30 = vadd.f32 %v861_v21, %v860_v25  ;;  %v3707_v60 = vadd.f32 %v874_v29, %v873_v5  ;;  %v980_v63 = vadd.f32 %v5361_v32, %v5360_v56  ;;  %v883_v52 = vrot.slane %v882_v7, 4  ;;  %v5365_v24 = vld [vmem:[#allocation43_spill] sm:$0xff]  ;;  %v5367_v25 = vld [vmem:[#allocation44_spill] sm:$0xff] }
 0x179   : > { %v896_v51 = vrot.slane %v895_v2, 4  ;;  %v909_v0 = vrot.slane %v908_v12, 4  ;;  %v922_v23 = vrot.slane %v921_v36, 4  ;;  %v935_v15 = vrot.slane %v934_v22, 4  ;;  %v5375_v31 = vld [vmem:[#allocation24_spill] sm:$0xff] }
 0x17a   : > { %v948_v26 = vrot.slane %v947_v45, 4  ;;  %v961_v19 = vrot.slane %v960_v35, 4  ;;  %v974_v47 = vrot.slane %v973_v41, 4  ;;  %v993_v10 = vadd.f32 %v5363_v42, %v5362_v62  ;;  %v5376_v4 = vld [vmem:[#allocation48_spill] sm:$0xff]  ;;  %v5377_v62 = vld [vmem:[#allocation66_spill] sm:$0xff] }
 0x17b   : > { %v1006_v3 = vadd.f32 %v5365_v24, %v5364_v27  ;;  %v1019_v5 = vadd.f32 %v5367_v25, %v5366_v53  ;;  %v1032_v13 = vadd.f32 %v5369_v39, %v5368_v34  ;;  %v981_v40 = vadd.f32 %v980_v63, %v5370_v50  ;;  %v5378_v63 = vld [vmem:[#allocation67_spill] sm:$0xff]  ;;  %v5379_v24 = vld [vmem:[#allocation68_spill] sm:$0xff]  ;;  %v5380_v25 = vld [vmem:[#allocation69_spill] sm:$0xff] }
 0x17c   : > { %v1045_v38 = vadd.f32 %v5372_v48, %v5371_v18  ;;  %v1058_v44 = vadd.f32 %v5374_v57, %v5373_v54  ;;  %v1071_v1 = vadd.f32 %v5376_v4, %v5375_v31  ;;  %v884_v14 = vadd.f32 %v883_v52, %v882_v7  ;;  %v5381_v39 = vld [vmem:[#allocation92_spill] sm:$0xff]  ;;  %v5382_v18 = vld [vmem:[#allocation70_spill] sm:$0xff]  ;;  %v5383_v7 = vld [vmem:[#allocation71_spill] sm:$0xff] }
 0x17d   : > { %v897_v28 = vadd.f32 %v896_v51, %v895_v2  ;;  %v910_v8 = vadd.f32 %v909_v0, %v908_v12  ;;  %v923_v21 = vadd.f32 %v922_v23, %v921_v36  ;;  %v936_v29 = vadd.f32 %v935_v15, %v934_v22  ;;  %v5384_v12 = vld [vmem:[#allocation72_spill] sm:$0xff]  ;;  %v5385_v15 = vld [vmem:[#allocation93_spill] sm:$0xff]  ;;  %v5392_v4 = vld [vmem:[#allocation99_spill] sm:$0xff] }
 0x17e   : > { %v949_v58 = vadd.f32 %v948_v26, %v947_v45  ;;  %v962_v56 = vadd.f32 %v961_v19, %v960_v35  ;;  %v975_v32 = vadd.f32 %v974_v47, %v973_v41  ;;  %v994_v42 = vadd.f32 %v993_v10, %v5377_v62  ;;  %v5386_v19 = vld [vmem:[#allocation94_spill] sm:$0xff]  ;;  %v5387_v10 = vld [vmem:[#allocation95_spill] sm:$0xff]  ;;  %v5390_v54 = vld [vmem:[#allocation97_spill] sm:$0xff] }
 0x17f   : > { %v1007_v27 = vadd.f32 %v1006_v3, %v5378_v63  ;;  %v1020_v53 = vadd.f32 %v1019_v5, %v5379_v24  ;;  %v1033_v34 = vadd.f32 %v1032_v13, %v5380_v25  ;;  %v982_v50 = vadd.f32 %v981_v40, %v5381_v39  ;;  %v5388_v5 = vld [vmem:[#allocation96_spill] sm:$0xff] }
 0x180   : > { %v1046_v48 = vadd.f32 %v1045_v38, %v5382_v18  ;;  %v1059_v2 = vadd.f32 %v1058_v44, %v5383_v7  ;;  %v1072_v36 = vadd.f32 %v1071_v1, %v5384_v12  ;;  %v885_v22 = vrot.slane %v884_v14, 2  ;;  %v5389_v40 = vld [vmem:[#allocation124_spill] sm:$0xff]  ;;  %v5391_v44 = vld [vmem:[#allocation98_spill] sm:$0xff]  ;;  %v5393_v7 = vld [vmem:[#allocation125_spill] sm:$0xff] }
 0x181   : > { %v898_v45 = vrot.slane %v897_v28, 2  ;;  %v911_v35 = vrot.slane %v910_v8, 2  ;;  %v924_v41 = vrot.slane %v923_v21, 2  ;;  %v937_v52 = vrot.slane %v936_v29, 2  ;;  %v5394_v12 = vld [vmem:[#allocation126_spill] sm:$0xff] }
 0x182   : > { %v950_v51 = vrot.slane %v949_v58, 2  ;;  %v963_v0 = vrot.slane %v962_v56, 2  ;;  %v976_v23 = vrot.slane %v975_v32, 2  ;;  %v995_v26 = vadd.f32 %v994_v42, %v5385_v15  ;;  %v5395_v15 = vld [vmem:[#allocation127_spill] sm:$0xff] }
 0x183   : > { %v1008_v47 = vadd.f32 %v1007_v27, %v5386_v19  ;;  %v1021_v3 = vadd.f32 %v1020_v53, %v5387_v10  ;;  %v1034_v13 = vadd.f32 %v1033_v34, %v5388_v5  ;;  %v983_v38 = vadd.f32 %v982_v50, %v5389_v40  ;;  %v5396_v19 = vld [vmem:[#allocation128_spill] sm:$0xff]  ;;  %v5398_v5 = vld [vmem:[#allocation129_spill] sm:$0xff] }
 0x184   : > { %v1047_v57 = vadd.f32 %v1046_v48, %v5390_v54  ;;  %v1060_v31 = vadd.f32 %v1059_v2, %v5391_v44  ;;  %v1073_v1 = vadd.f32 %v1072_v36, %v5392_v4  ;;  %v886_v62 = vadd.f32 %v885_v22, %v884_v14  ;;  %v5397_v10 = vld [vmem:[#allocation152_spill] sm:$0xff]  ;;  %v5399_v14 = vld [vmem:[#allocation130_spill] sm:$0xff]  ;;  %v5406_v54 = vld [vmem:[#allocation157_spill] sm:$0xff] }
 0x185   : > { %v899_v63 = vadd.f32 %v898_v45, %v897_v28  ;;  %v912_v24 = vadd.f32 %v911_v35, %v910_v8  ;;  %v925_v25 = vadd.f32 %v924_v41, %v923_v21  ;;  %v938_v39 = vadd.f32 %v937_v52, %v936_v29  ;;  %v5400_v8 = vld [vmem:[#allocation131_spill] sm:$0xff]  ;;  %v5401_v52 = vld [vmem:[#allocation153_spill] sm:$0xff]  ;;  %v5405_v40 = vld [vmem:[#allocation172_spill] sm:$0xff] }
 0x186   : > { %v951_v42 = vadd.f32 %v950_v51, %v949_v58  ;;  %v964_v18 = vadd.f32 %v963_v0, %v962_v56  ;;  %v977_v27 = vadd.f32 %v976_v23, %v975_v32  ;;  %v996_v53 = vadd.f32 %v995_v26, %v5393_v7  ;;  %v5402_v0 = vld [vmem:[#allocation154_spill] sm:$0xff]  ;;  %v5403_v26 = vld [vmem:[#allocation155_spill] sm:$0xff] }
 0x187   : > { %v1009_v34 = vadd.f32 %v1008_v47, %v5394_v12  ;;  %v1022_v50 = vadd.f32 %v1021_v3, %v5395_v15  ;;  %v1035_v48 = vadd.f32 %v1034_v13, %v5396_v19  ;;  %v984_v2 = vadd.f32 %v983_v38, %v5397_v10  ;;  %v5404_v3 = vld [vmem:[#allocation156_spill] sm:$0xff]  ;;  %v5407_v44 = vld [vmem:[#allocation158_spill] sm:$0xff]  ;;  %v5408_v4 = vld [vmem:[#allocation159_spill] sm:$0xff] }
 0x188   : > { %v1048_v36 = vadd.f32 %v1047_v57, %v5398_v5  ;;  %v1061_v28 = vadd.f32 %v1060_v31, %v5399_v14  ;;  %v1074_v21 = vadd.f32 %v1073_v1, %v5400_v8  ;;  %v887_v29 = vrot.slane %v886_v62, 1  ;;  %v5411_v10 = vld [vmem:[#allocation173_spill] sm:$0xff]  ;;  %v5412_v5 = vld [vmem:[#allocation174_spill] sm:$0xff] }
 0x189   : > { %v900_v58 = vrot.slane %v899_v63, 1  ;;  %v913_v56 = vrot.slane %v912_v24, 1  ;;  %v926_v32 = vrot.slane %v925_v25, 1  ;;  %v939_v22 = vrot.slane %v938_v39, 1 }
 0x18a   : > { %v952_v45 = vrot.slane %v951_v42, 1  ;;  %v965_v35 = vrot.slane %v964_v18, 1  ;;  %v978_v41 = vrot.slane %v977_v27, 1  ;;  %v997_v51 = vadd.f32 %v996_v53, %v5401_v52  ;;  %v5424_v52 = vld [vmem:[#allocation28_spill] sm:$0xff] }
 0x18b   : > { %v1010_v23 = vadd.f32 %v1009_v34, %v5402_v0  ;;  %v1023_v47 = vadd.f32 %v1022_v50, %v5403_v26  ;;  %v1036_v13 = vadd.f32 %v1035_v48, %v5404_v3  ;;  %v985_v38 = vadd.f32 %v984_v2, %v5405_v40  ;;  %v5429_v3 = vld [vmem:[#allocation54_spill] sm:$0xff]  ;;  %v5430_v40 = vld [vmem:[#allocation31_spill] sm:$0xff] }
 0x18c   : > { %v1049_v57 = vadd.f32 %v1048_v36, %v5406_v54  ;;  %v1062_v31 = vadd.f32 %v1061_v28, %v5407_v44  ;;  %v1075_v1 = vadd.f32 %v1074_v21, %v5408_v4  ;;  %v3758_v7 = vadd.f32 %v887_v29, %v886_v62  ;;  %v5413_v62 = vld [vmem:[#allocation175_spill] sm:$0xff]  ;;  %v5433_v44 = vld [vmem:[#allocation56_spill] sm:$0xff]  ;;  %v5434_v4 = vld [vmem:[#allocation73_spill] sm:$0xff] }
 0x18d   : > { %v3760_v12 = vadd.f32 %v900_v58, %v899_v63  ;;  %v3762_v15 = vadd.f32 %v913_v56, %v912_v24  ;;  %v3764_v53 = vadd.f32 %v926_v32, %v925_v25  ;;  %v3766_v34 = vadd.f32 %v939_v22, %v938_v39  ;;  %v5414_v63 = vld [vmem:[#allocation176_spill] sm:$0xff]  ;;  %v5415_v25 = vld [vmem:[#allocation177_spill] sm:$0xff]  ;;  %v5416_v39 = vld [vmem:[#allocation178_spill] sm:$0xff] }
 0x18e   : > { %v3768_v50 = vadd.f32 %v952_v45, %v951_v42  ;;  %v3770_v19 = vadd.f32 %v965_v35, %v964_v18  ;;  %v3772_v48 = vadd.f32 %v978_v41, %v977_v27  ;;  %v998_v2 = vadd.f32 %v997_v51, %v5411_v10  ;;  %v5417_v42 = vld [vmem:[#allocation179_spill] sm:$0xff]  ;;  %v5418_v18 = vld [vmem:[#allocation25_spill] sm:$0xff]  ;;  %v5420_v56 = vld [vmem:[#allocation26_spill] sm:$0xff] }
 0x18f   : > { %v1011_v36 = vadd.f32 %v1010_v23, %v5412_v5  ;;  %v1024_v14 = vadd.f32 %v1023_v47, %v5413_v62  ;;  %v1037_v28 = vadd.f32 %v1036_v13, %v5414_v63  ;;  %v986_v24 = vadd.f32 %v985_v38, %v3553_v17  ;;  %v5419_v58 = vld [vmem:[#allocation49_spill] sm:$0xff]  ;;  %v5421_v32 = vld [vmem:[#allocation50_spill] sm:$0xff]  ;;  %v5422_v45 = vld [vmem:[#allocation27_spill] sm:$0xff] }
 0x190   : > { %5409 = vst [vmem:[#allocation114_spill] sm:$0xff] %v3770_v19  ;;  %v1050_v8 = vadd.f32 %v1049_v57, %v5415_v25  ;;  %v1063_v21 = vadd.f32 %v1062_v31, %v5416_v39  ;;  %v1076_v29 = vadd.f32 %v1075_v1, %v5417_v42  ;;  %v1084_v27 = vadd.f32 %v5419_v58, %v5418_v18  ;;  %v5423_v35 = vld [vmem:[#allocation51_spill] sm:$0xff]  ;;  %v5425_v51 = vld [vmem:[#allocation52_spill] sm:$0xff]  ;;  %v5426_v23 = vld [vmem:[#allocation29_spill] sm:$0xff] }
 0x191   : > { %5410 = vst [vmem:[#allocation115_spill] sm:$0xff] %v3772_v48  ;;  %v1097_v22 = vadd.f32 %v5421_v32, %v5420_v56  ;;  %v1110_v41 = vadd.f32 %v5423_v35, %v5422_v45  ;;  %v1123_v0 = vadd.f32 %v5425_v51, %v5424_v52  ;;  %v5427_v17 = vld [vmem:[#allocation53_spill] sm:$0xff]  ;;  %v5428_v47 = vld [vmem:[#allocation30_spill] sm:$0xff]  ;;  %v5431_v38 = vld [vmem:[#allocation55_spill] sm:$0xff] }
 0x192   : > { %v1136_v26 = vadd.f32 %v5427_v17, %v5426_v23  ;;  %v1149_v13 = vadd.f32 %v5429_v3, %v5428_v47  ;;  %v1162_v54 = vadd.f32 %v5431_v38, %v5430_v40  ;;  %v5432_v57 = vld [vmem:[#allocation32_spill] sm:$0xff]  ;;  %v1085_v1 = vadd.f32 %v1084_v27, %v5434_v4  ;;  %v5435_v10 = vld [vmem:[#allocation74_spill] sm:$0xff]  ;;  %v5436_v62 = vld [vmem:[#allocation75_spill] sm:$0xff] }
 0x193   : > { %v1175_v31 = vadd.f32 %v5433_v44, %v5432_v57  ;;  %v1098_v5 = vadd.f32 %v1097_v22, %v5435_v10  ;;  %v1111_v63 = vadd.f32 %v1110_v41, %v5436_v62  ;;  %v5437_v25 = vld [vmem:[#allocation76_spill] sm:$0xff]  ;;  %v5438_v42 = vld [vmem:[#allocation77_spill] sm:$0xff]  ;;  %v5439_v58 = vld [vmem:[#allocation78_spill] sm:$0xff]  ;;  %v999_v41 = vadd.f32 %v998_v2, %v3556_v37 }
 0x194   : > { %v1124_v39 = vadd.f32 %v1123_v0, %v5437_v25  ;;  %v1137_v18 = vadd.f32 %v1136_v26, %v5438_v42  ;;  %v1150_v56 = vadd.f32 %v1149_v13, %v5439_v58  ;;  %v5440_v32 = vld [vmem:[#allocation79_spill] sm:$0xff]  ;;  %v5441_v35 = vld [vmem:[#allocation80_spill] sm:$0xff]  ;;  %v5443_v17 = vld [vmem:[#allocation101_spill] sm:$0xff] }
 0x195   : > { %v1163_v45 = vadd.f32 %v1162_v54, %v5440_v32  ;;  %v1176_v52 = vadd.f32 %v1175_v31, %v5441_v35  ;;  %v5442_v51 = vld [vmem:[#allocation100_spill] sm:$0xff]  ;;  %v1099_v47 = vadd.f32 %v1098_v5, %v5443_v17  ;;  %v5444_v3 = vld [vmem:[#allocation102_spill] sm:$0xff]  ;;  %v5445_v40 = vld [vmem:[#allocation103_spill] sm:$0xff]  ;;  %v987_v35 = vrot.slane %v986_v24, 4 }
 0x196   : > { %v1086_v23 = vadd.f32 %v1085_v1, %v5442_v51  ;;  %v1112_v27 = vadd.f32 %v1111_v63, %v5444_v3  ;;  %v1125_v22 = vadd.f32 %v1124_v39, %v5445_v40  ;;  %v5446_v38 = vld [vmem:[#allocation81_spill] sm:$0xff]  ;;  %v5447_v57 = vld [vmem:[#allocation104_spill] sm:$0xff]  ;;  %v5449_v4 = vld [vmem:[#allocation82_spill] sm:$0xff] }
 0x197   : > { %v1012_v0 = vadd.f32 %v1011_v36, %v5446_v38  ;;  %v1138_v26 = vadd.f32 %v1137_v18, %v5447_v57  ;;  %v5448_v44 = vld [vmem:[#allocation105_spill] sm:$0xff]  ;;  %v1025_v54 = vadd.f32 %v1024_v14, %v5449_v4  ;;  %v5450_v10 = vld [vmem:[#allocation83_spill] sm:$0xff]  ;;  %v5451_v62 = vld [vmem:[#allocation106_spill] sm:$0xff] }
 0x198   : > { %v1151_v13 = vadd.f32 %v1150_v56, %v5448_v44  ;;  %v1038_v31 = vadd.f32 %v1037_v28, %v5450_v10  ;;  %v1164_v1 = vadd.f32 %v1163_v45, %v5451_v62  ;;  %v5452_v25 = vld [vmem:[#allocation107_spill] sm:$0xff]  ;;  %v5453_v42 = vld [vmem:[#allocation109_spill] sm:$0xff]  ;;  %v5454_v58 = vld [vmem:[#allocation110_spill] sm:$0xff]  ;;  %v1000_v28 = vrot.slane %v999_v41, 4 }
 0x199   : > { %v1177_v5 = vadd.f32 %v1176_v52, %v5452_v25  ;;  %v1051_v63 = vadd.f32 %v1050_v8, %v5453_v42  ;;  %v1064_v39 = vadd.f32 %v1063_v21, %v5454_v58  ;;  %v5455_v32 = vld [vmem:[#allocation132_spill] sm:$0xff]  ;;  %v5456_v2 = vld [vmem:[#allocation133_spill] sm:$0xff]  ;;  %v5457_v18 = vld [vmem:[#allocation111_spill] sm:$0xff]  ;;  %v1013_v40 = vrot.slane %v1012_v0, 4 }
 0x19a   : > { %v1087_v37 = vadd.f32 %v1086_v23, %v5455_v32  ;;  %v1100_v36 = vadd.f32 %v1099_v47, %v5456_v2  ;;  %v1077_v51 = vadd.f32 %v1076_v29, %v5457_v18  ;;  %v5458_v56 = vld [vmem:[#allocation134_spill] sm:$0xff]  ;;  %v5459_v14 = vld [vmem:[#allocation135_spill] sm:$0xff]  ;;  %v5460_v45 = vld [vmem:[#allocation136_spill] sm:$0xff]  ;;  %v1026_v8 = vrot.slane %v1025_v54, 4 }
 0x19b   : > { %v1113_v17 = vadd.f32 %v1112_v27, %v5458_v56  ;;  %v1126_v3 = vadd.f32 %v1125_v22, %v5459_v14  ;;  %v1139_v38 = vadd.f32 %v1138_v26, %v5460_v45  ;;  %v5461_v52 = vld [vmem:[#allocation137_spill] sm:$0xff]  ;;  %v1039_v44 = vrot.slane %v1038_v31, 4  ;;  %v5462_v21 = vld [vmem:[#allocation138_spill] sm:$0xff]  ;;  %v5463_v23 = vld [vmem:[#allocation139_spill] sm:$0xff] }
 0x19c   : > { %v1152_v57 = vadd.f32 %v1151_v13, %v5461_v52  ;;  %v1165_v4 = vadd.f32 %v1164_v1, %v5462_v21  ;;  %v1178_v10 = vadd.f32 %v1177_v5, %v5463_v23  ;;  %v1052_v47 = vrot.slane %v1051_v63, 4  ;;  %v5464_v25 = vld [vmem:[#allocation160_spill] sm:$0xff]  ;;  %v5465_v42 = vld [vmem:[#allocation161_spill] sm:$0xff]  ;;  %v5466_v32 = vld [vmem:[#allocation162_spill] sm:$0xff] }
 0x19d   : > { %v1065_v62 = vrot.slane %v1064_v39, 4  ;;  %v1088_v29 = vadd.f32 %v1087_v37, %v5464_v25  ;;  %v1101_v27 = vadd.f32 %v1100_v36, %v5465_v42  ;;  %v988_v58 = vadd.f32 %v987_v35, %v986_v24  ;;  %v5467_v18 = vld [vmem:[#allocation163_spill] sm:$0xff]  ;;  %v5468_v14 = vld [vmem:[#allocation164_spill] sm:$0xff]  ;;  %v5469_v52 = vld [vmem:[#allocation165_spill] sm:$0xff] }
 0x19e   : > { %v1078_v22 = vrot.slane %v1077_v51, 4  ;;  %v1114_v2 = vadd.f32 %v1113_v17, %v5466_v32  ;;  %v1127_v26 = vadd.f32 %v1126_v3, %v5467_v18  ;;  %v1001_v56 = vadd.f32 %v1000_v28, %v999_v41  ;;  %v5470_v23 = vld [vmem:[#allocation166_spill] sm:$0xff]  ;;  %v5471_v19 = vld [vmem:[#allocation167_spill] sm:$0xff]  ;;  %v5472_v24 = vld [vmem:[#allocation180_spill] sm:$0xff] }
 0x19f   : > { %v1014_v13 = vadd.f32 %v1013_v40, %v1012_v0  ;;  %v1140_v45 = vadd.f32 %v1139_v38, %v5468_v14  ;;  %v1153_v1 = vadd.f32 %v1152_v57, %v5469_v52  ;;  %v1027_v21 = vadd.f32 %v1026_v8, %v1025_v54  ;;  %v5473_v42 = vld [vmem:[#allocation181_spill] sm:$0xff]  ;;  %v5474_v41 = vld [vmem:[#allocation182_spill] sm:$0xff]  ;;  %v5475_v28 = vld [vmem:[#allocation183_spill] sm:$0xff] }
 0x1a0   : > { %v1040_v5 = vadd.f32 %v1039_v44, %v1038_v31  ;;  %v1166_v48 = vadd.f32 %v1165_v4, %v5470_v23  ;;  %v1179_v37 = vadd.f32 %v1178_v10, %v5471_v19  ;;  %v1053_v25 = vadd.f32 %v1052_v47, %v1051_v63  ;;  %v5476_v54 = vld [vmem:[#allocation184_spill] sm:$0xff]  ;;  %v5477_v8 = vld [vmem:[#allocation185_spill] sm:$0xff]  ;;  %v5478_v63 = vld [vmem:[#allocation186_spill] sm:$0xff] }
 0x1a1   : > { %v1066_v36 = vadd.f32 %v1065_v62, %v1064_v39  ;;  %v1089_v35 = vadd.f32 %v1088_v29, %v5472_v24  ;;  %v1102_v17 = vadd.f32 %v1101_v27, %v5473_v42  ;;  %v989_v32 = vrot.slane %v988_v58, 2  ;;  %v5479_v10 = vld [vmem:[#allocation187_spill] sm:$0xff]  ;;  %v5481_v24 = vld [vmem:[#allocation113_spill] sm:$0xff] }
 0x1a2   : > { %v1079_v3 = vadd.f32 %v1078_v22, %v1077_v51  ;;  %v1115_v0 = vadd.f32 %v1114_v2, %v5474_v41  ;;  %v1128_v40 = vadd.f32 %v1127_v26, %v5475_v28  ;;  %v1002_v38 = vrot.slane %v1001_v56, 2 }
 0x1a3   : > { %v1015_v57 = vrot.slane %v1014_v13, 2  ;;  %v1141_v31 = vadd.f32 %v1140_v45, %v5476_v54  ;;  %v1154_v44 = vadd.f32 %v1153_v1, %v5477_v8  ;;  %v1028_v4 = vrot.slane %v1027_v21, 2 }
 0x1a4   : > { %v1041_v19 = vrot.slane %v1040_v5, 2  ;;  %v1167_v39 = vadd.f32 %v1166_v48, %v5478_v63  ;;  %v1180_v47 = vadd.f32 %v1179_v37, %v5479_v10  ;;  %v1054_v62 = vrot.slane %v1053_v25, 2  ;;  %v5480_v37 = vld [vmem:[#allocation112_spill] sm:$0xff] }
 0x1a5   : > { %v1067_v29 = vrot.slane %v1066_v36, 2  ;;  %v1090_v51 = vadd.f32 %v1089_v35, %v3591_v49  ;;  %v1103_v27 = vadd.f32 %v1102_v17, %v3594_v43  ;;  %v990_v22 = vadd.f32 %v989_v32, %v988_v58 }
 0x1a6   : > { %v1080_v2 = vrot.slane %v1079_v3, 2  ;;  %v1116_v18 = vadd.f32 %v1115_v0, %v3597_v33  ;;  %v1129_v26 = vadd.f32 %v1128_v40, %v3600_v16  ;;  %v1003_v14 = vadd.f32 %v1002_v38, %v1001_v56 }
 0x1a7   : > { %v1016_v45 = vadd.f32 %v1015_v57, %v1014_v13  ;;  %v1142_v48 = vadd.f32 %v1141_v31, %v3603_v11  ;;  %v1155_v52 = vadd.f32 %v1154_v44, %v3606_v6  ;;  %v1029_v1 = vadd.f32 %v1028_v4, %v1027_v21 }
 0x1a8   : > { %v1042_v23 = vadd.f32 %v1041_v19, %v1040_v5  ;;  %v1168_v49 = vadd.f32 %v1167_v39, %v5480_v37  ;;  %v1181_v43 = vadd.f32 %v1180_v47, %v5481_v24  ;;  %v1055_v58 = vadd.f32 %v1054_v62, %v1053_v25 }
 0x1a9   : > { %v1068_v35 = vadd.f32 %v1067_v29, %v1066_v36  ;;  %v1091_v42 = vrot.slane %v1090_v51, 4  ;;  %v1104_v33 = vrot.slane %v1103_v27, 4  ;;  %v991_v17 = vrot.slane %v990_v22, 1 }
 0x1aa   : > { %v1081_v16 = vadd.f32 %v1080_v2, %v1079_v3  ;;  %v1117_v32 = vrot.slane %v1116_v18, 4  ;;  %v1130_v41 = vrot.slane %v1129_v26, 4  ;;  %v1004_v56 = vrot.slane %v1003_v14, 1 }
 0x1ab   : > { %v1017_v13 = vrot.slane %v1016_v45, 1  ;;  %v1143_v11 = vrot.slane %v1142_v48, 4  ;;  %v1156_v0 = vrot.slane %v1155_v52, 4  ;;  %v1030_v6 = vrot.slane %v1029_v1, 1 }
 0x1ac   : > { %v1043_v21 = vrot.slane %v1042_v23, 1  ;;  %v1169_v5 = vrot.slane %v1168_v49, 4  ;;  %v1182_v28 = vrot.slane %v1181_v43, 4  ;;  %v1056_v40 = vrot.slane %v1055_v58, 1 }
 0x1ad   : > { %v1069_v38 = vrot.slane %v1068_v35, 1  ;;  %v1092_v57 = vadd.f32 %v1091_v42, %v1090_v51  ;;  %v1105_v25 = vadd.f32 %v1104_v33, %v1103_v27  ;;  %v1082_v36 = vrot.slane %v1081_v16, 1 }
 0x1ae   : > { %v1118_v54 = vadd.f32 %v1117_v32, %v1116_v18  ;;  %v1131_v31 = vadd.f32 %v1130_v41, %v1129_v26  ;;  %v3856_v8 = vstv %s3849_s24  ;;  %v3858_v3 = vadd.f32 %v991_v17, %v990_v22 }
 0x1af   : > { %v3860_v44 = vadd.f32 %v1004_v56, %v1003_v14  ;;  %v1144_v4 = vadd.f32 %v1143_v11, %v1142_v48  ;;  %v1157_v19 = vadd.f32 %v1156_v0, %v1155_v52  ;;  %v3862_v63 = vadd.f32 %v1017_v13, %v1016_v45 }
 0x1b0   : > { %v3864_v39 = vadd.f32 %v1030_v6, %v1029_v1  ;;  %v1170_v10 = vadd.f32 %v1169_v5, %v1168_v49  ;;  %v1183_v47 = vadd.f32 %v1182_v28, %v1181_v43  ;;  %v3866_v62 = vadd.f32 %v1043_v21, %v1042_v23 }
 0x1b1   : > { %v1093_v29 = vrot.slane %v1092_v57, 2  ;;  %v1106_v51 = vrot.slane %v1105_v25, 2  ;;  %v1190_v27 = vadd.f32 %v3856_v8, %v3685_v9  ;;  %v3870_v2 = vadd.f32 %v1056_v40, %v1055_v58 }
 0x1b2   : > { %v1119_v22 = vrot.slane %v1118_v54, 2  ;;  %v1132_v18 = vrot.slane %v1131_v31, 2  ;;  %v1191_v26 = vadd.f32 %v3856_v8, %v3695_v59  ;;  %v3874_v14 = vadd.f32 %v1069_v38, %v1068_v35 }
 0x1b3   : > { %v1145_v45 = vrot.slane %v1144_v4, 2  ;;  %v1158_v48 = vrot.slane %v1157_v19, 2  ;;  %v1192_v52 = vadd.f32 %v3856_v8, %v3697_v46  ;;  %v3878_v1 = vadd.f32 %v1082_v36, %v1081_v16 }
 0x1b4   : > { %v1171_v23 = vrot.slane %v1170_v10, 2  ;;  %v1184_v37 = vrot.slane %v1183_v47, 2  ;;  %v1193_v9 = vadd.f32 %v3856_v8, %v3699_v55  ;;  %v1094_v49 = vadd.f32 %v1093_v29, %v1092_v57 }
 0x1b5   : > { %v1107_v24 = vadd.f32 %v1106_v51, %v1105_v25  ;;  %v1194_v43 = vadd.f32 %v3856_v8, %v3701_v20  ;;  %v2044_v59 = vmul.f32 -1.442695, %v1190_v27  ;;  %v1120_v58 = vadd.f32 %v1119_v22, %v1118_v54 }
 0x1b6   : > { %v1133_v35 = vadd.f32 %v1132_v18, %v1131_v31  ;;  %v1195_v42 = vadd.f32 %v3856_v8, %v3703_v61  ;;  %v2045_v33 = vmul.f32 -1.442695, %v1191_v26  ;;  %v3886_v46 = vadd.f32 %v1145_v45, %v1144_v4  ;;  %v5482_v31 = vld [vmem:[#allocation114_spill] sm:$0xff] }
 0x1b7   : > { %v3888_v17 = vadd.f32 %v1158_v48, %v1157_v19  ;;  %v1196_v16 = vadd.f32 %v3856_v8, %v3705_v30  ;;  %v2046_v55 = vmul.f32 -1.442695, %v1192_v52  ;;  %v3892_v32 = vadd.f32 %v1171_v23, %v1170_v10 }
 0x1b8   : > { %v3894_v41 = vadd.f32 %v1184_v37, %v1183_v47  ;;  %v1197_v20 = vadd.f32 %v3856_v8, %v3707_v60  ;;  %v2047_v56 = vmul.f32 -1.442695, %v1193_v9  ;;  %v1095_v13 = vrot.slane %v1094_v49, 1  ;;  %v5483_v47 = vld [vmem:[#allocation115_spill] sm:$0xff] }
 0x1b9   : > { %v1198_v61 = vadd.f32 %v3856_v8, %v3758_v7  ;;  %2149 = vpow2.f32 %v2044_v59  ;;  %v2048_v11 = vmul.f32 -1.442695, %v1194_v43  ;;  %v1108_v0 = vrot.slane %v1107_v24, 1 }
 0x1ba   : > { %v1199_v6 = vadd.f32 %v3856_v8, %v3760_v12  ;;  %2151 = vpow2.f32 %v2045_v33  ;;  %v2049_v30 = vmul.f32 -1.442695, %v1195_v42  ;;  %v1121_v21 = vrot.slane %v1120_v58, 1 }
 0x1bb   : > { %v1200_v5 = vadd.f32 %v3856_v8, %v3762_v15  ;;  %2153 = vpow2.f32 %v2046_v55  ;;  %v2050_v28 = vmul.f32 -1.442695, %v1196_v16  ;;  %v1134_v60 = vrot.slane %v1133_v35, 1 }
 0x1bc   : > { %v1201_v40 = vadd.f32 %v3856_v8, %v3764_v53  ;;  %2155 = vpow2.f32 %v2047_v56  ;;  %v2051_v7 = vmul.f32 -1.442695, %v1197_v20  ;;  %v1147_v38 = vrot.slane %v3886_v46, 1 }
 0x1bd   : > { %v1202_v57 = vadd.f32 %v3856_v8, %v3766_v34  ;;  %2157 = vpow2.f32 %v2048_v11  ;;  %v2052_v12 = vmul.f32 -1.442695, %v1198_v61  ;;  %v1160_v25 = vrot.slane %v3888_v17, 1 }
 0x1be   : > { %v1203_v15 = vadd.f32 %v3856_v8, %v3768_v50  ;;  %2159 = vpow2.f32 %v2049_v30  ;;  %v2053_v36 = vmul.f32 -1.442695, %v1199_v6  ;;  %v1173_v53 = vrot.slane %v3892_v32, 1 }
 0x1bf   : > { %v3912_v54 = vpop.eup %2149  ;;  %v1204_v4 = vadd.f32 %v3856_v8, %v5482_v31  ;;  %2161 = vpow2.f32 %v2050_v28  ;;  %v2054_v19 = vmul.f32 -1.442695, %v1200_v5  ;;  %v1186_v34 = vrot.slane %v3894_v41, 1 }
 0x1c0   : > { %v3917_v10 = vpop.eup %2151  ;;  %v1205_v29 = vadd.f32 %v3856_v8, %v5483_v47  ;;  %2163 = vpow2.f32 %v2051_v7  ;;  %v2055_v50 = vmul.f32 -1.442695, %v1201_v40  ;;  %v1096_v27 = vadd.f32 %v1095_v13, %v1094_v49 }
 0x1c1   : > { %v3922_v51 = vpop.eup %2153  ;;  %v1206_v22 = vadd.f32 %v3856_v8, %v3858_v3  ;;  %2165 = vpow2.f32 %v2052_v12  ;;  %v2056_v18 = vmul.f32 -1.442695, %v1202_v57  ;;  %v1109_v45 = vadd.f32 %v1108_v0, %v1107_v24 }
 0x1c2   : > { %v3926_v26 = vpop.eup %2155  ;;  %v1207_v48 = vadd.f32 %v3856_v8, %v3860_v44  ;;  %2167 = vpow2.f32 %v2053_v36  ;;  %v2057_v52 = vmul.f32 -1.442695, %v1203_v15  ;;  %v1122_v37 = vadd.f32 %v1121_v21, %v1120_v58 }
 0x1c3   : > { %v3930_v23 = vpop.eup %2157  ;;  %v1208_v9 = vadd.f32 %v3856_v8, %v3862_v63  ;;  %2169 = vpow2.f32 %v2054_v19  ;;  %v2058_v49 = vmul.f32 -1.442695, %v1204_v4  ;;  %v1135_v3 = vadd.f32 %v1134_v60, %v1133_v35 }
 0x1c4   : > { %v3934_v43 = vpop.eup %2159  ;;  %v1209_v59 = vadd.f32 %v3856_v8, %v3864_v39  ;;  %2171 = vpow2.f32 %v2055_v50  ;;  %v2059_v24 = vmul.f32 -1.442695, %v1205_v29  ;;  %v1148_v44 = vadd.f32 %v1147_v38, %v3886_v46 }
 0x1c5   : > { %v3938_v42 = vpop.eup %2161  ;;  %v1210_v58 = vadd.f32 %v3856_v8, %v3866_v62  ;;  %2173 = vpow2.f32 %v2056_v18  ;;  %v2060_v33 = vmul.f32 -1.442695, %v1206_v22  ;;  %v1161_v16 = vadd.f32 %v1160_v25, %v3888_v17 }
 0x1c6   : > { %v3943_v63 = vpop.eup %2163  ;;  %v1211_v35 = vadd.f32 %v3856_v8, %v3870_v2  ;;  %2175 = vpow2.f32 %v2057_v52  ;;  %v2061_v39 = vmul.f32 -1.442695, %v1207_v48  ;;  %v1174_v20 = vadd.f32 %v1173_v53, %v3892_v32 }
 0x1c7   : > { %v3948_v55 = vpop.eup %2165  ;;  %v1212_v46 = vadd.f32 %v3856_v8, %v3874_v14  ;;  %2177 = vpow2.f32 %v2058_v49  ;;  %v2062_v62 = vmul.f32 -1.442695, %v1208_v9  ;;  %v1187_v13 = vadd.f32 %v1186_v34, %v3894_v41 }
 0x1c8   : > { %v3953_v56 = vpop.eup %2167  ;;  %v1213_v17 = vadd.f32 %v3856_v8, %v3878_v1  ;;  %2179 = vpow2.f32 %v2059_v24  ;;  %v2063_v2 = vmul.f32 -1.442695, %v1209_v59  ;;  %v1214_v11 = vadd.f32 %v3856_v8, %v1096_v27 }
 0x1c9   : > { %v3958_v61 = vpop.eup %2169  ;;  %v1215_v32 = vadd.f32 %v3856_v8, %v1109_v45  ;;  %2181 = vpow2.f32 %v2060_v33  ;;  %v2064_v0 = vmul.f32 -1.442695, %v1210_v58  ;;  %v1216_v6 = vadd.f32 %v3856_v8, %v1122_v37 }
 0x1ca   : > { %v3962_v14 = vpop.eup %2171  ;;  %v1217_v30 = vadd.f32 %v3856_v8, %v1135_v3  ;;  %2183 = vpow2.f32 %v2061_v39  ;;  %v2065_v41 = vmul.f32 -1.442695, %v1211_v35  ;;  %v1218_v1 = vadd.f32 %v3856_v8, %v1148_v44 }
 0x1cb   : > { %v3966_v21 = vpop.eup %2173  ;;  %v1219_v5 = vadd.f32 %v3856_v8, %v1161_v16  ;;  %2185 = vpow2.f32 %v2062_v62  ;;  %v2066_v28 = vmul.f32 -1.442695, %v1212_v46  ;;  %v1220_v40 = vadd.f32 %v3856_v8, %v1174_v20 }
 0x1cc   : > { %v2176_v60 = vpop.eup %2175  ;;  %2187 = vpow2.f32 %v2063_v2  ;;  %v2067_v7 = vmul.f32 -1.442695, %v1213_v17  ;;  %v3972_v38 = vadd.f32 1.0, %v3912_v54  ;;  %v1221_v12 = vadd.f32 %v3856_v8, %v1187_v13 }
 0x1cd   : > { %v2178_v57 = vpop.eup %2177  ;;  %2189 = vpow2.f32 %v2064_v0  ;;  %v2068_v25 = vmul.f32 -1.442695, %v1214_v11  ;;  %v3976_v15 = vadd.f32 1.0, %v3917_v10  ;;  %v2069_v53 = vmul.f32 -1.442695, %v1215_v32 }
 0x1ce   : > { %v2180_v36 = vpop.eup %2179  ;;  %2191 = vpow2.f32 %v2065_v41  ;;  %v2070_v31 = vmul.f32 -1.442695, %v1216_v6  ;;  %v2071_v19 = vmul.f32 -1.442695, %v1217_v30  ;;  %v2072_v34 = vmul.f32 -1.442695, %v1218_v1 }
 0x1cf   : > { %v2182_v4 = vpop.eup %2181  ;;  %2193 = vpow2.f32 %v2066_v28  ;;  %v3979_v47 = vadd.f32 1.0, %v3922_v51  ;;  %v2073_v29 = vmul.f32 -1.442695, %v1219_v5  ;;  %v3981_v8 = vmul.f32 -1.442695, %v1220_v40 }
 0x1d0   : > { %v2184_v54 = vpop.eup %2183  ;;  %2195 = vpow2.f32 %v2067_v7  ;;  %v1361_v50 = vand.u32 2147483648, %v3972_v38  ;;  %v3984_v27 = vmul.f32 -1.442695, %v1221_v12  ;;  %v3987_v22 = vadd.f32 1.0, %v3926_v26 }
 0x1d1   : > { %v2186_v10 = vpop.eup %2185  ;;  %2197 = vpow2.f32 %v2068_v25  ;;  %v1376_v18 = vand.u32 2147483648, %v3976_v15  ;;  %v3991_v51 = vadd.f32 1.0, %v3930_v23  ;;  %v3994_v48 = vadd.f32 1.0, %v3934_v43 }
 0x1d2   : > { %v2188_v45 = vpop.eup %2187  ;;  %2199 = vpow2.f32 %v2069_v53  ;;  %v3998_v9 = vadd.f32 1.0, %v3938_v42  ;;  %v1391_v49 = vand.u32 2147483648, %v3979_v47  ;;  %v4003_v59 = vadd.f32 1.0, %v3943_v63 }
 0x1d3   : > { %v2190_v37 = vpop.eup %2189  ;;  %2201 = vpow2.f32 %v2070_v31  ;;  %v4006_v23 = vadd.f32 1.0, %v3948_v55  ;;  %v4008_v43 = vor.u32 1.1754944e-38, %v1361_v50  ;;  %v4010_v44 = vor.u32 1.1754944e-38, %v1376_v18 }
 0x1d4   : > { %v2192_v3 = vpop.eup %2191  ;;  %2203 = vpow2.f32 %v2071_v19  ;;  %v1406_v58 = vand.u32 2147483648, %v3987_v22  ;;  %v4015_v16 = vadd.f32 1.0, %v3953_v56  ;;  %v4018_v63 = vadd.f32 1.0, %v3958_v61 }
 0x1d5   : > { %v2194_v24 = vpop.eup %2193  ;;  %2205 = vpow2.f32 %v2072_v34  ;;  %v4022_v55 = vadd.f32 1.0, %v3962_v14  ;;  %v4025_v20 = vor.u32 1.1754944e-38, %v1391_v49  ;;  %v1421_v46 = vand.u32 2147483648, %v3991_v51 }
 0x1d6   : > { %v2196_v33 = vpop.eup %2195  ;;  %2207 = vpow2.f32 %v2073_v29  ;;  %v4029_v13 = vadd.f32 1.0, %v3966_v21  ;;  %v4031_v56 = vadd.f32 1.0, %v2176_v60  ;;  %v1436_v17 = vand.u32 2147483648, %v3994_v48 }
 0x1d7   : > { %v2198_v39 = vpop.eup %2197  ;;  %2209 = vrcp.f32 %v3972_v38  ;;  %v4035_v61 = vadd.f32 1.0, %v2178_v57  ;;  %v4038_v11 = vor.u32 1.1754944e-38, %v1406_v58  ;;  %v4041_v14 = vadd.f32 1.0, %v2180_v36 }
 0x1d8   : > { %v2200_v62 = vpop.eup %2199  ;;  %2211 = vrcp.f32 %v3976_v15  ;;  %v1451_v30 = vand.u32 2147483648, %v3998_v9  ;;  %v4046_v21 = vadd.f32 1.0, %v2182_v4  ;;  %v4048_v1 = vadd.f32 1.0, %v2184_v54 }
 0x1d9   : > { %v2202_v2 = vpop.eup %2201  ;;  %2213 = vrcp.f32 %v3979_v47  ;;  %v4051_v5 = vor.u32 1.1754944e-38, %v1421_v46  ;;  %v4053_v60 = vadd.f32 1.0, %v2186_v10  ;;  %v4056_v40 = vor.u32 1.1754944e-38, %v1436_v17 }
 0x1da   : > { %v2204_v0 = vpop.eup %2203  ;;  %2215 = vrcp.f32 %v3987_v22  ;;  %v1466_v7 = vand.u32 2147483648, %v4003_v59  ;;  %v4061_v12 = vadd.f32 1.0, %v2188_v45  ;;  %v4063_v25 = vadd.f32 1.0, %v2190_v37 }
 0x1db   : > { %v2206_v41 = vpop.eup %2205  ;;  %2217 = vrcp.f32 %v3991_v51  ;;  %v4070_v31 = vadd.f32 1.0, %v2192_v3  ;;  %v4072_v4 = vor.u32 1.1754944e-38, %v1451_v30  ;;  %v4077_v54 = vadd.f32 1.0, %v2194_v24 }
 0x1dc   : > { %v2208_v28 = vpop.eup %2207  ;;  %2219 = vrcp.f32 %v3994_v48  ;;  %5484 = vst [vmem:[#allocation140_spill] sm:$0xff] %v4063_v25  ;;  %v4079_v29 = vadd.f32 1.0, %v2196_v33  ;;  %v4090_v45 = vor.u32 1.1754944e-38, %v1466_v7  ;;  %v1481_v37 = vand.u32 2147483648, %v4006_v23 }
 0x1dd   : > { %v4059_v57 = vpop.eup %2209  ;;  %2221 = vrcp.f32 %v3998_v9  ;;  %5485 = vst [vmem:[#allocation141_spill] sm:$0xff] %v4070_v31  ;;  %v4095_v3 = vadd.f32 1.0, %v2198_v39  ;;  %v1496_v17 = vand.u32 2147483648, %v4015_v16  ;;  %v4110_v39 = vadd.f32 1.0, %v2202_v2 }
 0x1de   : > { %v4067_v53 = vpop.eup %2211  ;;  %2223 = vpow2.f32 %v3981_v8  ;;  %5486 = vst [vmem:[#allocation142_spill] sm:$0xff] %v4077_v54  ;;  %v1351_v50 = vmul.f32 %v4059_v57, %v3972_v38  ;;  %vm1355_vm0 = vweird.f32 %v3972_v38  ;;  %v4118_v6 = vor.u32 1.1754944e-38, %v1481_v37 }
 0x1df   : > { %v4075_v34 = vpop.eup %2213  ;;  %5487 = vst [vmem:[#allocation143_spill] sm:$0xff] %v4079_v29  ;;  %v1366_v10 = vmul.f32 %v4067_v53, %v3976_v15  ;;  %2225 = vpow2.f32 %v3984_v27  ;;  %v4103_v27 = vadd.f32 1.0, %v2200_v62  ;;  %vm1370_vm1 = vweird.f32 %v3976_v15 }
 0x1e0   : > { %v4085_v18 = vpop.eup %2215  ;;  %v1381_v8 = vmul.f32 %v4075_v34, %v3979_v47  ;;  %5488 = vst [vmem:[#allocation144_spill] sm:$0xff] %v4095_v3  ;;  %2227 = vrcp.f32 %v4003_v59  ;;  %v1352_v7 = vsub.f32 1.0, %v1351_v50  ;;  %v4127_v35 = vadd.f32 1.0, %v2206_v41 }
 0x1e1   : > { %v4093_v49 = vpop.eup %2217  ;;  %v1396_v24 = vmul.f32 %v4085_v18, %v3987_v22  ;;  %5489 = vst [vmem:[#allocation9_spill] sm:$0xff] %v4103_v27  ;;  %2229 = vrcp.f32 %v4006_v23  ;;  %v1367_v19 = vsub.f32 1.0, %v1366_v10  ;;  %v1511_v10 = vand.u32 2147483648, %v4018_v63 }
 0x1e2   : > { %v4101_v33 = vpop.eup %2219  ;;  %5490 = vst [vmem:[#allocation33_spill] sm:$0xff] %v4110_v39  ;;  %2231 = vrcp.f32 %v4015_v16  ;;  %v1382_v58 = vsub.f32 1.0, %v1381_v8  ;;  %v1411_v62 = vmul.f32 %v4093_v49, %v3991_v51  ;;  %v4125_v8 = vadd.f32 1.0, %v2204_v0 }
 0x1e3   : > { %v4108_v30 = vpop.eup %2221  ;;  %v1426_v46 = vmul.f32 %v4101_v33, %v3994_v48  ;;  %v1397_v2 = vsub.f32 1.0, %v1396_v24  ;;  %2233 = vrcp.f32 %v4018_v63  ;;  %5492 = vst [vmem:[#allocation34_spill] sm:$0xff] %v4127_v35  ;;  %vm1385_vm2 = vweird.f32 %v3979_v47 }
 0x1e4   : > { %v2224_v36 = vpop.eup %2223  ;;  %v1441_v50 = vmul.f32 %v4108_v30, %v3998_v9  ;;  %5491 = vst [vmem:[#allocation10_spill] sm:$0xff] %v4125_v8  ;;  %v4130_v42 = vor.u32 1.1754944e-38, %v1496_v17  ;;  %v4135_v24 = vadd.f32 1.0, %v2208_v28  ;;  %v1353_v39 = vmul.f32 %v4059_v57, %v1352_v7 }
 0x1e5   : > { %v2226_v32 = vpop.eup %2225  ;;  %v4137_v52 = vadd.f32 1.0, %v2224_v36  ;;  %v1368_v27 = vmul.f32 %v4067_v53, %v1367_v19  ;;  %vm1400_vm3 = vweird.f32 %v3987_v22  ;;  %v1383_v41 = vmul.f32 %v4075_v34, %v1382_v58 }
 0x1e6   : > { %v4133_v26 = vpop.eup %2227  ;;  %5493 = vst [vmem:[#allocation11_spill] sm:$0xff] %v4135_v24  ;;  %v1412_v17 = vsub.f32 1.0, %v1411_v62  ;;  %v1427_v35 = vsub.f32 1.0, %v1426_v46  ;;  %v4148_v28 = vadd.f32 1.0, %v2226_v32  ;;  %v1398_v36 = vmul.f32 %v4085_v18, %v1397_v2 }
 0x1e7   : > { %5494 = vst [vmem:[#allocation35_spill] sm:$0xff] %v4137_v52  ;;  %v4142_v0 = vpop.eup %2229  ;;  %v1442_v7 = vsub.f32 1.0, %v1441_v50  ;;  %v4152_v19 = vor.u32 1.1754944e-38, %v1511_v10  ;;  %vm1356_vm5 = vweird.f32 %v4059_v57  ;;  %v5496_v52 = vand.u32 2147483647, %v3972_v38 }
 0x1e8   : > { %v4146_v8 = vpop.eup %2231  ;;  %5495 = vst [vmem:[#allocation12_spill] sm:$0xff] %v4148_v28  ;;  %vm1371_vm7 = vweird.f32 %v4067_v53  ;;  %v5499_v32 = vand.u32 2147483647, %v3976_v15  ;;  %v5502_v62 = vand.u32 2147483647, %v3979_v47  ;;  %v1526_v50 = vand.u32 2147483648, %v4022_v55  ;;  %vm4201_vm14 = vmor %vm1355_vm0, %vm1356_vm5 }
 0x1e9   : > { %vm4157_vm6 = vcmp.eq.f32.partialorder %v5496_v52, 8.507059e+37  ;;  %v1456_v52 = vmul.f32 %v4133_v26, %v4003_v59  ;;  %v4178_v10 = vpop.eup %2233  ;;  %v1369_v37 = vadd.f32 %v4067_v53, %v1368_v27  ;;  %vm1386_vm11 = vweird.f32 %v4075_v34  ;;  %vm4213_vm10 = vmor %vm1370_vm1, %vm1371_vm7 }
 0x1ea   : > { %vm4164_vm8 = vcmp.eq.f32.partialorder %v5499_v32, 8.507059e+37  ;;  %vm4170_vm9 = vcmp.eq.f32.partialorder %v5502_v62, 8.507059e+37  ;;  %v1354_v32 = vadd.f32 %v4059_v57, %v1353_v39  ;;  %v5505_v62 = vand.u32 2147483647, %v3987_v22  ;;  %vm4239_vm1 = vmor %vm1385_vm2, %vm1386_vm11 }
 0x1eb   : > { %v1471_v24 = vmul.f32 %v4142_v0, %v4006_v23  ;;  %v1384_v3 = vadd.f32 %v4075_v34, %v1383_v41  ;;  %v1413_v29 = vmul.f32 %v4093_v49, %v1412_v17  ;;  %v1428_v39 = vmul.f32 %v4101_v33, %v1427_v35 }
 0x1ec   : > { %vm4185_vm12 = vcmp.eq.f32.partialorder %v5505_v62, 8.507059e+37  ;;  %v1486_v27 = vmul.f32 %v4146_v8, %v4015_v16  ;;  %v1399_v54 = vadd.f32 %v4085_v18, %v1398_v36  ;;  %vm1401_vm15 = vweird.f32 %v4085_v18 }
 0x1ed   : > { %v1443_v41 = vmul.f32 %v4108_v30, %v1442_v7  ;;  %v5512_v38 = vand.u32 2147483647, %v3991_v51  ;;  %v5515_v36 = vand.u32 2147483647, %v3994_v48  ;;  %v1457_v7 = vsub.f32 1.0, %v1456_v52  ;;  %vm4262_vm2 = vmor %vm1400_vm3, %vm1401_vm15 }
 0x1ee   : > { %v1472_v25 = vsub.f32 1.0, %v1471_v24  ;;  %v1501_v15 = vmul.f32 %v4178_v10, %v4018_v63  ;;  %2235 = vrcp.f32 %v4022_v55  ;;  %vm1431_vm7 = vweird.f32 %v4101_v33 }
 0x1ef   : > { %vm4219_vm0 = vcmp.eq.f32.partialorder %v5512_v38, 8.507059e+37  ;;  %vm4225_vm5 = vcmp.eq.f32.partialorder %v5515_v36, 8.507059e+37  ;;  %v1358_v38 = vsel %vm4201_vm14, %v4059_v57, %v1354_v32  ;;  %v5520_v24 = vand.u32 2147483647, %v3998_v9 }
 0x1f0   : > { %vm1460_vm13 = vweird.f32 %v4003_v59  ;;  %v1487_v62 = vsub.f32 1.0, %v1486_v27  ;;  %2237 = vrcp.f32 %v4029_v13  ;;  %v1373_v47 = vsel %vm4213_vm10, %v4067_v53, %v1369_v37 }
 0x1f1   : > { %vm4246_vm4 = vcmp.eq.f32.partialorder %v5520_v24, 8.507059e+37  ;;  %v1388_v57 = vsel %vm4239_vm1, %v4075_v34, %v1384_v3  ;;  %v1414_v27 = vadd.f32 %v4093_v49, %v1413_v29  ;;  %v1429_v24 = vadd.f32 %v4101_v33, %v1428_v39 }
 0x1f2   : > { %vm1475_vm11 = vweird.f32 %v4006_v23  ;;  %v1403_v53 = vsel %vm4262_vm2, %v4085_v18, %v1399_v54  ;;  %v1444_v34 = vadd.f32 %v4108_v30, %v1443_v41  ;;  %vm1446_vm10 = vweird.f32 %v4108_v30 }
 0x1f3   : > { %vm1490_vm14 = vweird.f32 %v4015_v16  ;;  %2239 = vrcp.f32 %v4031_v56  ;;  %vm5525_vm3 = vweird.f32 %v4093_v49  ;;  %vm5526_vm15 = vweird.f32 %v3991_v51 }
 0x1f4   : > { %vm4280_vm1 = vmor %vm5526_vm15, %vm5525_vm3  ;;  %v1458_v29 = vmul.f32 %v4133_v26, %v1457_v7  ;;  %v1473_v54 = vmul.f32 %v4142_v0, %v1472_v25  ;;  %v1502_v18 = vsub.f32 1.0, %v1501_v15  ;;  %v4286_v3 = vor.u32 1.1754944e-38, %v1526_v50  ;;  %v4312_v58 = vpop.eup %2235 }
 0x1f5   : > { %v4291_v37 = vsel %vm4157_vm6, %v4008_v43, %v1358_v38  ;;  %v4296_v51 = vsel %vm4164_vm8, %v4010_v44, %v1373_v47  ;;  %v4301_v39 = vsel %vm4170_vm9, %v4025_v20, %v1388_v57  ;;  %vm5529_vm2 = vweird.f32 %v3994_v48 }
 0x1f6   : > { %vm4307_vm3 = vmor %vm5529_vm2, %vm1431_vm7  ;;  %v1488_v43 = vmul.f32 %v4146_v8, %v1487_v62  ;;  %v4317_v44 = vsel %vm4185_vm12, %v4038_v11, %v1403_v53  ;;  %v1418_v20 = vsel %vm4280_vm1, %v4093_v49, %v1414_v27  ;;  %vm5532_vm6 = vweird.f32 %v3998_v9  ;;  %v4347_v9 = vpop.eup %2237 }
 0x1f7   : > { %v1433_v48 = vsel %vm4307_vm3, %v4101_v33, %v1429_v24  ;;  %vm4329_vm8 = vmor %vm5532_vm6, %vm1446_vm10  ;;  %v5535_v28 = vand.u32 2147483647, %v4003_v59  ;;  %v5538_v49 = vand.u32 2147483647, %v4006_v23  ;;  %vm1505_vm7 = vweird.f32 %v4018_v63 }
 0x1f8   : > { %2241 = vrcp.f32 %v4035_v61  ;;  %v1448_v33 = vsel %vm4329_vm8, %v4108_v30, %v1444_v34  ;;  %vm1461_vm10 = vweird.f32 %v4133_v26  ;;  %vm1476_vm15 = vweird.f32 %v4142_v0 }
 0x1f9   : > { %vm4335_vm9 = vcmp.eq.f32.partialorder %v5535_v28, 8.507059e+37  ;;  %vm4341_vm12 = vcmp.eq.f32.partialorder %v5538_v49, 8.507059e+37  ;;  %v5541_v50 = vand.u32 2147483647, %v4015_v16  ;;  %v1516_v35 = vmul.f32 %v4312_v58, %v4022_v55  ;;  %v4367_v36 = vpop.eup %2239  ;;  %vm4388_vm3 = vmor %vm1460_vm13, %vm1461_vm10 }
 0x1fa   : > { %v1459_v7 = vadd.f32 %v4133_v26, %v1458_v29  ;;  %v1474_v15 = vadd.f32 %v4142_v0, %v1473_v54  ;;  %v1503_v38 = vmul.f32 %v4178_v10, %v1502_v18  ;;  %v1531_v30 = vmul.f32 %v4347_v9, %v4029_v13 }
 0x1fb   : > { %vm4356_vm1 = vcmp.eq.f32.partialorder %v5541_v50, 8.507059e+37  ;;  %v4372_v62 = vsel %vm4219_vm0, %v4051_v5, %v1418_v20  ;;  %v4377_v47 = vsel %vm4225_vm5, %v4056_v40, %v1433_v48  ;;  %v1489_v57 = vadd.f32 %v4146_v8, %v1488_v43 }
 0x1fc   : > { %vm1491_vm2 = vweird.f32 %v4146_v8  ;;  %v4384_v32 = vsel %vm4246_vm4, %v4072_v4, %v1448_v33  ;;  %v5546_v5 = vand.u32 2147483647, %v4018_v63  ;;  %v1517_v31 = vsub.f32 1.0, %v1516_v35  ;;  %vm4404_vm4 = vmor %vm1475_vm11, %vm1476_vm15 }
 0x1fd   : > { %v1532_v27 = vsub.f32 1.0, %v1531_v30  ;;  %v1546_v24 = vmul.f32 %v4367_v36, %v4031_v56  ;;  %vm1506_vm13 = vweird.f32 %v4178_v10  ;;  %vm1520_vm5 = vweird.f32 %v4022_v55  ;;  %vm4425_vm11 = vmor %vm1490_vm14, %vm1491_vm2 }
 0x1fe   : > { %vm4394_vm0 = vcmp.eq.f32.partialorder %v5546_v5, 8.507059e+37  ;;  %v1539_v4 = vand.u32 2147483647, %v4029_v13  ;;  %v1541_v52 = vand.u32 2147483648, %v4029_v13  ;;  %2243 = vrcp.f32 %v4041_v14  ;;  %v4413_v53 = vpop.eup %2241  ;;  %vm4456_vm8 = vmor %vm1505_vm7, %vm1506_vm13 }
 0x1ff   : > { %v1463_v23 = vsel %vm4388_vm3, %v4133_v26, %v1459_v7  ;;  %v1478_v34 = vsel %vm4404_vm4, %v4142_v0, %v1474_v15  ;;  %v1504_v29 = vadd.f32 %v4178_v10, %v1503_v38  ;;  %v1547_v54 = vsub.f32 1.0, %v1546_v24 }
 0x200   : > { %v1493_v18 = vsel %vm4425_vm11, %v4146_v8, %v1489_v57  ;;  %vm1535_vm6 = vweird.f32 %v4029_v13  ;;  %v1554_v26 = vand.u32 2147483647, %v4031_v56  ;;  %v1561_v0 = vmul.f32 %v4413_v53, %v4035_v61 }
 0x201   : > { %v1518_v16 = vmul.f32 %v4312_v58, %v1517_v31  ;;  %v1533_v25 = vmul.f32 %v4347_v9, %v1532_v27  ;;  %vm1550_vm14 = vweird.f32 %v4031_v56  ;;  %v1556_v43 = vand.u32 2147483648, %v4031_v56 }
 0x202   : > { %2245 = vrcp.f32 %v4046_v21  ;;  %v4445_v8 = vsel %vm4335_vm9, %v4090_v45, %v1463_v23  ;;  %v4450_v20 = vsel %vm4341_vm12, %v4118_v6, %v1478_v34  ;;  %v1542_v46 = vor.u32 1.1754944e-38, %v1541_v52 }
 0x203   : > { %v1562_v28 = vsub.f32 1.0, %v1561_v0  ;;  %v4463_v45 = vsel %vm4356_vm1, %v4130_v42, %v1493_v18  ;;  %v1508_v6 = vsel %vm4456_vm8, %v4178_v10, %v1504_v29  ;;  %vm1521_vm9 = vweird.f32 %v4312_v58 }
 0x204   : > { %v5555_v11 = vand.u32 2147483647, %v4022_v55  ;;  %vm4475_vm7 = vcmp.eq.f32.partialorder %v1539_v4, 8.507059e+37  ;;  %v1548_v2 = vmul.f32 %v4367_v36, %v1547_v54  ;;  %v4480_v42 = vpop.eup %2243  ;;  %vm1536_vm10 = vweird.f32 %v4347_v9  ;;  %vm4508_vm3 = vmor %vm1520_vm5, %vm1521_vm9 }
 0x205   : > { %v1569_v10 = vand.u32 2147483647, %v4035_v61  ;;  %v1571_v33 = vand.u32 2147483648, %v4035_v61  ;;  %2247 = vrcp.f32 %v4048_v1  ;;  %v1519_v50 = vadd.f32 %v4312_v58, %v1518_v16 }
 0x206   : > { %vm4471_vm12 = vcmp.eq.f32.partialorder %v5555_v11, 8.507059e+37  ;;  %v1534_v41 = vadd.f32 %v4347_v9, %v1533_v25  ;;  %vm4488_vm15 = vcmp.eq.f32.partialorder %v1554_v26, 8.507059e+37  ;;  %v1557_v7 = vor.u32 1.1754944e-38, %v1556_v43 }
 0x207   : > { %v1576_v15 = vmul.f32 %v4480_v42, %v4041_v14  ;;  %v4497_v38 = vsel %vm4394_vm0, %v4152_v19, %v1508_v6  ;;  %vm1551_vm1 = vweird.f32 %v4367_v36  ;;  %v1563_v30 = vmul.f32 %v4413_v53, %v1562_v28  ;;  %vm4519_vm0 = vmor %vm1535_vm6, %vm1536_vm10  ;;  %v5593_v6 = vld [vmem:[#allocation143_spill] sm:$0xff] }
 0x208   : > { %vm1565_vm2 = vweird.f32 %v4035_v61  ;;  %v4502_v57 = vpop.eup %2245  ;;  %v1549_v5 = vadd.f32 %v4367_v36, %v1548_v2  ;;  %v1586_v40 = vand.u32 2147483648, %v4041_v14  ;;  %2249 = vrcp.f32 %v4053_v60  ;;  %vm4545_vm11 = vmor %vm1550_vm14, %vm1551_vm1 }
 0x209   : > { %v1577_v19 = vsub.f32 1.0, %v1576_v15  ;;  %vm4523_vm4 = vcmp.eq.f32.partialorder %v1569_v10, 8.507059e+37  ;;  %v1572_v27 = vor.u32 1.1754944e-38, %v1571_v33  ;;  %v1584_v24 = vand.u32 2147483647, %v4041_v14 }
 0x20a   : > { %v1591_v59 = vmul.f32 %v4502_v57, %v4046_v21  ;;  %v1523_v4 = vsel %vm4508_vm3, %v4312_v58, %v1519_v50  ;;  %v1538_v13 = vsel %vm4519_vm0, %v4347_v9, %v1534_v41  ;;  %vm1566_vm13 = vweird.f32 %v4413_v53 }
 0x20b   : > { %vm1580_vm5 = vweird.f32 %v4041_v14  ;;  %v1599_v52 = vand.u32 2147483647, %v4046_v21  ;;  %v4539_v23 = vpop.eup %2247  ;;  %v1564_v58 = vadd.f32 %v4413_v53, %v1563_v30  ;;  %v1601_v9 = vand.u32 2147483648, %v4046_v21  ;;  %vm4575_vm14 = vmor %vm1565_vm2, %vm1566_vm13 }
 0x20c   : > { %v1592_v22 = vsub.f32 1.0, %v1591_v59  ;;  %2251 = vrcp.f32 %v4061_v12  ;;  %v1553_v29 = vsel %vm4545_vm11, %v4367_v36, %v1549_v5  ;;  %v1578_v54 = vmul.f32 %v4480_v42, %v1577_v19  ;;  %v5579_v19 = vld [vmem:[#allocation141_spill] sm:$0xff] }
 0x20d   : > { %v1587_v18 = vor.u32 1.1754944e-38, %v1586_v40  ;;  %v1606_v56 = vmul.f32 %v4539_v23, %v4048_v1  ;;  %v4561_v26 = vsel %vm4471_vm12, %v4286_v3, %v1523_v4  ;;  %v4565_v0 = vsel %vm4475_vm7, %v1542_v46, %v1538_v13  ;;  %v5574_v46 = vld [vmem:[#allocation140_spill] sm:$0xff] }
 0x20e   : > { %v1593_v16 = vmul.f32 %v4502_v57, %v1592_v22  ;;  %vm1595_vm6 = vweird.f32 %v4046_v21  ;;  %v4569_v36 = vpop.eup %2249  ;;  %vm1581_vm8 = vweird.f32 %v4480_v42  ;;  %vm4580_vm9 = vcmp.eq.f32.partialorder %v1584_v24, 8.507059e+37  ;;  %v5586_v22 = vld [vmem:[#allocation142_spill] sm:$0xff] }
 0x20f   : > { %v1607_v43 = vsub.f32 1.0, %v1606_v56  ;;  %v1616_v48 = vand.u32 2147483648, %v4048_v1  ;;  %2253 = vrcp.f32 %v5574_v46  ;;  %v4588_v28 = vsel %vm4488_vm15, %v1557_v7, %v1553_v29  ;;  %vm4619_vm1 = vmor %vm1580_vm5, %vm1581_vm8 }
 0x210   : > { %v1568_v61 = vsel %vm4575_vm14, %v4413_v53, %v1564_v58  ;;  %vm4593_vm12 = vcmp.eq.f32.partialorder %v1599_v52, 8.507059e+37  ;;  %v1602_v11 = vor.u32 1.1754944e-38, %v1601_v9  ;;  %v1621_v63 = vmul.f32 %v4569_v36, %v4053_v60 }
 0x211   : > { %v1579_v49 = vadd.f32 %v4480_v42, %v1578_v54  ;;  %vm1610_vm7 = vweird.f32 %v4048_v1  ;;  %v1614_v2 = vand.u32 2147483647, %v4048_v1  ;;  %v1629_v10 = vand.u32 2147483647, %v4053_v60 }
 0x212   : > { %v4603_v33 = vpop.eup %2251  ;;  %v1594_v53 = vadd.f32 %v4502_v57, %v1593_v16  ;;  %vm1596_vm10 = vweird.f32 %v4502_v57  ;;  %v1608_v50 = vmul.f32 %v4539_v23, %v1607_v43  ;;  %v1622_v41 = vsub.f32 1.0, %v1621_v63 }
 0x213   : > { %v4610_v35 = vsel %vm4523_vm4, %v1572_v27, %v1568_v61  ;;  %v1617_v7 = vor.u32 1.1754944e-38, %v1616_v48  ;;  %vm1625_vm15 = vweird.f32 %v4053_v60  ;;  %v1636_v15 = vmul.f32 %v4603_v33, %v4061_v12  ;;  %vm4634_vm3 = vmor %vm1595_vm6, %vm1596_vm10 }
 0x214   : > { %vm1611_vm2 = vweird.f32 %v4539_v23  ;;  %v1623_v17 = vmul.f32 %v4569_v36, %v1622_v41  ;;  %v1631_v5 = vand.u32 2147483648, %v4053_v60  ;;  %2255 = vrcp.f32 %v5579_v19 }
 0x215   : > { %v4627_v40 = vpop.eup %2253  ;;  %v1583_v31 = vsel %vm4619_vm1, %v4480_v42, %v1579_v49  ;;  %vm4638_vm0 = vcmp.eq.f32.partialorder %v1614_v2, 8.507059e+37  ;;  %vm4642_vm4 = vcmp.eq.f32.partialorder %v1629_v10, 8.507059e+37  ;;  %v1637_v24 = vsub.f32 1.0, %v1636_v15  ;;  %vm4673_vm11 = vmor %vm1610_vm7, %vm1611_vm2  ;;  %v5596_v15 = vld [vmem:[#allocation144_spill] sm:$0xff] }
 0x216   : > { %vm1640_vm13 = vweird.f32 %v4061_v12  ;;  %v1644_v59 = vand.u32 2147483647, %v4061_v12  ;;  %v1646_v42 = vand.u32 2147483648, %v4061_v12  ;;  %v1598_v21 = vsel %vm4634_vm3, %v4502_v57, %v1594_v53 }
 0x217   : > { %v1609_v4 = vadd.f32 %v4539_v23, %v1608_v50  ;;  %vm1626_vm5 = vweird.f32 %v4569_v36  ;;  %v1651_v13 = vmul.f32 %v4627_v40, %v5574_v46  ;;  %v1624_v52 = vadd.f32 %v4569_v36, %v1623_v17 }
 0x218   : > { %v1638_v34 = vmul.f32 %v4603_v33, %v1637_v24  ;;  %v1659_v58 = vand.u32 2147483647, %v5574_v46  ;;  %2257 = vrcp.f32 %v5586_v22  ;;  %v4662_v9 = vsel %vm4580_vm9, %v1587_v18, %v1583_v31  ;;  %vm4692_vm9 = vmor %vm1625_vm15, %vm1626_vm5 }
 0x219   : > { %v1632_v57 = vor.u32 1.1754944e-38, %v1631_v5  ;;  %v1652_v29 = vsub.f32 1.0, %v1651_v13  ;;  %v1661_v54 = vand.u32 2147483648, %v5574_v46  ;;  %v4667_v56 = vsel %vm4593_vm12, %v1602_v11, %v1598_v21  ;;  %v5603_v21 = vld [vmem:[#allocation9_spill] sm:$0xff] }
 0x21a   : > { %vm1641_vm6 = vweird.f32 %v4603_v33  ;;  %vm4678_vm14 = vcmp.eq.f32.partialorder %v1644_v59, 8.507059e+37  ;;  %v1647_v25 = vor.u32 1.1754944e-38, %v1646_v42  ;;  %vm1655_vm8 = vweird.f32 %v5574_v46  ;;  %v4683_v3 = vpop.eup %2255 }
 0x21b   : > { %v1613_v43 = vsel %vm4673_vm11, %v4539_v23, %v1609_v4  ;;  %v1653_v48 = vmul.f32 %v4627_v40, %v1652_v29  ;;  %v1674_v61 = vand.u32 2147483647, %v5579_v19  ;;  %2259 = vrcp.f32 %v5593_v6  ;;  %vm4730_vm15 = vmor %vm1640_vm13, %vm1641_vm6  ;;  %v5606_v29 = vld [vmem:[#allocation33_spill] sm:$0xff] }
 0x21c   : > { %v1628_v11 = vsel %vm4692_vm9, %v4569_v36, %v1624_v52  ;;  %v1639_v23 = vadd.f32 %v4603_v33, %v1638_v34  ;;  %vm4703_vm12 = vcmp.eq.f32.partialorder %v1659_v58, 8.507059e+37  ;;  %v1666_v60 = vmul.f32 %v4683_v3, %v5579_v19 }
 0x21d   : > { %v1676_v49 = vand.u32 2147483648, %v5579_v19  ;;  %vm1656_vm7 = vweird.f32 %v4627_v40  ;;  %v1662_v2 = vor.u32 1.1754944e-38, %v1661_v54  ;;  %vm1670_vm10 = vweird.f32 %v5579_v19 }
 0x21e   : > { %v1691_v10 = vand.u32 2147483648, %v5586_v22  ;;  %v4713_v53 = vpop.eup %2257  ;;  %v1654_v36 = vadd.f32 %v4627_v40, %v1653_v48  ;;  %v1667_v50 = vsub.f32 1.0, %v1666_v60  ;;  %v1689_v41 = vand.u32 2147483647, %v5586_v22 }
 0x21f   : > { %2261 = vrcp.f32 %v5596_v15  ;;  %v4720_v30 = vsel %vm4638_vm0, %v1617_v7, %v1613_v43  ;;  %v4724_v17 = vsel %vm4642_vm4, %v1632_v57, %v1628_v11  ;;  %v1681_v31 = vmul.f32 %v4713_v53, %v5586_v22  ;;  %vm4752_vm0 = vmor %vm1655_vm8, %vm1656_vm7 }
 0x220   : > { %vm1685_vm1 = vweird.f32 %v5586_v22  ;;  %v1643_v7 = vsel %vm4730_vm15, %v4603_v33, %v1639_v23  ;;  %v1668_v14 = vmul.f32 %v4683_v3, %v1667_v50  ;;  %vm1671_vm2 = vweird.f32 %v4683_v3 }
 0x221   : > { %vm4742_vm3 = vcmp.eq.f32.partialorder %v1674_v61, 8.507059e+37  ;;  %v1677_v12 = vor.u32 1.1754944e-38, %v1676_v49  ;;  %v4746_v27 = vpop.eup %2259  ;;  %v1682_v33 = vsub.f32 1.0, %v1681_v31  ;;  %v1692_v59 = vor.u32 1.1754944e-38, %v1691_v10  ;;  %vm4790_vm6 = vmor %vm1670_vm10, %vm1671_vm2 }
 0x222   : > { %v1706_v42 = vand.u32 2147483648, %v5593_v6  ;;  %2263 = vrcp.f32 %v5603_v21  ;;  %v1658_v4 = vsel %vm4752_vm0, %v4627_v40, %v1654_v36  ;;  %v1669_v13 = vadd.f32 %v4683_v3, %v1668_v14  ;;  %v5613_v36 = vld [vmem:[#allocation10_spill] sm:$0xff] }
 0x223   : > { %vm4762_vm4 = vcmp.eq.f32.partialorder %v1689_v41, 8.507059e+37  ;;  %v1696_v46 = vmul.f32 %v4746_v27, %v5593_v6  ;;  %vm1700_vm13 = vweird.f32 %v5593_v6  ;;  %v1704_v34 = vand.u32 2147483647, %v5593_v6  ;;  %v5620_v6 = vld [vmem:[#allocation34_spill] sm:$0xff] }
 0x224   : > { %v4772_v58 = vsel %vm4678_vm14, %v1647_v25, %v1643_v7  ;;  %v1683_v57 = vmul.f32 %v4713_v53, %v1682_v33  ;;  %v1721_v40 = vand.u32 2147483648, %v5596_v15  ;;  %2265 = vrcp.f32 %v5606_v29 }
 0x225   : > { %v4777_v54 = vpop.eup %2261  ;;  %vm1686_vm5 = vweird.f32 %v4713_v53  ;;  %v1697_v16 = vsub.f32 1.0, %v1696_v46  ;;  %vm1715_vm11 = vweird.f32 %v5596_v15  ;;  %v1719_v43 = vand.u32 2147483647, %v5596_v15 }
 0x226   : > { %v4784_v18 = vsel %vm4703_vm12, %v1662_v2, %v1658_v4  ;;  %v1684_v1 = vadd.f32 %v4713_v53, %v1683_v57  ;;  %v1707_v48 = vor.u32 1.1754944e-38, %v1706_v42  ;;  %v1711_v61 = vmul.f32 %v4777_v54, %v5596_v15  ;;  %vm4814_vm9 = vmor %vm1685_vm1, %vm1686_vm5 }
 0x227   : > { %v1673_v11 = vsel %vm4790_vm6, %v4683_v3, %v1669_v13  ;;  %v1698_v23 = vmul.f32 %v4746_v27, %v1697_v16  ;;  %vm4801_vm14 = vcmp.eq.f32.partialorder %v1704_v34, 8.507059e+37  ;;  %vm1730_vm8 = vweird.f32 %v5603_v21  ;;  %v5627_v3 = vld [vmem:[#allocation11_spill] sm:$0xff] }
 0x228   : > { %v1734_v19 = vand.u32 2147483647, %v5603_v21  ;;  %v1736_v60 = vand.u32 2147483648, %v5603_v21  ;;  %v4808_v49 = vpop.eup %2263  ;;  %vm1701_vm12 = vweird.f32 %v4746_v27  ;;  %v1712_v2 = vsub.f32 1.0, %v1711_v61 }
 0x229   : > { %v1722_v10 = vor.u32 1.1754944e-38, %v1721_v40  ;;  %2267 = vrcp.f32 %v5613_v36  ;;  %v1688_v50 = vsel %vm4814_vm9, %v4713_v53, %v1684_v1  ;;  %v1699_v41 = vadd.f32 %v4746_v27, %v1698_v23  ;;  %vm4852_vm2 = vmor %vm1700_vm13, %vm1701_vm12 }
 0x22a   : > { %vm4824_vm7 = vcmp.eq.f32.partialorder %v1719_v43, 8.507059e+37  ;;  %v1726_v22 = vmul.f32 %v4808_v49, %v5603_v21  ;;  %vm1745_vm10 = vweird.f32 %v5606_v29  ;;  %v2266_v31 = vpop.eup %2265  ;;  %v4833_v7 = vsel %vm4742_vm3, %v1677_v12, %v1673_v11 }
 0x22b   : > { %v1713_v14 = vmul.f32 %v4777_v54, %v1712_v2  ;;  %v1749_v53 = vand.u32 2147483647, %v5606_v29  ;;  %v1751_v24 = vand.u32 2147483648, %v5606_v29  ;;  %vm1716_vm15 = vweird.f32 %v4777_v54 }
 0x22c   : > { %v1727_v33 = vsub.f32 1.0, %v1726_v22  ;;  %vm4839_vm1 = vcmp.eq.f32.partialorder %v1734_v19, 8.507059e+37  ;;  %v1737_v4 = vor.u32 1.1754944e-38, %v1736_v60  ;;  %v1741_v13 = vmul.f32 %v2266_v31, %v5606_v29 }
 0x22d   : > { %v4846_v55 = vsel %vm4762_vm4, %v1692_v59, %v1688_v50  ;;  %v1714_v46 = vadd.f32 %v4777_v54, %v1713_v14  ;;  %vm1731_vm3 = vweird.f32 %v4808_v49  ;;  %v1764_v34 = vand.u32 2147483647, %v5613_v36  ;;  %vm4869_vm4 = vmor %vm1715_vm11, %vm1716_vm15 }
 0x22e   : > { %v1703_v52 = vsel %vm4852_vm2, %v4746_v27, %v1699_v41  ;;  %v1728_v59 = vmul.f32 %v4808_v49, %v1727_v33  ;;  %v1742_v57 = vsub.f32 1.0, %v1741_v13  ;;  %vm1760_vm0 = vweird.f32 %v5613_v36  ;;  %vm4891_vm11 = vmor %vm1730_vm8, %vm1731_vm3 }
 0x22f   : > { %2269 = vrcp.f32 %v5620_v6  ;;  %v2268_v40 = vpop.eup %2267  ;;  %vm1746_vm13 = vweird.f32 %v2266_v31  ;;  %vm4873_vm5 = vcmp.eq.f32.partialorder %v1749_v53, 8.507059e+37  ;;  %v1752_v27 = vor.u32 1.1754944e-38, %v1751_v24 }
 0x230   : > { %v1766_v25 = vand.u32 2147483648, %v5613_v36  ;;  %v1718_v1 = vsel %vm4869_vm4, %v4777_v54, %v1714_v46  ;;  %v1729_v61 = vadd.f32 %v4808_v49, %v1728_v59  ;;  %v1743_v11 = vmul.f32 %v2266_v31, %v1742_v57  ;;  %v5633_v59 = vld [vmem:[#allocation12_spill] sm:$0xff] }
 0x231   : > { %v1756_v15 = vmul.f32 %v2268_v40, %v5613_v36  ;;  %v4885_v23 = vsel %vm4801_vm14, %v1707_v48, %v1703_v52  ;;  %v1779_v60 = vand.u32 2147483647, %v5620_v6  ;;  %v1781_v54 = vand.u32 2147483648, %v5620_v6  ;;  %vm1747_vm14 = vmor %vm1745_vm10, %vm1746_vm13 }
 0x232   : > { %2271 = vrcp.f32 %v5627_v3  ;;  %v1733_v63 = vsel %vm4891_vm11, %v4808_v49, %v1729_v61  ;;  %v1744_v48 = vadd.f32 %v2266_v31, %v1743_v11  ;;  %vm4901_vm6 = vcmp.eq.f32.partialorder %v1764_v34, 8.507059e+37  ;;  %v5630_v49 = vld [vmem:[#allocation35_spill] sm:$0xff] }
 0x233   : > { %v1757_v2 = vsub.f32 1.0, %v1756_v15  ;;  %v4907_v21 = vsel %vm4824_vm7, %v1722_v10, %v1718_v1  ;;  %v1767_v41 = vor.u32 1.1754944e-38, %v1766_v25  ;;  %vm1775_vm8 = vweird.f32 %v5620_v6 }
 0x234   : > { %v1796_v22 = vand.u32 2147483648, %v5627_v3  ;;  %2273 = vrcp.f32 %v5630_v49  ;;  %v1748_v53 = vsel %vm1747_vm14, %v2266_v31, %v1744_v48  ;;  %vm1761_vm9 = vweird.f32 %v2268_v40 }
 0x235   : > { %v2270_v14 = vpop.eup %2269  ;;  %v1758_v24 = vmul.f32 %v2268_v40, %v1757_v2  ;;  %v1794_v33 = vand.u32 2147483647, %v5627_v3  ;;  %v4918_v10 = vsel %vm4839_vm1, %v1737_v4, %v1733_v63  ;;  %vm4921_vm12 = vcmp.eq.f32.partialorder %v1779_v60, 8.507059e+37  ;;  %vm1762_vm10 = vmor %vm1760_vm0, %vm1761_vm9 }
 0x236   : > { %v1771_v29 = vmul.f32 %v2270_v14, %v5620_v6  ;;  %v1782_v13 = vor.u32 1.1754944e-38, %v1781_v54  ;;  %v4927_v12 = vsel %vm4873_vm5, %v1752_v27, %v1748_v53  ;;  %vm1790_vm7 = vweird.f32 %v5627_v3 }
 0x237   : > { %v1759_v31 = vadd.f32 %v2268_v40, %v1758_v24  ;;  %v1809_v46 = vand.u32 2147483647, %v5630_v49  ;;  %v1811_v42 = vand.u32 2147483648, %v5630_v49  ;;  %vm1776_vm15 = vweird.f32 %v2270_v14 }
 0x238   : > { %v2272_v4 = vpop.eup %2271  ;;  %v1772_v34 = vsub.f32 1.0, %v1771_v29  ;;  %v1797_v52 = vor.u32 1.1754944e-38, %v1796_v22  ;;  %2275 = vrcp.f32 %v5633_v59  ;;  %vm4936_vm2 = vcmp.eq.f32.partialorder %v1794_v33, 8.507059e+37  ;;  %vm1777_vm13 = vmor %vm1775_vm8, %vm1776_vm15 }
 0x239   : > { %v1763_v57 = vsel %vm1762_vm10, %v2268_v40, %v1759_v31  ;;  %v1786_v16 = vmul.f32 %v2272_v4, %v5627_v3  ;;  %vm1791_vm1 = vweird.f32 %v2272_v4  ;;  %vm1805_vm3 = vweird.f32 %v5630_v49 }
 0x23a   : > { %v1824_v27 = vand.u32 2147483647, %v5633_v59  ;;  %v2274_v25 = vpop.eup %2273  ;;  %v4944_v36 = vsel %vm4901_vm6, %v1767_v41, %v1763_v57  ;;  %v1773_v1 = vmul.f32 %v2270_v14, %v1772_v34  ;;  %v1812_v61 = vor.u32 1.1754944e-38, %v1811_v42  ;;  %vm1792_vm6 = vmor %vm1790_vm7, %vm1791_vm1 }
 0x23b   : > { %v1826_v40 = vand.u32 2147483648, %v5633_v59  ;;  %v1787_v11 = vsub.f32 1.0, %v1786_v16  ;;  %v1801_v15 = vmul.f32 %v2274_v25, %v5630_v49  ;;  %vm1806_vm0 = vweird.f32 %v2274_v25 }
 0x23c   : > { %vm4948_vm4 = vcmp.eq.f32.partialorder %v1809_v46, 8.507059e+37  ;;  %v1862_v60 = vrot.slane %v4296_v51, 7  ;;  %v1774_v54 = vadd.f32 %v2270_v14, %v1773_v1  ;;  %v1863_v48 = vrot.slane %v4301_v39, 6  ;;  %vm1807_vm8 = vmor %vm1805_vm3, %vm1806_vm0 }
 0x23d   : > { %v1827_v63 = vor.u32 1.1754944e-38, %v1826_v40  ;;  %v1864_v2 = vrot.slane %v4317_v44, 5  ;;  %v1788_v50 = vmul.f32 %v2272_v4, %v1787_v11  ;;  %v1802_v41 = vsub.f32 1.0, %v1801_v15 }
 0x23e   : > { %vm1820_vm5 = vweird.f32 %v5633_v59  ;;  %v1865_v22 = vrot.slane %v4372_v62, 4  ;;  %v1866_v53 = vrot.slane %v4377_v47, 3  ;;  %v2276_v24 = vpop.eup %2275  ;;  %v1778_v51 = vsel %vm1777_vm13, %v2270_v14, %v1774_v54 }
 0x23f   : > { %v1867_v33 = vrot.slane %v4384_v32, 2  ;;  %v1868_v39 = vrot.slane %v4445_v8, 1  ;;  %v1869_v44 = vrot.slane %v4463_v45, 7  ;;  %v4966_v6 = vsel %vm4921_vm12, %v1782_v13, %v1778_v51 }
 0x240   : > { %v1789_v29 = vadd.f32 %v2272_v4, %v1788_v50  ;;  %v1803_v31 = vmul.f32 %v2274_v25, %v1802_v41  ;;  %v1816_v46 = vmul.f32 %v2276_v24, %v5633_v59  ;;  %vm4969_vm11 = vcmp.eq.f32.partialorder %v1824_v27, 8.507059e+37 }
 0x241   : > { %vm1821_vm14 = vweird.f32 %v2276_v24  ;;  %v1870_v47 = vrot.slane %v4497_v38, 6  ;;  %v1871_v32 = vrot.slane %v4561_v26, 5  ;;  %v1872_v8 = vrot.slane %v4565_v0, 4 }
 0x242   : > { %v1793_v45 = vsel %vm1792_vm6, %v2272_v4, %v1789_v29  ;;  %v1804_v14 = vadd.f32 %v2274_v25, %v1803_v31  ;;  %v1817_v5 = vsub.f32 1.0, %v1816_v46  ;;  %v1873_v13 = vrot.slane %v4588_v28, 3  ;;  %vm1822_vm9 = vmor %vm1820_vm5, %vm1821_vm14 }
 0x243   : > { %v4982_v42 = vsel %vm4936_vm2, %v1797_v52, %v1793_v45  ;;  %v1874_v3 = vrot.slane %v4610_v35, 2  ;;  %v1875_v38 = vrot.slane %v4662_v9, 1  ;;  %v1876_v26 = vrot.slane %v4720_v30, 7 }
 0x244   : > { %v1808_v0 = vsel %vm1807_vm8, %v2274_v25, %v1804_v14  ;;  %v1818_v4 = vmul.f32 %v2276_v24, %v1817_v5  ;;  %v1877_v34 = vrot.slane %v4724_v17, 6  ;;  %v1878_v28 = vrot.slane %v4772_v58, 5 }
 0x245   : > { %v1813_v52 = vsel %vm4948_vm4, %v1812_v61, %v1808_v0  ;;  %v1879_v57 = vrot.slane %v4784_v18, 4  ;;  %v1880_v49 = vrot.slane %v4833_v7, 3  ;;  %v1881_v35 = vrot.slane %v4846_v55, 2 }
 0x246   : > { %v1819_v9 = vadd.f32 %v2276_v24, %v1818_v4  ;;  %v1882_v30 = vrot.slane %v4885_v23, 1  ;;  %v1883_v16 = vrot.slane %v4918_v10, 7  ;;  %v1884_v43 = vrot.slane %v4927_v12, 6 }
 0x247   : > { %v1885_v17 = vrot.slane %v4944_v36, 5  ;;  %v1886_v58 = vrot.slane %v4966_v6, 4  ;;  %v1887_v18 = vrot.slane %v4982_v42, 3  ;;  %v1888_v7 = vrot.slane %v1813_v52, 2 }
 0x248   : > { %v1823_v55 = vsel %vm1822_vm9, %v2276_v24, %v1819_v9  ;;  %vm1890_vm12 = vcmask 1040384   ;;  %vm1892_vm7 = vcmask 1042434   ;;  %vm1894_vm10 = vcmask 1041408  }
 0x249   : > { %v1828_v23 = vsel %vm4969_vm11, %v1827_v63, %v1823_v55  ;;  %v1891_v10 = vsel %vm1890_vm12, %v4291_v37, %v1862_v60  ;;  %v1893_v12 = vsel %vm1892_vm7, %v1863_v48, %v1864_v2  ;;  %vm1896_vm15 = vcmask 1044484  }
 0x24a   : > { %v1889_v59 = vrot.slane %v1828_v23, 1  ;;  %v1895_v27 = vsel %vm1894_vm10, %v1891_v10, %v1893_v12  ;;  %v1897_v25 = vsel %vm1896_vm15, %v1865_v22, %v1866_v53  ;;  %vm1898_vm1 = vcmask 1046534  }
 0x24b   : > { %v1899_v36 = vsel %vm1898_vm1, %v1867_v33, %v1868_v39  ;;  %vm1900_vm2 = vcmask 1045508   ;;  %vm1902_vm3 = vcmask 1043456   ;;  %v1904_v1 = vsel %vm1890_vm12, %v4450_v20, %v1869_v44 }
 0x24c   : > { %v1901_v37 = vsel %vm1900_vm2, %v1897_v25, %v1899_v36  ;;  %v1905_v61 = vsel %vm1892_vm7, %v1870_v47, %v1871_v32  ;;  %v1907_v40 = vsel %vm1896_vm15, %v1872_v8, %v1873_v13  ;;  %v1908_v11 = vsel %vm1898_vm1, %v1874_v3, %v1875_v38 }
 0x24d   : > { %v1903_v15 = vsel %vm1902_vm3, %v1895_v27, %v1901_v37  ;;  %v1906_v19 = vsel %vm1894_vm10, %v1904_v1, %v1905_v61  ;;  %v1909_v20 = vsel %vm1900_vm2, %v1907_v40, %v1908_v11  ;;  %v1911_v60 = vsel %vm1890_vm12, %v4667_v56, %v1876_v26 }
 0x24e   : > { %v1910_v54 = vsel %vm1902_vm3, %v1906_v19, %v1909_v20  ;;  %v1912_v63 = vsel %vm1892_vm7, %v1877_v34, %v1878_v28  ;;  %v1914_v48 = vsel %vm1896_vm15, %v1879_v57, %v1880_v49  ;;  %v1915_v2 = vsel %vm1898_vm1, %v1881_v35, %v1882_v30  ;;  %1929 = vst [vmem:[%s209_s5] sm:$0xff] %v1903_v15 }
 0x24f   : > { %v1913_v50 = vsel %vm1894_vm10, %v1911_v60, %v1912_v63  ;;  %v1916_v41 = vsel %vm1900_vm2, %v1914_v48, %v1915_v2  ;;  %v1918_v56 = vsel %vm1890_vm12, %v4907_v21, %v1883_v16  ;;  %v1919_v22 = vsel %vm1892_vm7, %v1884_v43, %v1885_v17  ;;  %1930 = vst [vmem:[%s209_s5 + $0x8] sm:$0xff] %v1910_v54 }
 0x250   : > { %v1917_v53 = vsel %vm1902_vm3, %v1913_v50, %v1916_v41  ;;  %v1920_v24 = vsel %vm1894_vm10, %v1918_v56, %v1919_v22  ;;  %v1921_v51 = vsel %vm1896_vm15, %v1886_v58, %v1887_v18  ;;  %v1922_v33 = vsel %vm1898_vm1, %v1888_v7, %v1889_v59 }
 0x251   : > { %v1923_v39 = vsel %vm1900_vm2, %v1921_v51, %v1922_v33  ;;  %1931 = vst [vmem:[%s209_s5 + $0x10] sm:$0xff] %v1917_v53 }
 0x252   : > { %v1924_v44 = vsel %vm1902_vm3, %v1920_v24, %v1923_v39 }
 0x253   : > { %1932 = vst [vmem:[%s209_s5 + $0x18] sm:$0xff] %v1924_v44 }
 0x254   : > { %2334 = shalt.err (!%p2331_p13)
}
 0x255   : > { %2083 = dma.vmem_to_hbm [thread:$0]  (%p2468_p9), %s1949_s6, 512, %s1951_s25, %s1934_s7  }
 0x256 PF: > { %s1962_s2 = sand.u32 1, %s2369_s14   ;;  %p2090_p0 = pnand %p2037_p12, %p2475_p11 }
 0x257   : > { %s1963_s22 = scalar_lea.sflag [#allocation5], %s1962_s2 }
 0x258   : > { %p2091_p1 = pneg %p2090_p0 }
 0x25a   : > { %2364 = dma.done.wait (%p2091_p1), %s1963_s22, 512  }
 0x25b   : > { %2366 = vsyncadd (%p2091_p1), %s1963_s22, 4294966784  ;;  %s20_s19 = sadd.s32 1, %s2389_s19   ;;  %s5640_s14 = smov %s2373_s15 }
 0x25c   : > { %p17_p2 = scmp.ge.s32.totalorder %s20_s19, 4   ;;  %s5641_s15 = smov %s2377_s16 }
 0x25d   : > { %s5642_s16 = smov %s2473_s27  ;;  %s5643_s17 = smov %s2385_s18 }
 0x25e   : > { %s5644_s18 = smov %s5646_s21  ;;  %19 = sbr.rel (!%p17_p2) target bundleno = 8 (0x8), region = 77 }
 0x263   :  { %1969 = vsyncpa [#allocation4], 1 }
 0x264   :  { %1971 = vsyncpa [#allocation4 + $0x1], 1 }
 0x265   :  { %1972 = vsyncpa [#allocation5], 1 }
 0x266   :  { %1974 = vsyncpa [#allocation5 + $0x1], 1 }

</bundles_post_ra>
